<compile_context>
chip_gen: v6e
topology: v6e:2x2x1
jax: 0.10.0
libtpu: 0.0.40
codegen_flags: <defaults>
</compile_context>

<pallas_src>
import math

import numpy as np
import jax
import jax.numpy as jnp
from jax import lax
from jax.experimental import pallas as pl
from jax.experimental.pallas import tpu as pltpu

# ---------------------------------------------------------------------------
# Toy, deterministic NeoX-style config (stands in for AutoModel config).
# ---------------------------------------------------------------------------
VOCAB = 50            # vocab size
H = 128               # hidden size (config.n_embd) -- lane-dense (128 lanes)
NH = 4                # attention heads
DH = H // NH          # 32 -> head slices fall on 32-lane boundaries
L = 2                 # transformer layers
F = 4 * H             # MLP intermediate size (512)
T = 8                 # sequence length
BS = 2                # number of (chosen, rejected) pairs
B = 2 * BS            # full batch (chosen ++ rejected)
HALF = B // 2         # sequences per grid step of the transformer call
PAD_ID = 0            # self.PAD_ID (eos/pad token id)
OUT_LANES = 128       # packed scalar-output width (lane-dense single store)
MATMUL_DTYPE = jnp.bfloat16   # MXU inputs; statistics / elementwise stay f32

STACKED = ["ln1_w", "ln1_b", "ln2_w", "ln2_b",
           "wq", "bq", "wk", "bk", "wv", "bv", "wo", "bo",
           "w1", "b1", "w2", "b2"]
FINAL = ["lnf_w", "lnf_b"]
PNAMES = STACKED + FINAL


# ---------------------------------------------------------------------------
# Pure math shared by the Pallas kernels and the plain-JAX reference.
# ---------------------------------------------------------------------------
def _layer_norm(x, w, b, eps=1e-5):
    mean = jnp.mean(x, axis=-1, keepdims=True)
    var = jnp.mean(jnp.square(x - mean), axis=-1, keepdims=True)
    return (x - mean) * lax.rsqrt(var + eps) * w + b


def _softmax_last(s, in_kernel):
    s = s - jnp.max(s, axis=-1, keepdims=True)
    e = jnp.exp(s)
    d = jnp.sum(e, axis=-1, keepdims=True)
    if in_kernel:
        return e * pl.reciprocal(d, approx=True)      # EUP slot, ~free
    return e / d


def neox_layer(x_flat, lp, mask_full, nb, in_kernel):
    """One GPT-NeoX block (parallel residual). x_flat: (nb*T, H) float32."""
    scale = 1.0 / math.sqrt(DH)

    h1 = _layer_norm(x_flat, lp["ln1_w"], lp["ln1_b"])
    h1b = h1.astype(MATMUL_DTYPE)
    # separate q/k/v projections (no 3H-wide activation lane-slicing)
    q = jnp.dot(h1b, lp["wq"], preferred_element_type=jnp.float32) + lp["bq"]
    k = jnp.dot(h1b, lp["wk"], preferred_element_type=jnp.float32) + lp["bk"]
    v = jnp.dot(h1b, lp["wv"], preferred_element_type=jnp.float32) + lp["bv"]
    qb = q.reshape(nb, T, H).astype(MATMUL_DTYPE)
    kb = k.reshape(nb, T, H).astype(MATMUL_DTYPE)
    vb = v.reshape(nb, T, H).astype(MATMUL_DTYPE)

    head_outs = []
    for hd in range(NH):                       # unrolled at trace time (NH=4)
        sl = slice(hd * DH, (hd + 1) * DH)     # 32-lane-aligned head slice
        s = jnp.einsum('bqd,bkd->bqk', qb[:, :, sl], kb[:, :, sl],
                       preferred_element_type=jnp.float32)
        s = s * scale + mask_full              # hoisted additive causal mask
        p = _softmax_last(s, in_kernel)        # f32 statistics
        head_outs.append(jnp.einsum('bqk,bkd->bqd', p.astype(MATMUL_DTYPE),
                                    vb[:, :, sl],
                                    preferred_element_type=jnp.float32))
    o = jnp.concatenate(head_outs, axis=-1).reshape(nb * T, H)
    attn = jnp.dot(o.astype(MATMUL_DTYPE), lp["wo"],
                   preferred_element_type=jnp.float32) + lp["bo"]

    h2 = _layer_norm(x_flat, lp["ln2_w"], lp["ln2_b"])
    mlp_h = jax.nn.gelu(jnp.dot(h2.astype(MATMUL_DTYPE), lp["w1"],
                                preferred_element_type=jnp.float32) + lp["b1"])
    mlp = jnp.dot(mlp_h.astype(MATMUL_DTYPE), lp["w2"],
                  preferred_element_type=jnp.float32) + lp["b2"]
    return x_flat + attn + mlp                 # GPT-NeoX parallel residual


def neox_forward(x_flat, get_layer, lnf_w, lnf_b, nb, in_kernel):
    """x_flat: (nb*T, H) embedded tokens -> (nb*T, H) final hidden states."""
    causal = (lax.broadcasted_iota(jnp.int32, (1, T, T), 2)
              <= lax.broadcasted_iota(jnp.int32, (1, T, T), 1))
    mask_add = jnp.where(causal, 0.0, -1e30).astype(jnp.float32)
    mask_full = jnp.broadcast_to(mask_add, (nb, T, T))   # hoisted ONCE
    for l in range(L):
        x_flat = neox_layer(x_flat, get_layer(l), mask_full, nb, in_kernel)
    return _layer_norm(x_flat, lnf_w, lnf_b)


def pairwise_loss(rewards, ids, weight):
    """rewards/ids: (B, T); weight: (BS, 1). Returns (BS,1) columns."""
    c_rew, r_rew = rewards[:BS], rewards[BS:]
    cho, rej = ids[:BS], ids[BS:]
    it = lax.broadcasted_iota(jnp.int32, (BS, T), 1)

    c_ind = jnp.min(jnp.where(cho == PAD_ID, it, T), axis=1, keepdims=True)
    r_ind = jnp.min(jnp.where(rej == PAD_ID, it, T), axis=1, keepdims=True)
    end_ind = jnp.maximum(c_ind, r_ind)
    div_ind = jnp.min(jnp.where(cho != rej, it, T), axis=1, keepdims=True)

    mask = (it >= div_ind) & (it < end_ind)
    diff = c_rew - r_rew
    # -log(sigmoid(diff)) == softplus(-diff), numerically stable form
    nls = jnp.maximum(-diff, 0.0) + jnp.log(1.0 + jnp.exp(-jnp.abs(diff)))
    cnt = jnp.maximum(jnp.sum(mask.astype(jnp.float32), axis=1, keepdims=True),
                      1.0)
    loss_i = weight * jnp.sum(jnp.where(mask, nls, 0.0), axis=1,
                              keepdims=True) / cnt
    sel = it == (end_ind - 1)                    # truncated_reward[-1]
    ce = jnp.sum(jnp.where(sel, c_rew, 0.0), axis=1, keepdims=True)
    re = jnp.sum(jnp.where(sel, r_rew, 0.0), axis=1, keepdims=True)
    return loss_i, ce, re


# ---------------------------------------------------------------------------
# Pallas kernels.
# ---------------------------------------------------------------------------
def transformer_kernel(x_ref, *refs):
    """One grid step = one half of the batch (chosen OR rejected sequences)."""
    hidden_ref = refs[-1]
    prefs = dict(zip(PNAMES, refs[:-1]))

    def get_layer(l):           # static l: loads only layer l's weights
        return {name: prefs[name][l] for name in STACKED}

    h = neox_forward(x_ref[...], get_layer,
                     prefs["lnf_w"][...], prefs["lnf_b"][...],
                     nb=HALF, in_kernel=True)
    hidden_ref[...] = h                                  # (HALF*T, H), lane-dense


def reward_head_kernel(hidden_ref, vw_ref, ids_ref, weight_ref, packed_ref):
    hidden = hidden_ref[...]                             # (B, T, H) f32
    rewards = jnp.sum(hidden * vw_ref[...], axis=-1)     # v_head(h).squeeze(-1)
    loss_i, ce, re = pairwise_loss(rewards, ids_ref[...], weight_ref[...])
    # pack (per-pair loss, chosen_end, rejected_end) into ONE lane-dense row
    lane = lax.broadcasted_iota(jnp.int32, (BS, OUT_LANES), 1)
    packed_ref[...] = (jnp.where(lane == 0, loss_i, 0.0)
                       + jnp.where(lane == 1, ce, 0.0)
                       + jnp.where(lane == 2, re, 0.0))


# ---------------------------------------------------------------------------
# Wrapper.
# ---------------------------------------------------------------------------
def _full_spec(shape):
    nd = len(shape)
    return pl.BlockSpec(shape, lambda i, _nd=nd: (0,) * _nd)


def _cost_estimate(arrays, out_bytes):
    toks = B * T
    mm = 2 * L * toks * (4 * H * H + 2 * H * F)          # qkv,o + mlp matmuls
    att = 2 * L * B * NH * (2 * T * T * DH)              # scores + PV
    trans = L * (B * NH * T * T + toks * F) + toks       # exp (softmax/gelu)
    byts = sum(int(a.size) * a.dtype.itemsize for a in arrays) + out_bytes
    return pl.CostEstimate(flops=int(mm + att), transcendentals=int(trans),
                           bytes_accessed=int(byts))


def gpt_reward_model_forward(input_ids, params, weight=None):
    assert input_ids.ndim == 2
    if weight is None:
        weight = jnp.ones((BS, 1), jnp.float32)          # weight=None -> [1]*bs

    x_emb = jnp.take(params["emb"], input_ids, axis=0)   # (B, T, H) glue
    x_flat = x_emb.reshape(B * T, H)
    param_args = [params[name] for name in PNAMES]

    # --- call 1: transformer stack; grid=(2,) parallel over the two batch
    #     halves (both v7x TensorCores; sequential on v5e/v6e). ---------------
    hidden_flat = pl.pallas_call(
        transformer_kernel,
        grid=(2,),
        in_specs=[pl.BlockSpec((HALF * T, H), lambda i: (i, 0))]
                 + [_full_spec(p.shape) for p in param_args],
        out_specs=pl.BlockSpec((HALF * T, H), lambda i: (i, 0)),
        out_shape=jax.ShapeDtypeStruct((B * T, H), jnp.float32),
        compiler_params=pltpu.CompilerParams(
            dimension_semantics=("parallel",)),
        cost_estimate=_cost_estimate([x_flat] + param_args, B * T * H * 4),
    )(x_flat, *param_args)
    hidden = hidden_flat.reshape(B, T, H)

    # --- call 2: v_head + pairwise loss, one lane-dense packed output. -------
    vmem = pltpu.MemorySpace.VMEM
    packed = pl.pallas_call(
        reward_head_kernel,
        in_specs=[pl.BlockSpec(memory_space=vmem)] * 4,
        out_specs=pl.BlockSpec(memory_space=vmem),
        out_shape=jax.ShapeDtypeStruct((BS, OUT_LANES), jnp.float32),
    )(hidden, params["v_head"], input_ids.astype(jnp.int32), weight)

    return {
        "loss": jnp.sum(packed[:, 0]),
        "chosen_end_scores": packed[:, 1],
        "rejected_end_scores": packed[:, 2],
        "_hidden": hidden,
    }


# ---------------------------------------------------------------------------
# Deterministic parameter init (matmul weights stored bf16 for the MXU).
# ---------------------------------------------------------------------------
def init_params(key):
    ks = jax.random.split(key, 8)
    f32 = jnp.float32
    bf = MATMUL_DTYPE

    def nrm(k, shape, dtype=f32):
        return (0.02 * jax.random.normal(k, shape)).astype(dtype)

    return {
        "emb": nrm(ks[0], (VOCAB, H)),
        "ln1_w": jnp.ones((L, 1, H), f32), "ln1_b": jnp.zeros((L, 1, H), f32),
        "ln2_w": jnp.ones((L, 1, H), f32), "ln2_b": jnp.zeros((L, 1, H), f32),
        "wq": nrm(ks[1], (L, H, H), bf), "bq": jnp.zeros((L, 1, H), f32),
        "wk": nrm(ks[2], (L, H, H), bf), "bk": jnp.zeros((L, 1, H), f32),
        "wv": nrm(ks[3], (L, H, H), bf), "bv": jnp.zeros((L, 1, H), f32),
        "wo": nrm(ks[4], (L, H, H), bf), "bo": jnp.zeros((L, 1, H), f32),
        "w1": nrm(ks[5], (L, H, F), bf), "b1": jnp.zeros((L, 1, F), f32),
        "w2": nrm(ks[6], (L, F, H), bf), "b2": jnp.zeros((L, 1, H), f32),
        "lnf_w": jnp.ones((1, H), f32), "lnf_b": jnp.zeros((1, H), f32),
        "v_head": nrm(ks[7], (1, H)),       # nn.Linear(n_embd, 1, bias=False)
    }


# ---------------------------------------------------------------------------
# Main.
# ---------------------------------------------------------------------------
if __name__ == "__main__":
    key = jax.random.PRNGKey(0)
    k_par, k_cho, k_rej = jax.random.split(key, 3)
    params = init_params(k_par)

    # chosen / rejected ids: shared prefix, guaranteed divergence at pos 2,
    # PAD_ID tails on some sequences.
    cho = jax.random.randint(k_cho, (BS, T), 1, VOCAB, dtype=jnp.int32)
    rej = jax.random.randint(k_rej, (BS, T), 1, VOCAB, dtype=jnp.int32)
    rej = rej.at[:, :2].set(cho[:, :2])
    rej = rej.at[:, 2].set((cho[:, 2] % (VOCAB - 1)) + 1)  # always != cho[:, 2]
    cho = cho.at[0, 6:].set(PAD_ID)
    rej = rej.at[0, 7:].set(PAD_ID)
    rej = rej.at[1, 5:].set(PAD_ID)
    input_ids = jnp.concatenate([cho, rej], axis=0)         # (2*BS, T)
    weight = jnp.ones((BS, 1), jnp.float32)

    out = gpt_reward_model_forward(input_ids, params, weight)
    jax.block_until_ready(out)

    # ---- plain-JAX reference (same bf16 weights, exact softmax recip) ------
    x_emb = jnp.take(params["emb"], input_ids, axis=0)
    get_layer_ref = lambda l: {name: params[name][l] for name in STACKED}
    hidden_expect = neox_forward(
        x_emb.reshape(B * T, H), get_layer_ref,
        params["lnf_w"], params["lnf_b"], nb=B, in_kernel=False).reshape(B, T, H)
    rew_e = jnp.sum(hidden_expect * params["v_head"], axis=-1)
    li_e, ce_e, re_e = pairwise_loss(rew_e, input_ids, weight)
    loss_expect = jnp.sum(li_e)

    # transformer stack vs reference (loose: approx recip + MXU accumulation)
    assert np.allclose(np.asarray(out["_hidden"]), np.asarray(hidden_expect),
                       rtol=2e-2, atol=2e-2)
    # reward-head math vs same math applied to the kernel's own hidden states
    rew_k = jnp.sum(out["_hidden"] * params["v_head"], axis=-1)
    li_k, ce_k, re_k = pairwise_loss(rew_k, input_ids, weight)
    assert np.allclose(float(out["loss"]), float(jnp.sum(li_k)),
                       rtol=1e-3, atol=1e-3)
    assert np.allclose(np.asarray(out["chosen_end_scores"]),
                       np.asarray(ce_k[:, 0]), rtol=1e-3, atol=1e-3)
    assert np.allclose(np.asarray(out["rejected_end_scores"]),
                       np.asarray(re_k[:, 0]), rtol=1e-3, atol=1e-3)
    # end-to-end sanity vs full plain-JAX reference
    assert np.allclose(float(out["loss"]), float(loss_expect),
                       rtol=5e-2, atol=5e-2)
    assert np.all(np.isfinite(np.asarray(out["loss"])))

    print("KERNEL_OK")
</pallas_src>

<mosaic_0001>
module attributes {stable_mosaic.version = 11 : i64} {
  func.func @transformer_kernel(%arg0: i32, %arg1: memref<16x128xf32, #tpu.memory_space<vmem>>, %arg2: memref<2x1x128xf32, #tpu.memory_space<vmem>>, %arg3: memref<2x1x128xf32, #tpu.memory_space<vmem>>, %arg4: memref<2x1x128xf32, #tpu.memory_space<vmem>>, %arg5: memref<2x1x128xf32, #tpu.memory_space<vmem>>, %arg6: memref<2x128x128xbf16, #tpu.memory_space<vmem>>, %arg7: memref<2x1x128xf32, #tpu.memory_space<vmem>>, %arg8: memref<2x128x128xbf16, #tpu.memory_space<vmem>>, %arg9: memref<2x1x128xf32, #tpu.memory_space<vmem>>, %arg10: memref<2x128x128xbf16, #tpu.memory_space<vmem>>, %arg11: memref<2x1x128xf32, #tpu.memory_space<vmem>>, %arg12: memref<2x128x128xbf16, #tpu.memory_space<vmem>>, %arg13: memref<2x1x128xf32, #tpu.memory_space<vmem>>, %arg14: memref<2x128x512xbf16, #tpu.memory_space<vmem>>, %arg15: memref<2x1x512xf32, #tpu.memory_space<vmem>>, %arg16: memref<2x512x128xbf16, #tpu.memory_space<vmem>>, %arg17: memref<2x1x128xf32, #tpu.memory_space<vmem>>, %arg18: memref<1x128xf32, #tpu.memory_space<vmem>>, %arg19: memref<1x128xf32, #tpu.memory_space<vmem>>, %arg20: memref<16x128xf32, #tpu.memory_space<vmem>>) attributes {dimension_semantics = [#tpu.dimension_semantics<parallel>], iteration_bounds = array<i64: 2>, scalar_prefetch = 0 : i64, scratch_operands = 0 : i64, tpu.core_type = #tpu.core_type<tc>, window_params = [{transform_indices = @transform_0, window_bounds = array<i64: 16, 128>}, {pipeline_mode = #tpu.pipeline_mode<synchronous>, transform_indices = @transform_1, window_bounds = array<i64: 2, 1, 128>}, {pipeline_mode = #tpu.pipeline_mode<synchronous>, transform_indices = @transform_2, window_bounds = array<i64: 2, 1, 128>}, {pipeline_mode = #tpu.pipeline_mode<synchronous>, transform_indices = @transform_3, window_bounds = array<i64: 2, 1, 128>}, {pipeline_mode = #tpu.pipeline_mode<synchronous>, transform_indices = @transform_4, window_bounds = array<i64: 2, 1, 128>}, {pipeline_mode = #tpu.pipeline_mode<synchronous>, transform_indices = @transform_5, window_bounds = array<i64: 2, 128, 128>}, {pipeline_mode = #tpu.pipeline_mode<synchronous>, transform_indices = @transform_6, window_bounds = array<i64: 2, 1, 128>}, {pipeline_mode = #tpu.pipeline_mode<synchronous>, transform_indices = @transform_7, window_bounds = array<i64: 2, 128, 128>}, {pipeline_mode = #tpu.pipeline_mode<synchronous>, transform_indices = @transform_8, window_bounds = array<i64: 2, 1, 128>}, {pipeline_mode = #tpu.pipeline_mode<synchronous>, transform_indices = @transform_9, window_bounds = array<i64: 2, 128, 128>}, {pipeline_mode = #tpu.pipeline_mode<synchronous>, transform_indices = @transform_10, window_bounds = array<i64: 2, 1, 128>}, {pipeline_mode = #tpu.pipeline_mode<synchronous>, transform_indices = @transform_11, window_bounds = array<i64: 2, 128, 128>}, {pipeline_mode = #tpu.pipeline_mode<synchronous>, transform_indices = @transform_12, window_bounds = array<i64: 2, 1, 128>}, {pipeline_mode = #tpu.pipeline_mode<synchronous>, transform_indices = @transform_13, window_bounds = array<i64: 2, 128, 512>}, {pipeline_mode = #tpu.pipeline_mode<synchronous>, transform_indices = @transform_14, window_bounds = array<i64: 2, 1, 512>}, {pipeline_mode = #tpu.pipeline_mode<synchronous>, transform_indices = @transform_15, window_bounds = array<i64: 2, 512, 128>}, {pipeline_mode = #tpu.pipeline_mode<synchronous>, transform_indices = @transform_16, window_bounds = array<i64: 2, 1, 128>}, {pipeline_mode = #tpu.pipeline_mode<synchronous>, transform_indices = @transform_17, window_bounds = array<i64: 1, 128>}, {pipeline_mode = #tpu.pipeline_mode<synchronous>, transform_indices = @transform_18, window_bounds = array<i64: 1, 128>}, {transform_indices = @transform_19, window_bounds = array<i64: 16, 128>}]} {
    %c0 = arith.constant 0 : index
    %c0_0 = arith.constant 0 : index
    %0 = vector.load %arg1[%c0, %c0_0] : memref<16x128xf32, #tpu.memory_space<vmem>>, vector<16x128xf32>
    %c0_1 = arith.constant 0 : index
    %c0_2 = arith.constant 0 : index
    %1 = vector.load %arg18[%c0_1, %c0_2] : memref<1x128xf32, #tpu.memory_space<vmem>>, vector<1x128xf32>
    %c0_3 = arith.constant 0 : index
    %c0_4 = arith.constant 0 : index
    %2 = vector.load %arg19[%c0_3, %c0_4] : memref<1x128xf32, #tpu.memory_space<vmem>>, vector<1x128xf32>
    %3 = tpu.iota {dimensions = array<i32: 2>} : vector<1x8x8xi32>
    %4 = tpu.iota {dimensions = array<i32: 1>} : vector<1x8x8xi32>
    %5 = arith.cmpi sle, %3, %4 : vector<1x8x8xi32>
    %cst = arith.constant 0.000000e+00 : f32
    %cst_5 = arith.constant -1.000000e+30 : f32
    %6 = vector.broadcast %cst : f32 to vector<1x8x8xf32>
    %7 = vector.broadcast %cst_5 : f32 to vector<1x8x8xf32>
    %8 = arith.select %5, %6, %7 : vector<1x8x8xi1>, vector<1x8x8xf32>
    %9 = vector.shape_cast %8 : vector<1x8x8xf32> to vector<1x8x8xf32>
    %10 = vector.broadcast %9 : vector<1x8x8xf32> to vector<2x8x8xf32>
    %c0_6 = arith.constant 0 : index
    %c0_7 = arith.constant 0 : index
    %c0_8 = arith.constant 0 : index
    %11 = vector.load %arg2[%c0_6, %c0_7, %c0_8] : memref<2x1x128xf32, #tpu.memory_space<vmem>>, vector<1x1x128xf32>
    %12 = vector.shape_cast %11 : vector<1x1x128xf32> to vector<1x128xf32>
    %c0_9 = arith.constant 0 : index
    %c0_10 = arith.constant 0 : index
    %c0_11 = arith.constant 0 : index
    %13 = vector.load %arg3[%c0_9, %c0_10, %c0_11] : memref<2x1x128xf32, #tpu.memory_space<vmem>>, vector<1x1x128xf32>
    %14 = vector.shape_cast %13 : vector<1x1x128xf32> to vector<1x128xf32>
    %c0_12 = arith.constant 0 : index
    %c0_13 = arith.constant 0 : index
    %c0_14 = arith.constant 0 : index
    %15 = vector.load %arg4[%c0_12, %c0_13, %c0_14] : memref<2x1x128xf32, #tpu.memory_space<vmem>>, vector<1x1x128xf32>
    %16 = vector.shape_cast %15 : vector<1x1x128xf32> to vector<1x128xf32>
    %c0_15 = arith.constant 0 : index
    %c0_16 = arith.constant 0 : index
    %c0_17 = arith.constant 0 : index
    %17 = vector.load %arg5[%c0_15, %c0_16, %c0_17] : memref<2x1x128xf32, #tpu.memory_space<vmem>>, vector<1x1x128xf32>
    %18 = vector.shape_cast %17 : vector<1x1x128xf32> to vector<1x128xf32>
    %c0_18 = arith.constant 0 : index
    %c0_19 = arith.constant 0 : index
    %c0_20 = arith.constant 0 : index
    %19 = vector.load %arg6[%c0_18, %c0_19, %c0_20] : memref<2x128x128xbf16, #tpu.memory_space<vmem>>, vector<1x128x128xbf16>
    %20 = vector.shape_cast %19 : vector<1x128x128xbf16> to vector<128x128xbf16>
    %c0_21 = arith.constant 0 : index
    %c0_22 = arith.constant 0 : index
    %c0_23 = arith.constant 0 : index
    %21 = vector.load %arg7[%c0_21, %c0_22, %c0_23] : memref<2x1x128xf32, #tpu.memory_space<vmem>>, vector<1x1x128xf32>
    %22 = vector.shape_cast %21 : vector<1x1x128xf32> to vector<1x128xf32>
    %c0_24 = arith.constant 0 : index
    %c0_25 = arith.constant 0 : index
    %c0_26 = arith.constant 0 : index
    %23 = vector.load %arg8[%c0_24, %c0_25, %c0_26] : memref<2x128x128xbf16, #tpu.memory_space<vmem>>, vector<1x128x128xbf16>
    %24 = vector.shape_cast %23 : vector<1x128x128xbf16> to vector<128x128xbf16>
    %c0_27 = arith.constant 0 : index
    %c0_28 = arith.constant 0 : index
    %c0_29 = arith.constant 0 : index
    %25 = vector.load %arg9[%c0_27, %c0_28, %c0_29] : memref<2x1x128xf32, #tpu.memory_space<vmem>>, vector<1x1x128xf32>
    %26 = vector.shape_cast %25 : vector<1x1x128xf32> to vector<1x128xf32>
    %c0_30 = arith.constant 0 : index
    %c0_31 = arith.constant 0 : index
    %c0_32 = arith.constant 0 : index
    %27 = vector.load %arg10[%c0_30, %c0_31, %c0_32] : memref<2x128x128xbf16, #tpu.memory_space<vmem>>, vector<1x128x128xbf16>
    %28 = vector.shape_cast %27 : vector<1x128x128xbf16> to vector<128x128xbf16>
    %c0_33 = arith.constant 0 : index
    %c0_34 = arith.constant 0 : index
    %c0_35 = arith.constant 0 : index
    %29 = vector.load %arg11[%c0_33, %c0_34, %c0_35] : memref<2x1x128xf32, #tpu.memory_space<vmem>>, vector<1x1x128xf32>
    %30 = vector.shape_cast %29 : vector<1x1x128xf32> to vector<1x128xf32>
    %c0_36 = arith.constant 0 : index
    %c0_37 = arith.constant 0 : index
    %c0_38 = arith.constant 0 : index
    %31 = vector.load %arg12[%c0_36, %c0_37, %c0_38] : memref<2x128x128xbf16, #tpu.memory_space<vmem>>, vector<1x128x128xbf16>
    %32 = vector.shape_cast %31 : vector<1x128x128xbf16> to vector<128x128xbf16>
    %c0_39 = arith.constant 0 : index
    %c0_40 = arith.constant 0 : index
    %c0_41 = arith.constant 0 : index
    %33 = vector.load %arg13[%c0_39, %c0_40, %c0_41] : memref<2x1x128xf32, #tpu.memory_space<vmem>>, vector<1x1x128xf32>
    %34 = vector.shape_cast %33 : vector<1x1x128xf32> to vector<1x128xf32>
    %c0_42 = arith.constant 0 : index
    %c0_43 = arith.constant 0 : index
    %c0_44 = arith.constant 0 : index
    %35 = vector.load %arg14[%c0_42, %c0_43, %c0_44] : memref<2x128x512xbf16, #tpu.memory_space<vmem>>, vector<1x128x512xbf16>
    %36 = vector.shape_cast %35 : vector<1x128x512xbf16> to vector<128x512xbf16>
    %c0_45 = arith.constant 0 : index
    %c0_46 = arith.constant 0 : index
    %c0_47 = arith.constant 0 : index
    %37 = vector.load %arg15[%c0_45, %c0_46, %c0_47] : memref<2x1x512xf32, #tpu.memory_space<vmem>>, vector<1x1x512xf32>
    %38 = vector.shape_cast %37 : vector<1x1x512xf32> to vector<1x512xf32>
    %c0_48 = arith.constant 0 : index
    %c0_49 = arith.constant 0 : index
    %c0_50 = arith.constant 0 : index
    %39 = vector.load %arg16[%c0_48, %c0_49, %c0_50] : memref<2x512x128xbf16, #tpu.memory_space<vmem>>, vector<1x512x128xbf16>
    %40 = vector.shape_cast %39 : vector<1x512x128xbf16> to vector<512x128xbf16>
    %c0_51 = arith.constant 0 : index
    %c0_52 = arith.constant 0 : index
    %c0_53 = arith.constant 0 : index
    %41 = vector.load %arg17[%c0_51, %c0_52, %c0_53] : memref<2x1x128xf32, #tpu.memory_space<vmem>>, vector<1x1x128xf32>
    %42 = vector.shape_cast %41 : vector<1x1x128xf32> to vector<1x128xf32>
    %cst_54 = arith.constant dense<0.000000e+00> : vector<16xf32>
    %43 = vector.multi_reduction <add>, %0, %cst_54 [1] : vector<16x128xf32> to vector<16xf32>
    %44 = vector.shape_cast %43 : vector<16xf32> to vector<16x1xf32>
    %cst_55 = arith.constant 1.280000e+02 : f32
    %45 = vector.broadcast %cst_55 : f32 to vector<16x1xf32>
    %46 = arith.divf %44, %45 : vector<16x1xf32>
    %47 = vector.broadcast %46 : vector<16x1xf32> to vector<16x128xf32>
    %48 = arith.subf %0, %47 : vector<16x128xf32>
    %49 = arith.mulf %48, %48 : vector<16x128xf32>
    %cst_56 = arith.constant dense<0.000000e+00> : vector<16xf32>
    %50 = vector.multi_reduction <add>, %49, %cst_56 [1] : vector<16x128xf32> to vector<16xf32>
    %51 = vector.shape_cast %50 : vector<16xf32> to vector<16x1xf32>
    %cst_57 = arith.constant 1.280000e+02 : f32
    %52 = vector.broadcast %cst_57 : f32 to vector<16x1xf32>
    %53 = arith.divf %51, %52 : vector<16x1xf32>
    %54 = vector.broadcast %46 : vector<16x1xf32> to vector<16x128xf32>
    %55 = arith.subf %0, %54 : vector<16x128xf32>
    %cst_58 = arith.constant 9.99999974E-6 : f32
    %56 = vector.broadcast %cst_58 : f32 to vector<16x1xf32>
    %57 = arith.addf %53, %56 : vector<16x1xf32>
    %58 = math.rsqrt %57 : vector<16x1xf32>
    %59 = vector.broadcast %58 : vector<16x1xf32> to vector<16x128xf32>
    %60 = arith.mulf %55, %59 : vector<16x128xf32>
    %61 = vector.broadcast %12 : vector<1x128xf32> to vector<16x128xf32>
    %62 = arith.mulf %60, %61 : vector<16x128xf32>
    %63 = vector.broadcast %14 : vector<1x128xf32> to vector<16x128xf32>
    %64 = arith.addf %62, %63 : vector<16x128xf32>
    %65 = arith.truncf %64 : vector<16x128xf32> to vector<16x128xbf16>
    %cst_59 = arith.constant dense<0.000000e+00> : vector<16x128xf32>
    %66 = tpu.matmul %65, %20, %cst_59 {dimension_numbers = #tpu.dot_dimension_numbers<[1], [0], [0], [1], [0, 0, 1, 1], [], []>} : vector<16x128xbf16>, vector<128x128xbf16>, vector<16x128xf32> -> vector<16x128xf32>
    %67 = vector.broadcast %22 : vector<1x128xf32> to vector<16x128xf32>
    %68 = arith.addf %66, %67 : vector<16x128xf32>
    %cst_60 = arith.constant dense<0.000000e+00> : vector<16x128xf32>
    %69 = tpu.matmul %65, %24, %cst_60 {dimension_numbers = #tpu.dot_dimension_numbers<[1], [0], [0], [1], [0, 0, 1, 1], [], []>} : vector<16x128xbf16>, vector<128x128xbf16>, vector<16x128xf32> -> vector<16x128xf32>
    %70 = vector.broadcast %26 : vector<1x128xf32> to vector<16x128xf32>
    %71 = arith.addf %69, %70 : vector<16x128xf32>
    %cst_61 = arith.constant dense<0.000000e+00> : vector<16x128xf32>
    %72 = tpu.matmul %65, %28, %cst_61 {dimension_numbers = #tpu.dot_dimension_numbers<[1], [0], [0], [1], [0, 0, 1, 1], [], []>} : vector<16x128xbf16>, vector<128x128xbf16>, vector<16x128xf32> -> vector<16x128xf32>
    %73 = vector.broadcast %30 : vector<1x128xf32> to vector<16x128xf32>
    %74 = arith.addf %72, %73 : vector<16x128xf32>
    %75 = vector.shape_cast %68 : vector<16x128xf32> to vector<2x8x128xf32>
    %76 = arith.truncf %75 : vector<2x8x128xf32> to vector<2x8x128xbf16>
    %77 = vector.shape_cast %71 : vector<16x128xf32> to vector<2x8x128xf32>
    %78 = arith.truncf %77 : vector<2x8x128xf32> to vector<2x8x128xbf16>
    %79 = vector.shape_cast %74 : vector<16x128xf32> to vector<2x8x128xf32>
    %80 = arith.truncf %79 : vector<2x8x128xf32> to vector<2x8x128xbf16>
    %81 = vector.extract_strided_slice %76 {offsets = [0, 0, 0], sizes = [2, 8, 32], strides = [1, 1, 1]} : vector<2x8x128xbf16> to vector<2x8x32xbf16>
    %82 = vector.extract_strided_slice %78 {offsets = [0, 0, 0], sizes = [2, 8, 32], strides = [1, 1, 1]} : vector<2x8x128xbf16> to vector<2x8x32xbf16>
    "tpu.trace_start"() <{level = 10 : i32, message = "bqd,bkd->bqk"}> : () -> ()
    %cst_62 = arith.constant dense<0.000000e+00> : vector<2x8x8xf32>
    %83 = tpu.matmul %81, %82, %cst_62 {dimension_numbers = #tpu.dot_dimension_numbers<[2], [2], [1], [1], [0, 0, 0, 1, 1, 1], [0], [0]>} : vector<2x8x32xbf16>, vector<2x8x32xbf16>, vector<2x8x8xf32> -> vector<2x8x8xf32>
    "tpu.trace_stop"() : () -> ()
    %cst_63 = arith.constant 0.176776692 : f32
    %84 = vector.broadcast %cst_63 : f32 to vector<2x8x8xf32>
    %85 = arith.mulf %83, %84 : vector<2x8x8xf32>
    %86 = arith.addf %85, %10 : vector<2x8x8xf32>
    %cst_64 = arith.constant dense<0xFF800000> : vector<2x8xf32>
    %87 = vector.multi_reduction <maximumf>, %86, %cst_64 [2] : vector<2x8x8xf32> to vector<2x8xf32>
    %88 = vector.shape_cast %87 : vector<2x8xf32> to vector<2x8x1xf32>
    %89 = vector.broadcast %88 : vector<2x8x1xf32> to vector<2x8x8xf32>
    %90 = arith.subf %86, %89 : vector<2x8x8xf32>
    %91 = math.exp %90 : vector<2x8x8xf32>
    %cst_65 = arith.constant dense<0.000000e+00> : vector<2x8xf32>
    %92 = vector.multi_reduction <add>, %91, %cst_65 [2] : vector<2x8x8xf32> to vector<2x8xf32>
    %93 = vector.shape_cast %92 : vector<2x8xf32> to vector<2x8x1xf32>
    %94 = tpu.reciprocal %93 {approx = true} : vector<2x8x1xf32> -> vector<2x8x1xf32>
    %95 = vector.broadcast %94 : vector<2x8x1xf32> to vector<2x8x8xf32>
    %96 = arith.mulf %91, %95 : vector<2x8x8xf32>
    %97 = arith.truncf %96 : vector<2x8x8xf32> to vector<2x8x8xbf16>
    %98 = vector.extract_strided_slice %80 {offsets = [0, 0, 0], sizes = [2, 8, 32], strides = [1, 1, 1]} : vector<2x8x128xbf16> to vector<2x8x32xbf16>
    "tpu.trace_start"() <{level = 10 : i32, message = "bqk,bkd->bqd"}> : () -> ()
    %cst_66 = arith.constant dense<0.000000e+00> : vector<2x8x32xf32>
    %99 = tpu.matmul %97, %98, %cst_66 {dimension_numbers = #tpu.dot_dimension_numbers<[2], [1], [1], [2], [0, 0, 0, 1, 1, 2], [0], [0]>} : vector<2x8x8xbf16>, vector<2x8x32xbf16>, vector<2x8x32xf32> -> vector<2x8x32xf32>
    "tpu.trace_stop"() : () -> ()
    %100 = vector.extract_strided_slice %76 {offsets = [0, 0, 32], sizes = [2, 8, 32], strides = [1, 1, 1]} : vector<2x8x128xbf16> to vector<2x8x32xbf16>
    %101 = vector.extract_strided_slice %78 {offsets = [0, 0, 32], sizes = [2, 8, 32], strides = [1, 1, 1]} : vector<2x8x128xbf16> to vector<2x8x32xbf16>
    "tpu.trace_start"() <{level = 10 : i32, message = "bqd,bkd->bqk"}> : () -> ()
    %cst_67 = arith.constant dense<0.000000e+00> : vector<2x8x8xf32>
    %102 = tpu.matmul %100, %101, %cst_67 {dimension_numbers = #tpu.dot_dimension_numbers<[2], [2], [1], [1], [0, 0, 0, 1, 1, 1], [0], [0]>} : vector<2x8x32xbf16>, vector<2x8x32xbf16>, vector<2x8x8xf32> -> vector<2x8x8xf32>
    "tpu.trace_stop"() : () -> ()
    %cst_68 = arith.constant 0.176776692 : f32
    %103 = vector.broadcast %cst_68 : f32 to vector<2x8x8xf32>
    %104 = arith.mulf %102, %103 : vector<2x8x8xf32>
    %105 = arith.addf %104, %10 : vector<2x8x8xf32>
    %cst_69 = arith.constant dense<0xFF800000> : vector<2x8xf32>
    %106 = vector.multi_reduction <maximumf>, %105, %cst_69 [2] : vector<2x8x8xf32> to vector<2x8xf32>
    %107 = vector.shape_cast %106 : vector<2x8xf32> to vector<2x8x1xf32>
    %108 = vector.broadcast %107 : vector<2x8x1xf32> to vector<2x8x8xf32>
    %109 = arith.subf %105, %108 : vector<2x8x8xf32>
    %110 = math.exp %109 : vector<2x8x8xf32>
    %cst_70 = arith.constant dense<0.000000e+00> : vector<2x8xf32>
    %111 = vector.multi_reduction <add>, %110, %cst_70 [2] : vector<2x8x8xf32> to vector<2x8xf32>
    %112 = vector.shape_cast %111 : vector<2x8xf32> to vector<2x8x1xf32>
    %113 = tpu.reciprocal %112 {approx = true} : vector<2x8x1xf32> -> vector<2x8x1xf32>
    %114 = vector.broadcast %113 : vector<2x8x1xf32> to vector<2x8x8xf32>
    %115 = arith.mulf %110, %114 : vector<2x8x8xf32>
    %116 = arith.truncf %115 : vector<2x8x8xf32> to vector<2x8x8xbf16>
    %117 = vector.extract_strided_slice %80 {offsets = [0, 0, 32], sizes = [2, 8, 32], strides = [1, 1, 1]} : vector<2x8x128xbf16> to vector<2x8x32xbf16>
    "tpu.trace_start"() <{level = 10 : i32, message = "bqk,bkd->bqd"}> : () -> ()
    %cst_71 = arith.constant dense<0.000000e+00> : vector<2x8x32xf32>
    %118 = tpu.matmul %116, %117, %cst_71 {dimension_numbers = #tpu.dot_dimension_numbers<[2], [1], [1], [2], [0, 0, 0, 1, 1, 2], [0], [0]>} : vector<2x8x8xbf16>, vector<2x8x32xbf16>, vector<2x8x32xf32> -> vector<2x8x32xf32>
    "tpu.trace_stop"() : () -> ()
    %119 = vector.extract_strided_slice %76 {offsets = [0, 0, 64], sizes = [2, 8, 32], strides = [1, 1, 1]} : vector<2x8x128xbf16> to vector<2x8x32xbf16>
    %120 = vector.extract_strided_slice %78 {offsets = [0, 0, 64], sizes = [2, 8, 32], strides = [1, 1, 1]} : vector<2x8x128xbf16> to vector<2x8x32xbf16>
    "tpu.trace_start"() <{level = 10 : i32, message = "bqd,bkd->bqk"}> : () -> ()
    %cst_72 = arith.constant dense<0.000000e+00> : vector<2x8x8xf32>
    %121 = tpu.matmul %119, %120, %cst_72 {dimension_numbers = #tpu.dot_dimension_numbers<[2], [2], [1], [1], [0, 0, 0, 1, 1, 1], [0], [0]>} : vector<2x8x32xbf16>, vector<2x8x32xbf16>, vector<2x8x8xf32> -> vector<2x8x8xf32>
    "tpu.trace_stop"() : () -> ()
    %cst_73 = arith.constant 0.176776692 : f32
    %122 = vector.broadcast %cst_73 : f32 to vector<2x8x8xf32>
    %123 = arith.mulf %121, %122 : vector<2x8x8xf32>
    %124 = arith.addf %123, %10 : vector<2x8x8xf32>
    %cst_74 = arith.constant dense<0xFF800000> : vector<2x8xf32>
    %125 = vector.multi_reduction <maximumf>, %124, %cst_74 [2] : vector<2x8x8xf32> to vector<2x8xf32>
    %126 = vector.shape_cast %125 : vector<2x8xf32> to vector<2x8x1xf32>
    %127 = vector.broadcast %126 : vector<2x8x1xf32> to vector<2x8x8xf32>
    %128 = arith.subf %124, %127 : vector<2x8x8xf32>
    %129 = math.exp %128 : vector<2x8x8xf32>
    %cst_75 = arith.constant dense<0.000000e+00> : vector<2x8xf32>
    %130 = vector.multi_reduction <add>, %129, %cst_75 [2] : vector<2x8x8xf32> to vector<2x8xf32>
    %131 = vector.shape_cast %130 : vector<2x8xf32> to vector<2x8x1xf32>
    %132 = tpu.reciprocal %131 {approx = true} : vector<2x8x1xf32> -> vector<2x8x1xf32>
    %133 = vector.broadcast %132 : vector<2x8x1xf32> to vector<2x8x8xf32>
    %134 = arith.mulf %129, %133 : vector<2x8x8xf32>
    %135 = arith.truncf %134 : vector<2x8x8xf32> to vector<2x8x8xbf16>
    %136 = vector.extract_strided_slice %80 {offsets = [0, 0, 64], sizes = [2, 8, 32], strides = [1, 1, 1]} : vector<2x8x128xbf16> to vector<2x8x32xbf16>
    "tpu.trace_start"() <{level = 10 : i32, message = "bqk,bkd->bqd"}> : () -> ()
    %cst_76 = arith.constant dense<0.000000e+00> : vector<2x8x32xf32>
    %137 = tpu.matmul %135, %136, %cst_76 {dimension_numbers = #tpu.dot_dimension_numbers<[2], [1], [1], [2], [0, 0, 0, 1, 1, 2], [0], [0]>} : vector<2x8x8xbf16>, vector<2x8x32xbf16>, vector<2x8x32xf32> -> vector<2x8x32xf32>
    "tpu.trace_stop"() : () -> ()
    %138 = vector.extract_strided_slice %76 {offsets = [0, 0, 96], sizes = [2, 8, 32], strides = [1, 1, 1]} : vector<2x8x128xbf16> to vector<2x8x32xbf16>
    %139 = vector.extract_strided_slice %78 {offsets = [0, 0, 96], sizes = [2, 8, 32], strides = [1, 1, 1]} : vector<2x8x128xbf16> to vector<2x8x32xbf16>
    "tpu.trace_start"() <{level = 10 : i32, message = "bqd,bkd->bqk"}> : () -> ()
    %cst_77 = arith.constant dense<0.000000e+00> : vector<2x8x8xf32>
    %140 = tpu.matmul %138, %139, %cst_77 {dimension_numbers = #tpu.dot_dimension_numbers<[2], [2], [1], [1], [0, 0, 0, 1, 1, 1], [0], [0]>} : vector<2x8x32xbf16>, vector<2x8x32xbf16>, vector<2x8x8xf32> -> vector<2x8x8xf32>
    "tpu.trace_stop"() : () -> ()
    %cst_78 = arith.constant 0.176776692 : f32
    %141 = vector.broadcast %cst_78 : f32 to vector<2x8x8xf32>
    %142 = arith.mulf %140, %141 : vector<2x8x8xf32>
    %143 = arith.addf %142, %10 : vector<2x8x8xf32>
    %cst_79 = arith.constant dense<0xFF800000> : vector<2x8xf32>
    %144 = vector.multi_reduction <maximumf>, %143, %cst_79 [2] : vector<2x8x8xf32> to vector<2x8xf32>
    %145 = vector.shape_cast %144 : vector<2x8xf32> to vector<2x8x1xf32>
    %146 = vector.broadcast %145 : vector<2x8x1xf32> to vector<2x8x8xf32>
    %147 = arith.subf %143, %146 : vector<2x8x8xf32>
    %148 = math.exp %147 : vector<2x8x8xf32>
    %cst_80 = arith.constant dense<0.000000e+00> : vector<2x8xf32>
    %149 = vector.multi_reduction <add>, %148, %cst_80 [2] : vector<2x8x8xf32> to vector<2x8xf32>
    %150 = vector.shape_cast %149 : vector<2x8xf32> to vector<2x8x1xf32>
    %151 = tpu.reciprocal %150 {approx = true} : vector<2x8x1xf32> -> vector<2x8x1xf32>
    %152 = vector.broadcast %151 : vector<2x8x1xf32> to vector<2x8x8xf32>
    %153 = arith.mulf %148, %152 : vector<2x8x8xf32>
    %154 = arith.truncf %153 : vector<2x8x8xf32> to vector<2x8x8xbf16>
    %155 = vector.extract_strided_slice %80 {offsets = [0, 0, 96], sizes = [2, 8, 32], strides = [1, 1, 1]} : vector<2x8x128xbf16> to vector<2x8x32xbf16>
    "tpu.trace_start"() <{level = 10 : i32, message = "bqk,bkd->bqd"}> : () -> ()
    %cst_81 = arith.constant dense<0.000000e+00> : vector<2x8x32xf32>
    %156 = tpu.matmul %154, %155, %cst_81 {dimension_numbers = #tpu.dot_dimension_numbers<[2], [1], [1], [2], [0, 0, 0, 1, 1, 2], [0], [0]>} : vector<2x8x8xbf16>, vector<2x8x32xbf16>, vector<2x8x32xf32> -> vector<2x8x32xf32>
    "tpu.trace_stop"() : () -> ()
    %157 = tpu.concatenate %99, %118, %137, %156 in 2 : vector<2x8x32xf32>, vector<2x8x32xf32>, vector<2x8x32xf32>, vector<2x8x32xf32> -> vector<2x8x128xf32>
    %158 = vector.shape_cast %157 : vector<2x8x128xf32> to vector<16x128xf32>
    %159 = arith.truncf %158 : vector<16x128xf32> to vector<16x128xbf16>
    %cst_82 = arith.constant dense<0.000000e+00> : vector<16x128xf32>
    %160 = tpu.matmul %159, %32, %cst_82 {dimension_numbers = #tpu.dot_dimension_numbers<[1], [0], [0], [1], [0, 0, 1, 1], [], []>} : vector<16x128xbf16>, vector<128x128xbf16>, vector<16x128xf32> -> vector<16x128xf32>
    %161 = vector.broadcast %34 : vector<1x128xf32> to vector<16x128xf32>
    %162 = arith.addf %160, %161 : vector<16x128xf32>
    %cst_83 = arith.constant dense<0.000000e+00> : vector<16xf32>
    %163 = vector.multi_reduction <add>, %0, %cst_83 [1] : vector<16x128xf32> to vector<16xf32>
    %164 = vector.shape_cast %163 : vector<16xf32> to vector<16x1xf32>
    %cst_84 = arith.constant 1.280000e+02 : f32
    %165 = vector.broadcast %cst_84 : f32 to vector<16x1xf32>
    %166 = arith.divf %164, %165 : vector<16x1xf32>
    %167 = vector.broadcast %166 : vector<16x1xf32> to vector<16x128xf32>
    %168 = arith.subf %0, %167 : vector<16x128xf32>
    %169 = arith.mulf %168, %168 : vector<16x128xf32>
    %cst_85 = arith.constant dense<0.000000e+00> : vector<16xf32>
    %170 = vector.multi_reduction <add>, %169, %cst_85 [1] : vector<16x128xf32> to vector<16xf32>
    %171 = vector.shape_cast %170 : vector<16xf32> to vector<16x1xf32>
    %cst_86 = arith.constant 1.280000e+02 : f32
    %172 = vector.broadcast %cst_86 : f32 to vector<16x1xf32>
    %173 = arith.divf %171, %172 : vector<16x1xf32>
    %174 = vector.broadcast %166 : vector<16x1xf32> to vector<16x128xf32>
    %175 = arith.subf %0, %174 : vector<16x128xf32>
    %cst_87 = arith.constant 9.99999974E-6 : f32
    %176 = vector.broadcast %cst_87 : f32 to vector<16x1xf32>
    %177 = arith.addf %173, %176 : vector<16x1xf32>
    %178 = math.rsqrt %177 : vector<16x1xf32>
    %179 = vector.broadcast %178 : vector<16x1xf32> to vector<16x128xf32>
    %180 = arith.mulf %175, %179 : vector<16x128xf32>
    %181 = vector.broadcast %16 : vector<1x128xf32> to vector<16x128xf32>
    %182 = arith.mulf %180, %181 : vector<16x128xf32>
    %183 = vector.broadcast %18 : vector<1x128xf32> to vector<16x128xf32>
    %184 = arith.addf %182, %183 : vector<16x128xf32>
    %185 = arith.truncf %184 : vector<16x128xf32> to vector<16x128xbf16>
    %cst_88 = arith.constant dense<0.000000e+00> : vector<16x512xf32>
    %186 = tpu.matmul %185, %36, %cst_88 {dimension_numbers = #tpu.dot_dimension_numbers<[1], [0], [0], [1], [0, 0, 1, 1], [], []>} : vector<16x128xbf16>, vector<128x512xbf16>, vector<16x512xf32> -> vector<16x512xf32>
    %187 = vector.broadcast %38 : vector<1x512xf32> to vector<16x512xf32>
    %188 = arith.addf %186, %187 : vector<16x512xf32>
    %189 = arith.mulf %188, %188 : vector<16x512xf32>
    %190 = arith.mulf %188, %189 : vector<16x512xf32>
    %cst_89 = arith.constant 4.471500e-02 : f32
    %191 = vector.broadcast %cst_89 : f32 to vector<16x512xf32>
    %192 = arith.mulf %191, %190 : vector<16x512xf32>
    %193 = arith.addf %188, %192 : vector<16x512xf32>
    %cst_90 = arith.constant 0.797884583 : f32
    %194 = vector.broadcast %cst_90 : f32 to vector<16x512xf32>
    %195 = arith.mulf %194, %193 : vector<16x512xf32>
    %196 = math.tanh %195 : vector<16x512xf32>
    %cst_91 = arith.constant 1.000000e+00 : f32
    %197 = vector.broadcast %cst_91 : f32 to vector<16x512xf32>
    %198 = arith.addf %197, %196 : vector<16x512xf32>
    %cst_92 = arith.constant 5.000000e-01 : f32
    %199 = vector.broadcast %cst_92 : f32 to vector<16x512xf32>
    %200 = arith.mulf %199, %198 : vector<16x512xf32>
    %201 = arith.mulf %188, %200 : vector<16x512xf32>
    %202 = arith.truncf %201 : vector<16x512xf32> to vector<16x512xbf16>
    %cst_93 = arith.constant dense<0.000000e+00> : vector<16x128xf32>
    %203 = tpu.matmul %202, %40, %cst_93 {dimension_numbers = #tpu.dot_dimension_numbers<[1], [0], [0], [1], [0, 0, 1, 1], [], []>} : vector<16x512xbf16>, vector<512x128xbf16>, vector<16x128xf32> -> vector<16x128xf32>
    %204 = vector.broadcast %42 : vector<1x128xf32> to vector<16x128xf32>
    %205 = arith.addf %203, %204 : vector<16x128xf32>
    %206 = arith.addf %0, %162 : vector<16x128xf32>
    %207 = arith.addf %206, %205 : vector<16x128xf32>
    %c1 = arith.constant 1 : index
    %c0_94 = arith.constant 0 : index
    %c0_95 = arith.constant 0 : index
    %208 = vector.load %arg2[%c1, %c0_94, %c0_95] : memref<2x1x128xf32, #tpu.memory_space<vmem>>, vector<1x1x128xf32>
    %209 = vector.shape_cast %208 : vector<1x1x128xf32> to vector<1x128xf32>
    %c1_96 = arith.constant 1 : index
    %c0_97 = arith.constant 0 : index
    %c0_98 = arith.constant 0 : index
    %210 = vector.load %arg3[%c1_96, %c0_97, %c0_98] : memref<2x1x128xf32, #tpu.memory_space<vmem>>, vector<1x1x128xf32>
    %211 = vector.shape_cast %210 : vector<1x1x128xf32> to vector<1x128xf32>
    %c1_99 = arith.constant 1 : index
    %c0_100 = arith.constant 0 : index
    %c0_101 = arith.constant 0 : index
    %212 = vector.load %arg4[%c1_99, %c0_100, %c0_101] : memref<2x1x128xf32, #tpu.memory_space<vmem>>, vector<1x1x128xf32>
    %213 = vector.shape_cast %212 : vector<1x1x128xf32> to vector<1x128xf32>
    %c1_102 = arith.constant 1 : index
    %c0_103 = arith.constant 0 : index
    %c0_104 = arith.constant 0 : index
    %214 = vector.load %arg5[%c1_102, %c0_103, %c0_104] : memref<2x1x128xf32, #tpu.memory_space<vmem>>, vector<1x1x128xf32>
    %215 = vector.shape_cast %214 : vector<1x1x128xf32> to vector<1x128xf32>
    %c1_105 = arith.constant 1 : index
    %c0_106 = arith.constant 0 : index
    %c0_107 = arith.constant 0 : index
    %216 = vector.load %arg6[%c1_105, %c0_106, %c0_107] : memref<2x128x128xbf16, #tpu.memory_space<vmem>>, vector<1x128x128xbf16>
    %217 = vector.shape_cast %216 : vector<1x128x128xbf16> to vector<128x128xbf16>
    %c1_108 = arith.constant 1 : index
    %c0_109 = arith.constant 0 : index
    %c0_110 = arith.constant 0 : index
    %218 = vector.load %arg7[%c1_108, %c0_109, %c0_110] : memref<2x1x128xf32, #tpu.memory_space<vmem>>, vector<1x1x128xf32>
    %219 = vector.shape_cast %218 : vector<1x1x128xf32> to vector<1x128xf32>
    %c1_111 = arith.constant 1 : index
    %c0_112 = arith.constant 0 : index
    %c0_113 = arith.constant 0 : index
    %220 = vector.load %arg8[%c1_111, %c0_112, %c0_113] : memref<2x128x128xbf16, #tpu.memory_space<vmem>>, vector<1x128x128xbf16>
    %221 = vector.shape_cast %220 : vector<1x128x128xbf16> to vector<128x128xbf16>
    %c1_114 = arith.constant 1 : index
    %c0_115 = arith.constant 0 : index
    %c0_116 = arith.constant 0 : index
    %222 = vector.load %arg9[%c1_114, %c0_115, %c0_116] : memref<2x1x128xf32, #tpu.memory_space<vmem>>, vector<1x1x128xf32>
    %223 = vector.shape_cast %222 : vector<1x1x128xf32> to vector<1x128xf32>
    %c1_117 = arith.constant 1 : index
    %c0_118 = arith.constant 0 : index
    %c0_119 = arith.constant 0 : index
    %224 = vector.load %arg10[%c1_117, %c0_118, %c0_119] : memref<2x128x128xbf16, #tpu.memory_space<vmem>>, vector<1x128x128xbf16>
    %225 = vector.shape_cast %224 : vector<1x128x128xbf16> to vector<128x128xbf16>
    %c1_120 = arith.constant 1 : index
    %c0_121 = arith.constant 0 : index
    %c0_122 = arith.constant 0 : index
    %226 = vector.load %arg11[%c1_120, %c0_121, %c0_122] : memref<2x1x128xf32, #tpu.memory_space<vmem>>, vector<1x1x128xf32>
    %227 = vector.shape_cast %226 : vector<1x1x128xf32> to vector<1x128xf32>
    %c1_123 = arith.constant 1 : index
    %c0_124 = arith.constant 0 : index
    %c0_125 = arith.constant 0 : index
    %228 = vector.load %arg12[%c1_123, %c0_124, %c0_125] : memref<2x128x128xbf16, #tpu.memory_space<vmem>>, vector<1x128x128xbf16>
    %229 = vector.shape_cast %228 : vector<1x128x128xbf16> to vector<128x128xbf16>
    %c1_126 = arith.constant 1 : index
    %c0_127 = arith.constant 0 : index
    %c0_128 = arith.constant 0 : index
    %230 = vector.load %arg13[%c1_126, %c0_127, %c0_128] : memref<2x1x128xf32, #tpu.memory_space<vmem>>, vector<1x1x128xf32>
    %231 = vector.shape_cast %230 : vector<1x1x128xf32> to vector<1x128xf32>
    %c1_129 = arith.constant 1 : index
    %c0_130 = arith.constant 0 : index
    %c0_131 = arith.constant 0 : index
    %232 = vector.load %arg14[%c1_129, %c0_130, %c0_131] : memref<2x128x512xbf16, #tpu.memory_space<vmem>>, vector<1x128x512xbf16>
    %233 = vector.shape_cast %232 : vector<1x128x512xbf16> to vector<128x512xbf16>
    %c1_132 = arith.constant 1 : index
    %c0_133 = arith.constant 0 : index
    %c0_134 = arith.constant 0 : index
    %234 = vector.load %arg15[%c1_132, %c0_133, %c0_134] : memref<2x1x512xf32, #tpu.memory_space<vmem>>, vector<1x1x512xf32>
    %235 = vector.shape_cast %234 : vector<1x1x512xf32> to vector<1x512xf32>
    %c1_135 = arith.constant 1 : index
    %c0_136 = arith.constant 0 : index
    %c0_137 = arith.constant 0 : index
    %236 = vector.load %arg16[%c1_135, %c0_136, %c0_137] : memref<2x512x128xbf16, #tpu.memory_space<vmem>>, vector<1x512x128xbf16>
    %237 = vector.shape_cast %236 : vector<1x512x128xbf16> to vector<512x128xbf16>
    %c1_138 = arith.constant 1 : index
    %c0_139 = arith.constant 0 : index
    %c0_140 = arith.constant 0 : index
    %238 = vector.load %arg17[%c1_138, %c0_139, %c0_140] : memref<2x1x128xf32, #tpu.memory_space<vmem>>, vector<1x1x128xf32>
    %239 = vector.shape_cast %238 : vector<1x1x128xf32> to vector<1x128xf32>
    %cst_141 = arith.constant dense<0.000000e+00> : vector<16xf32>
    %240 = vector.multi_reduction <add>, %207, %cst_141 [1] : vector<16x128xf32> to vector<16xf32>
    %241 = vector.shape_cast %240 : vector<16xf32> to vector<16x1xf32>
    %cst_142 = arith.constant 1.280000e+02 : f32
    %242 = vector.broadcast %cst_142 : f32 to vector<16x1xf32>
    %243 = arith.divf %241, %242 : vector<16x1xf32>
    %244 = vector.broadcast %243 : vector<16x1xf32> to vector<16x128xf32>
    %245 = arith.subf %207, %244 : vector<16x128xf32>
    %246 = arith.mulf %245, %245 : vector<16x128xf32>
    %cst_143 = arith.constant dense<0.000000e+00> : vector<16xf32>
    %247 = vector.multi_reduction <add>, %246, %cst_143 [1] : vector<16x128xf32> to vector<16xf32>
    %248 = vector.shape_cast %247 : vector<16xf32> to vector<16x1xf32>
    %cst_144 = arith.constant 1.280000e+02 : f32
    %249 = vector.broadcast %cst_144 : f32 to vector<16x1xf32>
    %250 = arith.divf %248, %249 : vector<16x1xf32>
    %251 = vector.broadcast %243 : vector<16x1xf32> to vector<16x128xf32>
    %252 = arith.subf %207, %251 : vector<16x128xf32>
    %cst_145 = arith.constant 9.99999974E-6 : f32
    %253 = vector.broadcast %cst_145 : f32 to vector<16x1xf32>
    %254 = arith.addf %250, %253 : vector<16x1xf32>
    %255 = math.rsqrt %254 : vector<16x1xf32>
    %256 = vector.broadcast %255 : vector<16x1xf32> to vector<16x128xf32>
    %257 = arith.mulf %252, %256 : vector<16x128xf32>
    %258 = vector.broadcast %209 : vector<1x128xf32> to vector<16x128xf32>
    %259 = arith.mulf %257, %258 : vector<16x128xf32>
    %260 = vector.broadcast %211 : vector<1x128xf32> to vector<16x128xf32>
    %261 = arith.addf %259, %260 : vector<16x128xf32>
    %262 = arith.truncf %261 : vector<16x128xf32> to vector<16x128xbf16>
    %cst_146 = arith.constant dense<0.000000e+00> : vector<16x128xf32>
    %263 = tpu.matmul %262, %217, %cst_146 {dimension_numbers = #tpu.dot_dimension_numbers<[1], [0], [0], [1], [0, 0, 1, 1], [], []>} : vector<16x128xbf16>, vector<128x128xbf16>, vector<16x128xf32> -> vector<16x128xf32>
    %264 = vector.broadcast %219 : vector<1x128xf32> to vector<16x128xf32>
    %265 = arith.addf %263, %264 : vector<16x128xf32>
    %cst_147 = arith.constant dense<0.000000e+00> : vector<16x128xf32>
    %266 = tpu.matmul %262, %221, %cst_147 {dimension_numbers = #tpu.dot_dimension_numbers<[1], [0], [0], [1], [0, 0, 1, 1], [], []>} : vector<16x128xbf16>, vector<128x128xbf16>, vector<16x128xf32> -> vector<16x128xf32>
    %267 = vector.broadcast %223 : vector<1x128xf32> to vector<16x128xf32>
    %268 = arith.addf %266, %267 : vector<16x128xf32>
    %cst_148 = arith.constant dense<0.000000e+00> : vector<16x128xf32>
    %269 = tpu.matmul %262, %225, %cst_148 {dimension_numbers = #tpu.dot_dimension_numbers<[1], [0], [0], [1], [0, 0, 1, 1], [], []>} : vector<16x128xbf16>, vector<128x128xbf16>, vector<16x128xf32> -> vector<16x128xf32>
    %270 = vector.broadcast %227 : vector<1x128xf32> to vector<16x128xf32>
    %271 = arith.addf %269, %270 : vector<16x128xf32>
    %272 = vector.shape_cast %265 : vector<16x128xf32> to vector<2x8x128xf32>
    %273 = arith.truncf %272 : vector<2x8x128xf32> to vector<2x8x128xbf16>
    %274 = vector.shape_cast %268 : vector<16x128xf32> to vector<2x8x128xf32>
    %275 = arith.truncf %274 : vector<2x8x128xf32> to vector<2x8x128xbf16>
    %276 = vector.shape_cast %271 : vector<16x128xf32> to vector<2x8x128xf32>
    %277 = arith.truncf %276 : vector<2x8x128xf32> to vector<2x8x128xbf16>
    %278 = vector.extract_strided_slice %273 {offsets = [0, 0, 0], sizes = [2, 8, 32], strides = [1, 1, 1]} : vector<2x8x128xbf16> to vector<2x8x32xbf16>
    %279 = vector.extract_strided_slice %275 {offsets = [0, 0, 0], sizes = [2, 8, 32], strides = [1, 1, 1]} : vector<2x8x128xbf16> to vector<2x8x32xbf16>
    "tpu.trace_start"() <{level = 10 : i32, message = "bqd,bkd->bqk"}> : () -> ()
    %cst_149 = arith.constant dense<0.000000e+00> : vector<2x8x8xf32>
    %280 = tpu.matmul %278, %279, %cst_149 {dimension_numbers = #tpu.dot_dimension_numbers<[2], [2], [1], [1], [0, 0, 0, 1, 1, 1], [0], [0]>} : vector<2x8x32xbf16>, vector<2x8x32xbf16>, vector<2x8x8xf32> -> vector<2x8x8xf32>
    "tpu.trace_stop"() : () -> ()
    %cst_150 = arith.constant 0.176776692 : f32
    %281 = vector.broadcast %cst_150 : f32 to vector<2x8x8xf32>
    %282 = arith.mulf %280, %281 : vector<2x8x8xf32>
    %283 = arith.addf %282, %10 : vector<2x8x8xf32>
    %cst_151 = arith.constant dense<0xFF800000> : vector<2x8xf32>
    %284 = vector.multi_reduction <maximumf>, %283, %cst_151 [2] : vector<2x8x8xf32> to vector<2x8xf32>
    %285 = vector.shape_cast %284 : vector<2x8xf32> to vector<2x8x1xf32>
    %286 = vector.broadcast %285 : vector<2x8x1xf32> to vector<2x8x8xf32>
    %287 = arith.subf %283, %286 : vector<2x8x8xf32>
    %288 = math.exp %287 : vector<2x8x8xf32>
    %cst_152 = arith.constant dense<0.000000e+00> : vector<2x8xf32>
    %289 = vector.multi_reduction <add>, %288, %cst_152 [2] : vector<2x8x8xf32> to vector<2x8xf32>
    %290 = vector.shape_cast %289 : vector<2x8xf32> to vector<2x8x1xf32>
    %291 = tpu.reciprocal %290 {approx = true} : vector<2x8x1xf32> -> vector<2x8x1xf32>
    %292 = vector.broadcast %291 : vector<2x8x1xf32> to vector<2x8x8xf32>
    %293 = arith.mulf %288, %292 : vector<2x8x8xf32>
    %294 = arith.truncf %293 : vector<2x8x8xf32> to vector<2x8x8xbf16>
    %295 = vector.extract_strided_slice %277 {offsets = [0, 0, 0], sizes = [2, 8, 32], strides = [1, 1, 1]} : vector<2x8x128xbf16> to vector<2x8x32xbf16>
    "tpu.trace_start"() <{level = 10 : i32, message = "bqk,bkd->bqd"}> : () -> ()
    %cst_153 = arith.constant dense<0.000000e+00> : vector<2x8x32xf32>
    %296 = tpu.matmul %294, %295, %cst_153 {dimension_numbers = #tpu.dot_dimension_numbers<[2], [1], [1], [2], [0, 0, 0, 1, 1, 2], [0], [0]>} : vector<2x8x8xbf16>, vector<2x8x32xbf16>, vector<2x8x32xf32> -> vector<2x8x32xf32>
    "tpu.trace_stop"() : () -> ()
    %297 = vector.extract_strided_slice %273 {offsets = [0, 0, 32], sizes = [2, 8, 32], strides = [1, 1, 1]} : vector<2x8x128xbf16> to vector<2x8x32xbf16>
    %298 = vector.extract_strided_slice %275 {offsets = [0, 0, 32], sizes = [2, 8, 32], strides = [1, 1, 1]} : vector<2x8x128xbf16> to vector<2x8x32xbf16>
    "tpu.trace_start"() <{level = 10 : i32, message = "bqd,bkd->bqk"}> : () -> ()
    %cst_154 = arith.constant dense<0.000000e+00> : vector<2x8x8xf32>
    %299 = tpu.matmul %297, %298, %cst_154 {dimension_numbers = #tpu.dot_dimension_numbers<[2], [2], [1], [1], [0, 0, 0, 1, 1, 1], [0], [0]>} : vector<2x8x32xbf16>, vector<2x8x32xbf16>, vector<2x8x8xf32> -> vector<2x8x8xf32>
    "tpu.trace_stop"() : () -> ()
    %cst_155 = arith.constant 0.176776692 : f32
    %300 = vector.broadcast %cst_155 : f32 to vector<2x8x8xf32>
    %301 = arith.mulf %299, %300 : vector<2x8x8xf32>
    %302 = arith.addf %301, %10 : vector<2x8x8xf32>
    %cst_156 = arith.constant dense<0xFF800000> : vector<2x8xf32>
    %303 = vector.multi_reduction <maximumf>, %302, %cst_156 [2] : vector<2x8x8xf32> to vector<2x8xf32>
    %304 = vector.shape_cast %303 : vector<2x8xf32> to vector<2x8x1xf32>
    %305 = vector.broadcast %304 : vector<2x8x1xf32> to vector<2x8x8xf32>
    %306 = arith.subf %302, %305 : vector<2x8x8xf32>
    %307 = math.exp %306 : vector<2x8x8xf32>
    %cst_157 = arith.constant dense<0.000000e+00> : vector<2x8xf32>
    %308 = vector.multi_reduction <add>, %307, %cst_157 [2] : vector<2x8x8xf32> to vector<2x8xf32>
    %309 = vector.shape_cast %308 : vector<2x8xf32> to vector<2x8x1xf32>
    %310 = tpu.reciprocal %309 {approx = true} : vector<2x8x1xf32> -> vector<2x8x1xf32>
    %311 = vector.broadcast %310 : vector<2x8x1xf32> to vector<2x8x8xf32>
    %312 = arith.mulf %307, %311 : vector<2x8x8xf32>
    %313 = arith.truncf %312 : vector<2x8x8xf32> to vector<2x8x8xbf16>
    %314 = vector.extract_strided_slice %277 {offsets = [0, 0, 32], sizes = [2, 8, 32], strides = [1, 1, 1]} : vector<2x8x128xbf16> to vector<2x8x32xbf16>
    "tpu.trace_start"() <{level = 10 : i32, message = "bqk,bkd->bqd"}> : () -> ()
    %cst_158 = arith.constant dense<0.000000e+00> : vector<2x8x32xf32>
    %315 = tpu.matmul %313, %314, %cst_158 {dimension_numbers = #tpu.dot_dimension_numbers<[2], [1], [1], [2], [0, 0, 0, 1, 1, 2], [0], [0]>} : vector<2x8x8xbf16>, vector<2x8x32xbf16>, vector<2x8x32xf32> -> vector<2x8x32xf32>
    "tpu.trace_stop"() : () -> ()
    %316 = vector.extract_strided_slice %273 {offsets = [0, 0, 64], sizes = [2, 8, 32], strides = [1, 1, 1]} : vector<2x8x128xbf16> to vector<2x8x32xbf16>
    %317 = vector.extract_strided_slice %275 {offsets = [0, 0, 64], sizes = [2, 8, 32], strides = [1, 1, 1]} : vector<2x8x128xbf16> to vector<2x8x32xbf16>
    "tpu.trace_start"() <{level = 10 : i32, message = "bqd,bkd->bqk"}> : () -> ()
    %cst_159 = arith.constant dense<0.000000e+00> : vector<2x8x8xf32>
    %318 = tpu.matmul %316, %317, %cst_159 {dimension_numbers = #tpu.dot_dimension_numbers<[2], [2], [1], [1], [0, 0, 0, 1, 1, 1], [0], [0]>} : vector<2x8x32xbf16>, vector<2x8x32xbf16>, vector<2x8x8xf32> -> vector<2x8x8xf32>
    "tpu.trace_stop"() : () -> ()
    %cst_160 = arith.constant 0.176776692 : f32
    %319 = vector.broadcast %cst_160 : f32 to vector<2x8x8xf32>
    %320 = arith.mulf %318, %319 : vector<2x8x8xf32>
    %321 = arith.addf %320, %10 : vector<2x8x8xf32>
    %cst_161 = arith.constant dense<0xFF800000> : vector<2x8xf32>
    %322 = vector.multi_reduction <maximumf>, %321, %cst_161 [2] : vector<2x8x8xf32> to vector<2x8xf32>
    %323 = vector.shape_cast %322 : vector<2x8xf32> to vector<2x8x1xf32>
    %324 = vector.broadcast %323 : vector<2x8x1xf32> to vector<2x8x8xf32>
    %325 = arith.subf %321, %324 : vector<2x8x8xf32>
    %326 = math.exp %325 : vector<2x8x8xf32>
    %cst_162 = arith.constant dense<0.000000e+00> : vector<2x8xf32>
    %327 = vector.multi_reduction <add>, %326, %cst_162 [2] : vector<2x8x8xf32> to vector<2x8xf32>
    %328 = vector.shape_cast %327 : vector<2x8xf32> to vector<2x8x1xf32>
    %329 = tpu.reciprocal %328 {approx = true} : vector<2x8x1xf32> -> vector<2x8x1xf32>
    %330 = vector.broadcast %329 : vector<2x8x1xf32> to vector<2x8x8xf32>
    %331 = arith.mulf %326, %330 : vector<2x8x8xf32>
    %332 = arith.truncf %331 : vector<2x8x8xf32> to vector<2x8x8xbf16>
    %333 = vector.extract_strided_slice %277 {offsets = [0, 0, 64], sizes = [2, 8, 32], strides = [1, 1, 1]} : vector<2x8x128xbf16> to vector<2x8x32xbf16>
    "tpu.trace_start"() <{level = 10 : i32, message = "bqk,bkd->bqd"}> : () -> ()
    %cst_163 = arith.constant dense<0.000000e+00> : vector<2x8x32xf32>
    %334 = tpu.matmul %332, %333, %cst_163 {dimension_numbers = #tpu.dot_dimension_numbers<[2], [1], [1], [2], [0, 0, 0, 1, 1, 2], [0], [0]>} : vector<2x8x8xbf16>, vector<2x8x32xbf16>, vector<2x8x32xf32> -> vector<2x8x32xf32>
    "tpu.trace_stop"() : () -> ()
    %335 = vector.extract_strided_slice %273 {offsets = [0, 0, 96], sizes = [2, 8, 32], strides = [1, 1, 1]} : vector<2x8x128xbf16> to vector<2x8x32xbf16>
    %336 = vector.extract_strided_slice %275 {offsets = [0, 0, 96], sizes = [2, 8, 32], strides = [1, 1, 1]} : vector<2x8x128xbf16> to vector<2x8x32xbf16>
    "tpu.trace_start"() <{level = 10 : i32, message = "bqd,bkd->bqk"}> : () -> ()
    %cst_164 = arith.constant dense<0.000000e+00> : vector<2x8x8xf32>
    %337 = tpu.matmul %335, %336, %cst_164 {dimension_numbers = #tpu.dot_dimension_numbers<[2], [2], [1], [1], [0, 0, 0, 1, 1, 1], [0], [0]>} : vector<2x8x32xbf16>, vector<2x8x32xbf16>, vector<2x8x8xf32> -> vector<2x8x8xf32>
    "tpu.trace_stop"() : () -> ()
    %cst_165 = arith.constant 0.176776692 : f32
    %338 = vector.broadcast %cst_165 : f32 to vector<2x8x8xf32>
    %339 = arith.mulf %337, %338 : vector<2x8x8xf32>
    %340 = arith.addf %339, %10 : vector<2x8x8xf32>
    %cst_166 = arith.constant dense<0xFF800000> : vector<2x8xf32>
    %341 = vector.multi_reduction <maximumf>, %340, %cst_166 [2] : vector<2x8x8xf32> to vector<2x8xf32>
    %342 = vector.shape_cast %341 : vector<2x8xf32> to vector<2x8x1xf32>
    %343 = vector.broadcast %342 : vector<2x8x1xf32> to vector<2x8x8xf32>
    %344 = arith.subf %340, %343 : vector<2x8x8xf32>
    %345 = math.exp %344 : vector<2x8x8xf32>
    %cst_167 = arith.constant dense<0.000000e+00> : vector<2x8xf32>
    %346 = vector.multi_reduction <add>, %345, %cst_167 [2] : vector<2x8x8xf32> to vector<2x8xf32>
    %347 = vector.shape_cast %346 : vector<2x8xf32> to vector<2x8x1xf32>
    %348 = tpu.reciprocal %347 {approx = true} : vector<2x8x1xf32> -> vector<2x8x1xf32>
    %349 = vector.broadcast %348 : vector<2x8x1xf32> to vector<2x8x8xf32>
    %350 = arith.mulf %345, %349 : vector<2x8x8xf32>
    %351 = arith.truncf %350 : vector<2x8x8xf32> to vector<2x8x8xbf16>
    %352 = vector.extract_strided_slice %277 {offsets = [0, 0, 96], sizes = [2, 8, 32], strides = [1, 1, 1]} : vector<2x8x128xbf16> to vector<2x8x32xbf16>
    "tpu.trace_start"() <{level = 10 : i32, message = "bqk,bkd->bqd"}> : () -> ()
    %cst_168 = arith.constant dense<0.000000e+00> : vector<2x8x32xf32>
    %353 = tpu.matmul %351, %352, %cst_168 {dimension_numbers = #tpu.dot_dimension_numbers<[2], [1], [1], [2], [0, 0, 0, 1, 1, 2], [0], [0]>} : vector<2x8x8xbf16>, vector<2x8x32xbf16>, vector<2x8x32xf32> -> vector<2x8x32xf32>
    "tpu.trace_stop"() : () -> ()
    %354 = tpu.concatenate %296, %315, %334, %353 in 2 : vector<2x8x32xf32>, vector<2x8x32xf32>, vector<2x8x32xf32>, vector<2x8x32xf32> -> vector<2x8x128xf32>
    %355 = vector.shape_cast %354 : vector<2x8x128xf32> to vector<16x128xf32>
    %356 = arith.truncf %355 : vector<16x128xf32> to vector<16x128xbf16>
    %cst_169 = arith.constant dense<0.000000e+00> : vector<16x128xf32>
    %357 = tpu.matmul %356, %229, %cst_169 {dimension_numbers = #tpu.dot_dimension_numbers<[1], [0], [0], [1], [0, 0, 1, 1], [], []>} : vector<16x128xbf16>, vector<128x128xbf16>, vector<16x128xf32> -> vector<16x128xf32>
    %358 = vector.broadcast %231 : vector<1x128xf32> to vector<16x128xf32>
    %359 = arith.addf %357, %358 : vector<16x128xf32>
    %cst_170 = arith.constant dense<0.000000e+00> : vector<16xf32>
    %360 = vector.multi_reduction <add>, %207, %cst_170 [1] : vector<16x128xf32> to vector<16xf32>
    %361 = vector.shape_cast %360 : vector<16xf32> to vector<16x1xf32>
    %cst_171 = arith.constant 1.280000e+02 : f32
    %362 = vector.broadcast %cst_171 : f32 to vector<16x1xf32>
    %363 = arith.divf %361, %362 : vector<16x1xf32>
    %364 = vector.broadcast %363 : vector<16x1xf32> to vector<16x128xf32>
    %365 = arith.subf %207, %364 : vector<16x128xf32>
    %366 = arith.mulf %365, %365 : vector<16x128xf32>
    %cst_172 = arith.constant dense<0.000000e+00> : vector<16xf32>
    %367 = vector.multi_reduction <add>, %366, %cst_172 [1] : vector<16x128xf32> to vector<16xf32>
    %368 = vector.shape_cast %367 : vector<16xf32> to vector<16x1xf32>
    %cst_173 = arith.constant 1.280000e+02 : f32
    %369 = vector.broadcast %cst_173 : f32 to vector<16x1xf32>
    %370 = arith.divf %368, %369 : vector<16x1xf32>
    %371 = vector.broadcast %363 : vector<16x1xf32> to vector<16x128xf32>
    %372 = arith.subf %207, %371 : vector<16x128xf32>
    %cst_174 = arith.constant 9.99999974E-6 : f32
    %373 = vector.broadcast %cst_174 : f32 to vector<16x1xf32>
    %374 = arith.addf %370, %373 : vector<16x1xf32>
    %375 = math.rsqrt %374 : vector<16x1xf32>
    %376 = vector.broadcast %375 : vector<16x1xf32> to vector<16x128xf32>
    %377 = arith.mulf %372, %376 : vector<16x128xf32>
    %378 = vector.broadcast %213 : vector<1x128xf32> to vector<16x128xf32>
    %379 = arith.mulf %377, %378 : vector<16x128xf32>
    %380 = vector.broadcast %215 : vector<1x128xf32> to vector<16x128xf32>
    %381 = arith.addf %379, %380 : vector<16x128xf32>
    %382 = arith.truncf %381 : vector<16x128xf32> to vector<16x128xbf16>
    %cst_175 = arith.constant dense<0.000000e+00> : vector<16x512xf32>
    %383 = tpu.matmul %382, %233, %cst_175 {dimension_numbers = #tpu.dot_dimension_numbers<[1], [0], [0], [1], [0, 0, 1, 1], [], []>} : vector<16x128xbf16>, vector<128x512xbf16>, vector<16x512xf32> -> vector<16x512xf32>
    %384 = vector.broadcast %235 : vector<1x512xf32> to vector<16x512xf32>
    %385 = arith.addf %383, %384 : vector<16x512xf32>
    %386 = arith.mulf %385, %385 : vector<16x512xf32>
    %387 = arith.mulf %385, %386 : vector<16x512xf32>
    %cst_176 = arith.constant 4.471500e-02 : f32
    %388 = vector.broadcast %cst_176 : f32 to vector<16x512xf32>
    %389 = arith.mulf %388, %387 : vector<16x512xf32>
    %390 = arith.addf %385, %389 : vector<16x512xf32>
    %cst_177 = arith.constant 0.797884583 : f32
    %391 = vector.broadcast %cst_177 : f32 to vector<16x512xf32>
    %392 = arith.mulf %391, %390 : vector<16x512xf32>
    %393 = math.tanh %392 : vector<16x512xf32>
    %cst_178 = arith.constant 1.000000e+00 : f32
    %394 = vector.broadcast %cst_178 : f32 to vector<16x512xf32>
    %395 = arith.addf %394, %393 : vector<16x512xf32>
    %cst_179 = arith.constant 5.000000e-01 : f32
    %396 = vector.broadcast %cst_179 : f32 to vector<16x512xf32>
    %397 = arith.mulf %396, %395 : vector<16x512xf32>
    %398 = arith.mulf %385, %397 : vector<16x512xf32>
    %399 = arith.truncf %398 : vector<16x512xf32> to vector<16x512xbf16>
    %cst_180 = arith.constant dense<0.000000e+00> : vector<16x128xf32>
    %400 = tpu.matmul %399, %237, %cst_180 {dimension_numbers = #tpu.dot_dimension_numbers<[1], [0], [0], [1], [0, 0, 1, 1], [], []>} : vector<16x512xbf16>, vector<512x128xbf16>, vector<16x128xf32> -> vector<16x128xf32>
    %401 = vector.broadcast %239 : vector<1x128xf32> to vector<16x128xf32>
    %402 = arith.addf %400, %401 : vector<16x128xf32>
    %403 = arith.addf %207, %359 : vector<16x128xf32>
    %404 = arith.addf %403, %402 : vector<16x128xf32>
    %cst_181 = arith.constant dense<0.000000e+00> : vector<16xf32>
    %405 = vector.multi_reduction <add>, %404, %cst_181 [1] : vector<16x128xf32> to vector<16xf32>
    %406 = vector.shape_cast %405 : vector<16xf32> to vector<16x1xf32>
    %cst_182 = arith.constant 1.280000e+02 : f32
    %407 = vector.broadcast %cst_182 : f32 to vector<16x1xf32>
    %408 = arith.divf %406, %407 : vector<16x1xf32>
    %409 = vector.broadcast %408 : vector<16x1xf32> to vector<16x128xf32>
    %410 = arith.subf %404, %409 : vector<16x128xf32>
    %411 = arith.mulf %410, %410 : vector<16x128xf32>
    %cst_183 = arith.constant dense<0.000000e+00> : vector<16xf32>
    %412 = vector.multi_reduction <add>, %411, %cst_183 [1] : vector<16x128xf32> to vector<16xf32>
    %413 = vector.shape_cast %412 : vector<16xf32> to vector<16x1xf32>
    %cst_184 = arith.constant 1.280000e+02 : f32
    %414 = vector.broadcast %cst_184 : f32 to vector<16x1xf32>
    %415 = arith.divf %413, %414 : vector<16x1xf32>
    %416 = vector.broadcast %408 : vector<16x1xf32> to vector<16x128xf32>
    %417 = arith.subf %404, %416 : vector<16x128xf32>
    %cst_185 = arith.constant 9.99999974E-6 : f32
    %418 = vector.broadcast %cst_185 : f32 to vector<16x1xf32>
    %419 = arith.addf %415, %418 : vector<16x1xf32>
    %420 = math.rsqrt %419 : vector<16x1xf32>
    %421 = vector.broadcast %420 : vector<16x1xf32> to vector<16x128xf32>
    %422 = arith.mulf %417, %421 : vector<16x128xf32>
    %423 = vector.broadcast %1 : vector<1x128xf32> to vector<16x128xf32>
    %424 = arith.mulf %422, %423 : vector<16x128xf32>
    %425 = vector.broadcast %2 : vector<1x128xf32> to vector<16x128xf32>
    %426 = arith.addf %424, %425 : vector<16x128xf32>
    %c0_186 = arith.constant 0 : index
    %c0_187 = arith.constant 0 : index
    %427 = vector.load %arg20[%c0_186, %c0_187] : memref<16x128xf32, #tpu.memory_space<vmem>>, vector<16x128xf32>
    tpu.vector_store %arg20[%c0_186, %c0_187], %426 {strides = array<i32>} : memref<16x128xf32, #tpu.memory_space<vmem>>, vector<16x128xf32>,
    return
  }
  func.func @transform_0(%arg0: i32) -> (i32, i32) {
    %c0_i32 = arith.constant 0 : i32
    %c0_i32_0 = arith.constant 0 : i32
    return %arg0, %c0_i32 : i32, i32
  }
  func.func @transform_1(%arg0: i32) -> (i32, i32, i32) {
    %c0_i32 = arith.constant 0 : i32
    %c0_i32_0 = arith.constant 0 : i32
    %c0_i32_1 = arith.constant 0 : i32
    %c0_i32_2 = arith.constant 0 : i32
    return %c0_i32, %c0_i32_0, %c0_i32_1 : i32, i32, i32
  }
  func.func @transform_2(%arg0: i32) -> (i32, i32, i32) {
    %c0_i32 = arith.constant 0 : i32
    %c0_i32_0 = arith.constant 0 : i32
    %c0_i32_1 = arith.constant 0 : i32
    %c0_i32_2 = arith.constant 0 : i32
    return %c0_i32, %c0_i32_0, %c0_i32_1 : i32, i32, i32
  }
  func.func @transform_3(%arg0: i32) -> (i32, i32, i32) {
    %c0_i32 = arith.constant 0 : i32
    %c0_i32_0 = arith.constant 0 : i32
    %c0_i32_1 = arith.constant 0 : i32
    %c0_i32_2 = arith.constant 0 : i32
    return %c0_i32, %c0_i32_0, %c0_i32_1 : i32, i32, i32
  }
  func.func @transform_4(%arg0: i32) -> (i32, i32, i32) {
    %c0_i32 = arith.constant 0 : i32
    %c0_i32_0 = arith.constant 0 : i32
    %c0_i32_1 = arith.constant 0 : i32
    %c0_i32_2 = arith.constant 0 : i32
    return %c0_i32, %c0_i32_0, %c0_i32_1 : i32, i32, i32
  }
  func.func @transform_5(%arg0: i32) -> (i32, i32, i32) {
    %c0_i32 = arith.constant 0 : i32
    %c0_i32_0 = arith.constant 0 : i32
    %c0_i32_1 = arith.constant 0 : i32
    %c0_i32_2 = arith.constant 0 : i32
    return %c0_i32, %c0_i32_0, %c0_i32_1 : i32, i32, i32
  }
  func.func @transform_6(%arg0: i32) -> (i32, i32, i32) {
    %c0_i32 = arith.constant 0 : i32
    %c0_i32_0 = arith.constant 0 : i32
    %c0_i32_1 = arith.constant 0 : i32
    %c0_i32_2 = arith.constant 0 : i32
    return %c0_i32, %c0_i32_0, %c0_i32_1 : i32, i32, i32
  }
  func.func @transform_7(%arg0: i32) -> (i32, i32, i32) {
    %c0_i32 = arith.constant 0 : i32
    %c0_i32_0 = arith.constant 0 : i32
    %c0_i32_1 = arith.constant 0 : i32
    %c0_i32_2 = arith.constant 0 : i32
    return %c0_i32, %c0_i32_0, %c0_i32_1 : i32, i32, i32
  }
  func.func @transform_8(%arg0: i32) -> (i32, i32, i32) {
    %c0_i32 = arith.constant 0 : i32
    %c0_i32_0 = arith.constant 0 : i32
    %c0_i32_1 = arith.constant 0 : i32
    %c0_i32_2 = arith.constant 0 : i32
    return %c0_i32, %c0_i32_0, %c0_i32_1 : i32, i32, i32
  }
  func.func @transform_9(%arg0: i32) -> (i32, i32, i32) {
    %c0_i32 = arith.constant 0 : i32
    %c0_i32_0 = arith.constant 0 : i32
    %c0_i32_1 = arith.constant 0 : i32
    %c0_i32_2 = arith.constant 0 : i32
    return %c0_i32, %c0_i32_0, %c0_i32_1 : i32, i32, i32
  }
  func.func @transform_10(%arg0: i32) -> (i32, i32, i32) {
    %c0_i32 = arith.constant 0 : i32
    %c0_i32_0 = arith.constant 0 : i32
    %c0_i32_1 = arith.constant 0 : i32
    %c0_i32_2 = arith.constant 0 : i32
    return %c0_i32, %c0_i32_0, %c0_i32_1 : i32, i32, i32
  }
  func.func @transform_11(%arg0: i32) -> (i32, i32, i32) {
    %c0_i32 = arith.constant 0 : i32
    %c0_i32_0 = arith.constant 0 : i32
    %c0_i32_1 = arith.constant 0 : i32
    %c0_i32_2 = arith.constant 0 : i32
    return %c0_i32, %c0_i32_0, %c0_i32_1 : i32, i32, i32
  }
  func.func @transform_12(%arg0: i32) -> (i32, i32, i32) {
    %c0_i32 = arith.constant 0 : i32
    %c0_i32_0 = arith.constant 0 : i32
    %c0_i32_1 = arith.constant 0 : i32
    %c0_i32_2 = arith.constant 0 : i32
    return %c0_i32, %c0_i32_0, %c0_i32_1 : i32, i32, i32
  }
  func.func @transform_13(%arg0: i32) -> (i32, i32, i32) {
    %c0_i32 = arith.constant 0 : i32
    %c0_i32_0 = arith.constant 0 : i32
    %c0_i32_1 = arith.constant 0 : i32
    %c0_i32_2 = arith.constant 0 : i32
    return %c0_i32, %c0_i32_0, %c0_i32_1 : i32, i32, i32
  }
  func.func @transform_14(%arg0: i32) -> (i32, i32, i32) {
    %c0_i32 = arith.constant 0 : i32
    %c0_i32_0 = arith.constant 0 : i32
    %c0_i32_1 = arith.constant 0 : i32
    %c0_i32_2 = arith.constant 0 : i32
    return %c0_i32, %c0_i32_0, %c0_i32_1 : i32, i32, i32
  }
  func.func @transform_15(%arg0: i32) -> (i32, i32, i32) {
    %c0_i32 = arith.constant 0 : i32
    %c0_i32_0 = arith.constant 0 : i32
    %c0_i32_1 = arith.constant 0 : i32
    %c0_i32_2 = arith.constant 0 : i32
    return %c0_i32, %c0_i32_0, %c0_i32_1 : i32, i32, i32
  }
  func.func @transform_16(%arg0: i32) -> (i32, i32, i32) {
    %c0_i32 = arith.constant 0 : i32
    %c0_i32_0 = arith.constant 0 : i32
    %c0_i32_1 = arith.constant 0 : i32
    %c0_i32_2 = arith.constant 0 : i32
    return %c0_i32, %c0_i32_0, %c0_i32_1 : i32, i32, i32
  }
  func.func @transform_17(%arg0: i32) -> (i32, i32) {
    %c0_i32 = arith.constant 0 : i32
    %c0_i32_0 = arith.constant 0 : i32
    %c0_i32_1 = arith.constant 0 : i32
    return %c0_i32, %c0_i32_0 : i32, i32
  }
  func.func @transform_18(%arg0: i32) -> (i32, i32) {
    %c0_i32 = arith.constant 0 : i32
    %c0_i32_0 = arith.constant 0 : i32
    %c0_i32_1 = arith.constant 0 : i32
    return %c0_i32, %c0_i32_0 : i32, i32
  }
  func.func @transform_19(%arg0: i32) -> (i32, i32) {
    %c0_i32 = arith.constant 0 : i32
    %c0_i32_0 = arith.constant 0 : i32
    return %arg0, %c0_i32 : i32, i32
  }
}

</mosaic_0001>

<bundles_post_ra>
// kernel: tpu_custom_call.1
= control target key start
LH: loop header
LB: loop body
LE: loop exit
PB: predicated region body
PF: predicated region fallthrough
CT: control target
= control target key end

     0   :  { %s7959_s0 = inlined_call_operand.hbm [shape: f32[32,128], index: 0, kind: input, shape index: {}]   ;;  %s7960_s1 = inlined_call_operand.hbm [shape: f32[2,1,128], index: 1, kind: input, shape index: {}]   ;;  %s7961_s2 = inlined_call_operand.vmem [shape: f32[2,1,128], index: 2, kind: input, shape index: {}]   ;;  %s7962_s3 = inlined_call_operand.vmem [shape: f32[2,1,128], index: 3, kind: input, shape index: {}]   ;;  %s7963_s4 = inlined_call_operand.vmem [shape: f32[2,1,128], index: 4, kind: input, shape index: {}]   ;;  %s7964_s5 = inlined_call_operand.hbm [shape: bf16[2,128,128], index: 5, kind: input, shape index: {}]   ;;  %s7965_s6 = inlined_call_operand.vmem [shape: f32[2,1,128], index: 6, kind: input, shape index: {}]   ;;  %s7966_s7 = inlined_call_operand.hbm [shape: bf16[2,128,128], index: 7, kind: input, shape index: {}]   ;;  %s7967_s8 = inlined_call_operand.hbm [shape: f32[2,1,128], index: 8, kind: input, shape index: {}]   ;;  %s7968_s9 = inlined_call_operand.hbm [shape: bf16[2,128,128], index: 9, kind: input, shape index: {}]   ;;  %s7969_s10 = inlined_call_operand.vmem [shape: f32[2,1,128], index: 10, kind: input, shape index: {}]   ;;  %s7970_s11 = inlined_call_operand.hbm [shape: bf16[2,128,128], index: 11, kind: input, shape index: {}]   ;;  %s7971_s12 = inlined_call_operand.vmem [shape: f32[2,1,128], index: 12, kind: input, shape index: {}]   ;;  %s7972_s13 = inlined_call_operand.hbm [shape: bf16[2,128,512], index: 13, kind: input, shape index: {}]   ;;  %s7973_s14 = inlined_call_operand.vmem [shape: f32[2,1,512], index: 14, kind: input, shape index: {}]   ;;  %s7974_s15 = inlined_call_operand.hbm [shape: bf16[2,512,128], index: 15, kind: input, shape index: {}]   ;;  %s7975_s16 = inlined_call_operand.vmem [shape: f32[2,1,128], index: 16, kind: input, shape index: {}]   ;;  %s7976_s17 = inlined_call_operand.vmem [shape: f32[1,128], index: 17, kind: input, shape index: {}]   ;;  %s7977_s18 = inlined_call_operand.vmem [shape: f32[1,128], index: 18, kind: input, shape index: {}]   ;;  %s7978_s19 = inlined_call_operand.hbm [shape: f32[32,128], index: 19, kind: output, shape index: {}]  }
   0x1   :  { %7993 = sst [smem:[#allocation24_spill]] %s7959_s0 }
   0x2   :  { %7994 = sst [smem:[#allocation25_spill]] %s7960_s1 }
   0x3   :  { %7995 = sst [smem:[#allocation26_spill]] %s7961_s2 }
   0x4   :  { %7996 = sst [smem:[#allocation27_spill]] %s7962_s3 }
   0x5   :  { %7997 = sst [smem:[#allocation28_spill]] %s7964_s5 }
   0x6   :  { %7998 = sst [smem:[#allocation29_spill]] %s7966_s7 }
   0x7   :  { %7999 = sst [smem:[#allocation30_spill]] %s7967_s8 }
   0x8   :  { %8000 = sst [smem:[#allocation31_spill]] %s7968_s9 }
   0x9   :  { %8001 = sst [smem:[#allocation32_spill]] %s7970_s11 }
   0xa   :  { %8002 = sst [smem:[#allocation33_spill]] %s7972_s13 }
   0xb   :  { %8003 = sst [smem:[#allocation34_spill]] %s7975_s16 }
   0xc   :  { %8004 = sst [smem:[#allocation35_spill]] %s7976_s17 }
   0xd   :  { %8005 = sst [smem:[#allocation36_spill]] %s7977_s18 }
   0xe   :  { %8006 = sst [smem:[#allocation37_spill]] %s7978_s19 }
   0xf   :  { %24 = vsyncpa [#allocation3], 0 }
  0x10   :  { %26 = vsyncpa [#allocation3 + $0x1], 0 }
  0x11   :  { %27 = vsyncpa [#allocation6], 0 }
  0x12   :  { %28 = vsyncpa [#allocation9], 0 }
  0x13   :  { %29 = vsyncpa [#allocation12], 0 }
  0x14   :  { %30 = vsyncpa [#allocation15], 0 }
  0x15   :  { %31 = vsyncpa [#allocation4], 0 }
  0x16   :  { %33 = vsyncpa [#allocation4 + $0x1], 0  ;;  %s7106_s0 = smov 0   ;;  %s7108_s30 = smov 0  }
  0x17   :  { %s7110_s20 = smov 0   ;;  %s7112_s21 = smov 0  }
  0x18 LB: > { %s6980_s1 = smov [#allocation5]   ;;  %s7127_s2 = sadd.s32 4294967295, %s6978_s21   ;;  %s6978_s21 = sphi %s7112_s21, %s8048_s21   ;;  %s6974_s20 = sphi %s7110_s20, %s8047_s20   ;;  %s6970_s30 = sphi %s7108_s30, %s8046_s30   ;;  %s6966_s0 = sphi %s7106_s0, %s8045_s0  }
  0x19   : > { %s486_s22 = sshll.u32 %s6980_s1, 4  ;;  %p5296_p0 = scmp.ge.s32.totalorder %s6978_s21, 1  ;;  %s487_s22 = int_to_ptr.vmem [resolvable:$true] %s486_s22 }
  0x1a   : > { %p7989_p1 = scmp.eq.s32.totalorder %s7127_s2, 0  ;;  %p474_p2 = scmp.lt.s32.totalorder %s6978_s21, 3 }
  0x1b   : > { %s6981_s25 = smov [#allocation8]   ;;  %s6982_s26 = smov [#allocation11]  }
  0x1c   : > { %p7132_p3 = pnand %p5296_p0, %p474_p2  ;;  %s524_s3 = sshll.u32 %s6981_s25, 4  ;;  %s7145_s3 = int_to_ptr.vmem [resolvable:$true] %s524_s3 }
  0x1d   : > { %s7147_s27 = sshll.u32 %s6982_s26, 4  ;;  %s6673_s29 = scalar_lea.vmem %s487_s22, 32  ;;  %s551_s27 = int_to_ptr.vmem [resolvable:$true] %s7147_s27 }
  0x1e   : > { %s8007_s23 = scalar_select %p7132_p3, 1, 0 }
  0x1f   : > { %p6191_p5 = pneg %p7132_p3  ;;  %p6674_p8 = scmp.ne.s32.totalorder %s487_s22, %s6673_s29 }
  0x20   : > { %p6681_p11 = scmp.lt.s32.totalorder %s487_s22, %s487_s22  ;;  %p6682_p12 = scmp.lt.s32.totalorder %s6673_s29, %s6673_s29 }
  0x21   : > { %p7141_p6 = pnand %p6191_p5, %p7989_p1 }
  0x22   : > { %p6683_p13 = por %p6682_p12, %p6681_p11 }
  0x23   : > { %p7151_p7 = pneg %p7141_p6 }
  0x25   : > { %p6676_p9 = pnand %p6674_p8, %p7151_p7 }
  0x27   : > { %p6677_p10 = pneg %p6676_p9 }
  0x29   : > { %p6684_p0 = pnand %p6683_p13, %p6677_p10 }
  0x2b   : > { %6687 = shalt.err (!%p6684_p0)
}
  0x2c   : > { %s6983_s1 = smov 16   ;;  %s7984_s25 = smov 1  }
  0x2d   : > { %s8010_s18 = sld [smem:[#allocation25_spill]]  ;;  %s6699_s17 = scalar_lea.vmem %s7145_s3, 2048 }
  0x2e   : > { %p6700_p2 = scmp.ne.s32.totalorder %s7145_s3, %s6699_s17  ;;  %p6707_p9 = scmp.lt.s32.totalorder %s7145_s3, %s7145_s3 }
  0x2f   : > { %p6708_p10 = scmp.lt.s32.totalorder %s6699_s17, %s6699_s17 }
  0x30   : > { %p6702_p5 = pnand %p6700_p2, %p7151_p7 }
  0x31   : > { %p6709_p11 = por %p6708_p10, %p6707_p9 }
  0x32   : > { %p6703_p8 = pneg %p6702_p5 }
  0x33   : > { %6194 = dma.hbm_to_vmem [thread:$0]  (!%p7141_p6), %s8010_s18, 32, %s487_s22, [#allocation6], %s6983_s1, %s6983_s1, %s7984_s25  }
  0x34   : > { %p6710_p12 = pnand %p6709_p11, %p6703_p8 }
  0x36   : > { %6713 = shalt.err (!%p6710_p12)
}
  0x37   : > { %s7985_s29 = smov 64   ;;  %s7987_s16 = smov 4  }
  0x38   : > { %s8011_s7 = sld [smem:[#allocation29_spill]]  ;;  %s6725_s22 = scalar_lea.vmem %s551_s27, 2048 }
  0x39   : > { %p6726_p13 = scmp.ne.s32.totalorder %s551_s27, %s6725_s22  ;;  %p6733_p5 = scmp.lt.s32.totalorder %s551_s27, %s551_s27 }
  0x3a   : > { %p6734_p8 = scmp.lt.s32.totalorder %s6725_s22, %s6725_s22 }
  0x3b   : > { %p6728_p0 = pnand %p6726_p13, %p7151_p7 }
  0x3c   : > { %p6735_p9 = por %p6734_p8, %p6733_p5 }
  0x3d   : > { %p6729_p2 = pneg %p6728_p0 }
  0x3e   : > { %6200 = dma.hbm_to_vmem [thread:$0]  (!%p7141_p6), %s8011_s7, 2048, %s7145_s3, [#allocation9], %s7985_s29, %s7985_s29, %s7987_s16  }
  0x3f   : > { %p6736_p10 = pnand %p6735_p9, %p6729_p2 }
  0x41   : > { %6739 = shalt.err (!%p6736_p10)
}
  0x42   : > { %s8012_s9 = sld [smem:[#allocation31_spill]]  ;;  %s6987_s3 = smov [#allocation14]  }
  0x43   : > { %s582_s18 = sshll.u32 %s6987_s3, 4  ;;  %s583_s18 = int_to_ptr.vmem [resolvable:$true] %s582_s18 }
  0x44   : > { %s6751_s19 = scalar_lea.vmem %s583_s18, 8192  ;;  %p6759_p0 = scmp.lt.s32.totalorder %s583_s18, %s583_s18 }
  0x45   : > { %p6752_p11 = scmp.ne.s32.totalorder %s583_s18, %s6751_s19  ;;  %p6760_p2 = scmp.lt.s32.totalorder %s6751_s19, %s6751_s19 }
  0x47   : > { %p6754_p12 = pnand %p6752_p11, %p7151_p7  ;;  %p6761_p5 = por %p6760_p2, %p6759_p0 }
  0x48   : > { %6206 = dma.hbm_to_vmem [thread:$0]  (!%p7141_p6), %s8012_s9, 2048, %s551_s27, [#allocation12], %s7985_s29, %s7985_s29, %s7987_s16  }
  0x49   : > { %p6755_p13 = pneg %p6754_p12 }
  0x4b   : > { %p6762_p8 = pnand %p6761_p5, %p6755_p13 }
  0x4d   : > { %6765 = shalt.err (!%p6762_p8)
}
  0x4e   : > { %s6988_s22 = smov 256   ;;  %s8013_s13 = sld [smem:[#allocation33_spill]] }
  0x4f   : > { %s6989_s27 = smov [#allocation7]   ;;  %s6990_s25 = smov [#allocation10]  }
  0x50   : > { %s508_s3 = sshll.u32 %s6989_s27, 4  ;;  %s537_s29 = sshll.u32 %s6990_s25, 4  ;;  %s509_s3 = int_to_ptr.vmem [resolvable:$true] %s508_s3  ;;  %s538_s29 = int_to_ptr.vmem [resolvable:$true] %s537_s29 }
  0x51   : > { %s6777_s16 = scalar_lea.vmem %s509_s3, 2048  ;;  %p6785_p12 = scmp.lt.s32.totalorder %s509_s3, %s509_s3 }
  0x52   : > { %p6778_p9 = scmp.ne.s32.totalorder %s509_s3, %s6777_s16  ;;  %p6786_p13 = scmp.lt.s32.totalorder %s6777_s16, %s6777_s16 }
  0x54   : > { %6212 = dma.hbm_to_vmem [thread:$0]  (!%p7141_p6), %s8013_s13, 8192, %s583_s18, [#allocation15], %s6988_s22, %s6988_s22, %s6983_s1  }
  0x55   : > { %p6780_p10 = pnand %p6778_p9, %p7151_p7  ;;  %p6787_p0 = por %p6786_p13, %p6785_p12 }
  0x57   : > { %p6781_p11 = pneg %p6780_p10 }
  0x59   : > { %p6788_p2 = pnand %p6787_p0, %p6781_p11 }
  0x5b   : > { %6791 = shalt.err (!%p6788_p2)
}
  0x5c   : > { %s8014_s19 = smov 4   ;;  %s8015_s17 = smov 64  }
  0x5d   : > { %s8016_s5 = sld [smem:[#allocation28_spill]]  ;;  %s6803_s25 = scalar_lea.vmem %s538_s29, 32 }
  0x5e   : > { %p6804_p5 = scmp.ne.s32.totalorder %s538_s29, %s6803_s25  ;;  %p6811_p10 = scmp.lt.s32.totalorder %s538_s29, %s538_s29 }
  0x5f   : > { %p6812_p12 = scmp.lt.s32.totalorder %s6803_s25, %s6803_s25 }
  0x60   : > { %p6806_p8 = pnand %p6804_p5, %p7151_p7 }
  0x61   : > { %p6813_p11 = por %p6812_p12, %p6811_p10 }
  0x62   : > { %p6807_p9 = pneg %p6806_p8 }
  0x63   : > { %6197 = dma.hbm_to_vmem [thread:$0]  (!%p7141_p6), %s8016_s5, 2048, %s509_s3, [#allocation6], %s8015_s17, %s8015_s17, %s8014_s19  }
  0x64   : > { %p6814_p13 = pnand %p6813_p11, %p6807_p9 }
  0x66   : > { %6817 = shalt.err (!%p6814_p13)
}
  0x67   : > { %s8017_s16 = smov 1   ;;  %s8018_s8 = sld [smem:[#allocation30_spill]] }
  0x68   : > { %s6991_s3 = smov [#allocation13]   ;;  %s6992_s22 = smov [#allocation16]  }
  0x69   : > { %s566_s18 = sshll.u32 %s6991_s3, 4  ;;  %s598_s5 = sshll.u32 %s6992_s22, 4  ;;  %s567_s18 = int_to_ptr.vmem [resolvable:$true] %s566_s18  ;;  %s599_s5 = int_to_ptr.vmem [resolvable:$true] %s598_s5 }
  0x6a   : > { %s6829_s7 = scalar_lea.vmem %s567_s18, 2048  ;;  %p6837_p8 = scmp.lt.s32.totalorder %s567_s18, %s567_s18 }
  0x6b   : > { %p6830_p0 = scmp.ne.s32.totalorder %s567_s18, %s6829_s7  ;;  %p6838_p9 = scmp.lt.s32.totalorder %s6829_s7, %s6829_s7 }
  0x6d   : > { %6203 = dma.hbm_to_vmem [thread:$0]  (!%p7141_p6), %s8018_s8, 32, %s538_s29, [#allocation9], %s6983_s1, %s6983_s1, %s8017_s16  }
  0x6e   : > { %p6832_p2 = pnand %p6830_p0, %p7151_p7  ;;  %p6839_p10 = por %p6838_p9, %p6837_p8 }
  0x70   : > { %p6833_p5 = pneg %p6832_p2 }
  0x72   : > { %p6840_p12 = pnand %p6839_p10, %p6833_p5 }
  0x74   : > { %6843 = shalt.err (!%p6840_p12)
}
  0x75   : > { %s8019_s11 = sld [smem:[#allocation32_spill]]  ;;  %s6855_s25 = scalar_lea.vmem %s599_s5, 8192 }
  0x76   : > { %p6856_p11 = scmp.ne.s32.totalorder %s599_s5, %s6855_s25  ;;  %p6863_p2 = scmp.lt.s32.totalorder %s599_s5, %s599_s5 }
  0x77   : > { %p6864_p8 = scmp.lt.s32.totalorder %s6855_s25, %s6855_s25 }
  0x78   : > { %p6858_p13 = pnand %p6856_p11, %p7151_p7 }
  0x79   : > { %p6865_p5 = por %p6864_p8, %p6863_p2 }
  0x7a   : > { %p6859_p0 = pneg %p6858_p13 }
  0x7b   : > { %6209 = dma.hbm_to_vmem [thread:$0]  (!%p7141_p6), %s8019_s11, 2048, %s567_s18, [#allocation12], %s8015_s17, %s8015_s17, %s8014_s19  }
  0x7c   : > { %p6866_p9 = pnand %p6865_p5, %p6859_p0 }
  0x7e   : > { %6869 = shalt.err (!%p6866_p9)
}
  0x7f   : > { %6215 = dma.hbm_to_vmem [thread:$0]  (!%p7141_p6), %s7974_s15, 8192, %s599_s5, [#allocation15], %s8015_s17, %s8015_s17, %s8014_s19  }
  0x80   : > { %s5295_s24 = sadd.s32 4294967294, %s6978_s21   ;;  %s7241_s28 = sadd.s32 1, %s6978_s21  }
  0x81   : > { %s46_s26 = sadd.s32 1, %s6974_s20  ;;  %s43_s27 = ssub.s32 %s6978_s21, %s7241_s28 }
  0x82   : > { %p53_p7 = scmp.ne.s32.totalorder %s6974_s20, %s6970_s30  ;;  %p44_p10 = scmp.eq.s32.totalorder %s43_s27, 0 }
  0x83   : > { %p54_p12 = scmp.eq.s32.totalorder %s6978_s21, 0  ;;  %p59_p11 = scmp.ne.s32.totalorder %s6970_s30, %s6966_s0 }
  0x84   : > { %p461_p13 = scmp.eq.s32.totalorder %s7127_s2, 1  ;;  %p467_p8 = scmp.eq.s32.totalorder %s5295_s24, 1 }
  0x85   : > { %s7253_s3 = scalar_select %p44_p10, %s6974_s20, %s46_s26  }
  0x86   : > { %p55_p0 = por %p54_p12, %p53_p7  ;;  %p7257_p2 = por %p7989_p1, %p59_p11 }
  0x87   : > { %p7261_p6 = por %p461_p13, %p53_p7  ;;  %p6232_p5 = scmp.lt.s32.totalorder %s6978_s21, 2 }
  0x88   : > { %s8020_s18 = scalar_select %p7257_p2, 1, 0 }
  0x89   : > { %s8021_s5 = scalar_select %p7261_p6, 1, 0 }
  0x8a   : > { %s621_s19 = sand.u32 1, %s6974_s20   ;;  %p7267_p9 = por %p467_p8, %p59_p11 }
  0x8b   : > { %s5306_s22 = sshll.u32 %s621_s19, 4  ;;  %s5577_s1 = sshll.u32 %s6978_s21, 8 }
  0x8c   : > { %s8022_s17 = scalar_select %p7267_p9, 1, 0 }
  0x8d   : > { %s8023_s7 = sld [smem:[#allocation24_spill]]  ;;  %s625_s26 = scalar_lea.vmem [#allocation2], %s5306_s22 }
  0x8e   : > { %s632_s27 = sshll.u32 %s625_s26, 4  ;;  %p7277_p7 = pnand %p6232_p5, %p55_p0  ;;  %s7281_s27 = int_to_ptr.vmem [resolvable:$true] %s632_s27 }
  0x8f   : > { %s7283_s8 = scalar_lea.sflag [#allocation3], %s621_s19 }
  0x90   : > { %p6872_p12 = pneg %p7277_p7 }
  0x93   : > { %s7275_s16 = scalar_lea.hbm %s8023_s7, %s5577_s1  ;;  %s6875_s22 = scalar_lea.hbm %s8023_s7, 512 }
  0x94   : > { %s6870_s9 = scalar_lea.hbm %s7275_s16, 256  ;;  %p6876_p0 = scmp.lt.s32.totalorder %s7275_s16, %s8023_s7 }
  0x95   : > { %p6871_p10 = scmp.ne.s32.totalorder %s7275_s16, %s6870_s9  ;;  %p6877_p8 = scmp.lt.s32.totalorder %s6875_s22, %s6870_s9 }
  0x97   : > { %p6873_p11 = pnand %p6872_p12, %p6871_p10  ;;  %p6878_p5 = por %p6877_p8, %p6876_p0 }
  0x99   : > { %p6874_p13 = pneg %p6873_p11 }
  0x9b   : > { %p6879_p4 = pnand %p6878_p5, %p6874_p13 }
  0x9d   : > { %6882 = shalt.err (!%p6879_p4)
}
  0x9e   : > { %s6883_s19 = scalar_lea.vmem %s7281_s27, 256  ;;  %s6993_s11 = smov [#allocation2]  }
  0x9f   : > { %p6884_p1 = scmp.ne.s32.totalorder %s7281_s27, %s6883_s19  ;;  %s6888_s13 = sshll.u32 %s6993_s11, 4  ;;  %s6889_s13 = int_to_ptr.vmem [resolvable:$false] %s6888_s13 }
  0xa0   : > { %s6890_s1 = scalar_lea.vmem %s6889_s13, 512  ;;  %p6891_p11 = scmp.lt.s32.totalorder %s7281_s27, %s6889_s13 }
  0xa1   : > { %p6886_p9 = pnand %p6884_p1, %p6872_p12  ;;  %p6892_p6 = scmp.lt.s32.totalorder %s6890_s1, %s6883_s19 }
  0xa3   : > { %p6887_p10 = pneg %p6886_p9  ;;  %p6893_p2 = por %p6892_p6, %p6891_p11 }
  0xa5   : > { %p6894_p3 = pnand %p6893_p2, %p6887_p10 }
  0xa7   : > { %6897 = shalt.err (!%p6894_p3)
}
  0xa8   : > { %s6994_s9 = smov 128   ;;  %s6995_s29 = smov 8  }
  0xa9   : > { %6219 = dma.hbm_to_vmem [thread:$0]  (!%p7277_p7), %s7275_s16, 256, %s7281_s27, %s7283_s8, %s6994_s9, %s6994_s9, %s6995_s29  }
  0xaa   : > { %p8025_p1 = scmp.ne.s32.totalorder %s8007_s23, 0 }
  0xab   : > { %s7307_s11 = sand.u32 (!%p8025_p1), 1, %s6970_s30   ;;  %p8026_p3 = scmp.ne.s32.totalorder (!%p8025_p1), %s8020_s18, 0 }
  0xac   : > { %644 = sbr.rel (%p8025_p1) target bundleno = 7271 (0x1c67), region = 96  ;;  %s5310_s13 = sshll.u32 (!%p8025_p1), %s7307_s11, 4 }
  0xad   : > { %s647_s22 = scalar_lea.sflag (!%p8025_p1), [#allocation3], %s7307_s11  ;;  %s7313_s25 = scalar_lea.vmem (!%p8025_p1), [#allocation2], %s5310_s13 }
  0xb1   : > { %6941 = dma.done.wait (%p8026_p3), %s647_s22, 256  }
  0xb2   : > { %6943 = vsyncadd (%p8026_p3), %s647_s22, 4294967040  ;;  %p8027_p4 = scmp.eq.s32.totalorder %s7127_s2, 0 }
  0xb4   : > { %6945 = dma.done.wait (%p8027_p4), [#allocation6], 2080   ;;  %p8028_p2 = pmov %p8027_p4 }
  0xb6   : > { %6947 = vsyncadd (%p8028_p2), [#allocation6], 4294965216  ;;  %p8029_p6 = pmov %p8028_p2 }
  0xb7   : > { %p8030_p9 = pmov %p8028_p2 }
  0xb8   : > { %6949 = dma.done.wait (%p8029_p6), [#allocation9], 2080  }
  0xb9   : > { %6951 = vsyncadd (%p8030_p9), [#allocation9], 4294965216  ;;  %p8031_p7 = pmov %p8028_p2 }
  0xba   : > { %p8032_p12 = pmov %p8028_p2 }
  0xbb   : > { %6953 = dma.done.wait (%p8031_p7), [#allocation12], 4096  }
  0xbc   : > { %6955 = vsyncadd (%p8032_p12), [#allocation12], 4294963200  ;;  %p8033_p13 = pmov %p8028_p2 }
  0xbd   : > { %p8034_p0 = pmov %p8028_p2 }
  0xbe   : > { %6957 = dma.done.wait (%p8033_p13), [#allocation15], 16384  }
  0xbf   : > { %6959 = vsyncadd (%p8034_p0), [#allocation15], 4294950912  ;;  %v740_v0 = vld [vmem:[%s7313_s25] sm:$0xff]  ;;  %v741_v1 = vld [vmem:[%s7313_s25 + $0x8] sm:$0xff]  ;;  %v6996_v4 = vmov 0.0   ;;  %vm6997_vm0 = vmmov 0  }
  0xc0   : > { %920 = vadd.xlane.f32.xlu0 %v740_v0  ;;  %v6328_v2 = vld [vmem:[#allocation7 + $0x38] sm:$0xff]   ;;  %5803 = vmatprep.subr.bf16.mxu0 %v6996_v4  ;;  %v6330_v13 = vld [vmem:[#allocation7 + $0x30] sm:$0xff]   ;;  %v6332_v15 = vld [vmem:[#allocation7 + $0x28] sm:$0xff]   ;;  %s8035_s18 = sld [smem:[#allocation27_spill]]  ;;  %vm1251_vm1 = vcmask 261120   ;;  %vm1376_vm2 = vcmask 1043456  }
  0xc1   : > { %v6329_v3 = vld [vmem:[#allocation8 + $0x38] sm:$0xff]   ;;  %5823 = vmatprep.subr.bf16.mxu1 %v6996_v4  ;;  %5804 = vmatpush3.bf16.msra.mxu0 %v6328_v2  ;;  %v6331_v14 = vld [vmem:[#allocation8 + $0x30] sm:$0xff]   ;;  %v6333_v16 = vld [vmem:[#allocation8 + $0x28] sm:$0xff]   ;;  %s8036_s24 = sld [smem:[#allocation26_spill]]  ;;  %vm1348_vm4 = vcmask 64512   ;;  %s6999_s8 = smov 96  }
  0xc2   : > { %5824 = vmatpush3.bf16.msra.mxu1 %v6329_v3  ;;  %5805 = vmatprep.subr.bf16.mxu0 %v6996_v4  ;;  %v6334_v17 = vld [vmem:[#allocation7 + $0x20] sm:$0xff]   ;;  %v6336_v19 = vld [vmem:[#allocation7 + $0x18] sm:$0xff]   ;;  %v6338_v21 = vld [vmem:[#allocation7 + $0x10] sm:$0xff]   ;;  %s7000_s23 = smov 64   ;;  %s7001_s16 = smov 32   ;;  %vm2170_vm5 = vcmask 523264  }
  0xc3   : > { %5825 = vmatprep.subr.bf16.mxu1 %v6996_v4  ;;  %v6335_v18 = vld [vmem:[#allocation8 + $0x20] sm:$0xff]   ;;  %5819 = vmatprep.mubr.msk.bf16.mxu0 %vm6997_vm0, %v6996_v4  ;;  %v6337_v20 = vld [vmem:[#allocation8 + $0x18] sm:$0xff]   ;;  %v6339_v22 = vld [vmem:[#allocation8 + $0x10] sm:$0xff]   ;;  %vm2173_vm6 = vcmask 785408   ;;  %s8037_s22 = sld [smem:[#allocation34_spill]]  ;;  %s736_s19 = scalar_lea.vmem [#allocation17], %s5310_s13 }
  0xc4   : > { %922 = vadd.xlane.f32.xlu0 %v741_v1  ;;  %5839 = vmatprep.mubr.msk.bf16.mxu1 %vm6997_vm0, %v6996_v4  ;;  %v6340_v23 = vld [vmem:[#allocation7 + $0x8] sm:$0xff]   ;;  %v6342_v25 = vld [vmem:[#allocation7] sm:$0xff]   ;;  %v5320_v35 = vld [vmem:[#allocation5] ss:$0 sm:$0xff]  ;;  %s8038_s27 = sld [smem:[#allocation35_spill]]  ;;  %s5146_s1 = sshll.u32 %s736_s19, 4  ;;  %s7916_s1 = int_to_ptr.vmem [resolvable:$true] %s5146_s1 }
  0xc5   : > { %5806 = vmatpush3.bf16.msra.mxu0 %v6330_v13  ;;  %v6341_v24 = vld [vmem:[#allocation8 + $0x8] sm:$0xff]   ;;  %v6343_v26 = vld [vmem:[#allocation8] sm:$0xff]   ;;  %v5375_v42 = vld [vmem:[%s7963_s4] ss:$0 sm:$0xff]  ;;  %p8041_p5 = scmp.ne.s32.totalorder %s8021_s5, 0 }
  0xc6   : > { %5826 = vmatpush3.bf16.msra.mxu1 %v6331_v14  ;;  %5807 = vmatprep.subr.bf16.mxu0 %v6996_v4  ;;  %v5374_v36 = vld [vmem:[%s8035_s18] ss:$0 sm:$0xff]  ;;  %v6345_v52 = vld [vmem:[#allocation11 + $0x30] sm:$0xff]   ;;  %v6346_v53 = vld [vmem:[#allocation11 + $0x28] sm:$0xff]  }
  0xc7   : > { %5827 = vmatprep.subr.bf16.mxu1 %v6996_v4  ;;  %v5321_v41 = vld [vmem:[%s8036_s24] ss:$0 sm:$0xff]  ;;  %v6347_v54 = vld [vmem:[#allocation11 + $0x20] sm:$0xff]   ;;  %v6349_v56 = vld [vmem:[#allocation11 + $0x10] sm:$0xff]  }
  0xc8   : > { %v6344_v49 = vld [vmem:[#allocation11 + $0x38] sm:$0xff]   ;;  %v6350_v57 = vld [vmem:[#allocation11 + $0x8] sm:$0xff]   ;;  %v6351_v58 = vld [vmem:[#allocation11] sm:$0xff]  }
  0xc9   : > { %5808 = vmatpush3.bf16.msra.mxu0 %v6332_v15  ;;  %v6348_v55 = vld [vmem:[#allocation11 + $0x18] sm:$0xff]  }
  0xca   : > { %5828 = vmatpush3.bf16.msra.mxu1 %v6333_v16  ;;  %5809 = vmatprep.subr.bf16.mxu0 %v6996_v4  ;;  %v5331_v59 = vld [vmem:[#allocation10] ss:$0 sm:$0xff]  ;;  %v5322_v2 = vld [vmem:[%s7965_s6] ss:$0 sm:$0xff] }
  0xcb   : > { %5829 = vmatprep.subr.bf16.mxu1 %v6996_v4  ;;  %v5340_v16 = vld [vmem:[%s7969_s10] ss:$0 sm:$0xff] }
  0xcd   : > { %5810 = vmatpush3.bf16.msra.mxu0 %v6334_v17 }
  0xce   : > { %5830 = vmatpush3.bf16.msra.mxu1 %v6335_v18  ;;  %5811 = vmatprep.subr.bf16.mxu0 %v6996_v4 }
  0xcf   : > { %5831 = vmatprep.subr.bf16.mxu1 %v6996_v4 }
  0xd1   : > { %5812 = vmatpush3.bf16.msra.mxu0 %v6336_v19 }
  0xd2   : > { %5832 = vmatpush3.bf16.msra.mxu1 %v6337_v20  ;;  %5813 = vmatprep.subr.bf16.mxu0 %v6996_v4 }
  0xd3   : > { %5833 = vmatprep.subr.bf16.mxu1 %v6996_v4 }
  0xd5   : > { %5814 = vmatpush3.bf16.msra.mxu0 %v6338_v21 }
  0xd6   : > { %5834 = vmatpush3.bf16.msra.mxu1 %v6339_v22  ;;  %5815 = vmatprep.subr.bf16.mxu0 %v6996_v4 }
  0xd7   : > { %5835 = vmatprep.subr.bf16.mxu1 %v6996_v4 }
  0xd9   : > { %5816 = vmatpush3.bf16.msra.mxu0 %v6340_v23 }
  0xda   : > { %5836 = vmatpush3.bf16.msra.mxu1 %v6341_v24  ;;  %5817 = vmatprep.subr.bf16.mxu0 %v6996_v4 }
  0xdb   : > { %5837 = vmatprep.subr.bf16.mxu1 %v6996_v4 }
  0xdd   : > { %5818 = vmatpush3.bf16.msra.mxu0 %v6342_v25  ;;  %v744_v25 = vlaneseq }
  0xde   : > { %5838 = vmatpush3.bf16.msra.mxu1 %v6343_v26  ;;  %5843 = vmatprep.subr.bf16.mxu0 %v6996_v4 }
  0xdf   : > { %5863 = vmatprep.subr.bf16.mxu1 %v6996_v4  ;;  %v745_v26 = vand.u32 127, %v744_v25 }
 0x149   : > { %v921_v5 = vpop.xlane.xlu0 %920 }
 0x14a   : > { %v925_v6 = vmul.f32 0.0078125, %v921_v5 }
 0x14c   : > { %v927_v7 = vsub.f32 %v740_v0, %v925_v6 }
 0x14d   : > { %v923_v8 = vpop.xlane.xlu0 %922 }
 0x14e   : > { %v926_v9 = vmul.f32 0.0078125, %v923_v8  ;;  %v929_v10 = vmul.f32 %v927_v7, %v927_v7 }
 0x150   : > { %v928_v11 = vsub.f32 %v741_v1, %v926_v9  ;;  %931 = vadd.xlane.f32.xlu1 %v929_v10 }
 0x152   : > { %v930_v12 = vmul.f32 %v928_v11, %v928_v11 }
 0x154   : > { %933 = vadd.xlane.f32.xlu1 %v930_v12 }
 0x1d9   : > { %v932_v27 = vpop.xlane.xlu1 %931 }
 0x1da   : > { %v935_v28 = vmul.f32 0.0078125, %v932_v27  ;;  %v7417_v27 = vshrl.u32 %v744_v25, 7 }
 0x1dc   : > { %v937_v29 = vadd.f32 1e-05, %v935_v28  ;;  %vm748_vm3 = vcmp.le.s32.totalorder %v745_v26, %v7417_v27 }
 0x1dd   : > { %v934_v30 = vpop.xlane.xlu1 %933 }
 0x1de   : > { %6552 = vrsqrt.f32 %v937_v29  ;;  %v936_v31 = vmul.f32 0.0078125, %v934_v30  ;;  %v6998_v29 = vmov -1e+30  }
 0x1df   : > { %v7420_v30 = vsel %vm748_vm3, 0.0, %v6998_v29 }
 0x1e0   : > { %v938_v32 = vadd.f32 1e-05, %v936_v31 }
 0x1e2   : > { %6554 = vrsqrt.f32 %v938_v32 }
 0x1eb   : > { %v6553_v33 = vpop.eup %6552 }
 0x1ec   : > { %v941_v34 = vmul.f32 %v6553_v33, %v927_v7 }
 0x1ee   : > { %v949_v39 = vmul.f32 %v5320_v35, %v941_v34  ;;  %v2278_v40 = vmul.f32 %v5374_v36, %v941_v34 }
 0x1ef   : > { %v6555_v37 = vpop.eup %6554 }
 0x1f0   : > { %v942_v38 = vmul.f32 %v6555_v37, %v928_v11  ;;  %v957_v45 = vadd.f32 %v5321_v41, %v949_v39  ;;  %v2286_v47 = vadd.f32 %v5375_v42, %v2278_v40 }
 0x1f2   : > { %v950_v43 = vmul.f32 %v5320_v35, %v942_v38  ;;  %v2279_v44 = vmul.f32 %v5374_v36, %v942_v38 }
 0x1f4   : > { %v958_v46 = vadd.f32 %v5321_v41, %v950_v43  ;;  %v2287_v48 = vadd.f32 %v5375_v42, %v2279_v44 }
 0x1f6   : > { %v959_v50 = vpack.c.bf16 %v958_v46, %v957_v45  ;;  %v7368_v51 = vpack.c.bf16 %v2287_v48, %v2286_v47 }
 0x1f8   : > { %5820 = vmatmul.mubr.bf16.vlgmr.msra.gmra.mxu0 %v959_v50  ;;  %5840 = vmatmul.mubr.bf16.vlgmr.msra.gmra.mxu1 %v959_v50 }
 0x1f9   : > { %5844 = vmatpush3.bf16.msra.mxu0 %v6344_v49  ;;  %5859 = vmatprep.mubr.msk.bf16.mxu0 %vm6997_vm0, %v6996_v4 }
 0x1fa   : > { %5845 = vmatprep.subr.bf16.mxu0 %v6996_v4  ;;  %5865 = vmatprep.mubr.msk.bf16.mxu1 %vm6997_vm0, %v6996_v4 }
 0x1fd   : > { %5846 = vmatpush3.bf16.msra.mxu0 %v6345_v52 }
 0x1fe   : > { %5847 = vmatprep.subr.bf16.mxu0 %v6996_v4 }
 0x201   : > { %5848 = vmatpush3.bf16.msra.mxu0 %v6346_v53 }
 0x202   : > { %5849 = vmatprep.subr.bf16.mxu0 %v6996_v4 }
 0x205   : > { %5850 = vmatpush3.bf16.msra.mxu0 %v6347_v54 }
 0x206   : > { %5851 = vmatprep.subr.bf16.mxu0 %v6996_v4 }
 0x209   : > { %5852 = vmatpush3.bf16.msra.mxu0 %v6348_v55 }
 0x20a   : > { %5853 = vmatprep.subr.bf16.mxu0 %v6996_v4 }
 0x20d   : > { %5854 = vmatpush3.bf16.msra.mxu0 %v6349_v56 }
 0x20e   : > { %5855 = vmatprep.subr.bf16.mxu0 %v6996_v4 }
 0x211   : > { %5856 = vmatpush3.bf16.msra.mxu0 %v6350_v57 }
 0x212   : > { %5857 = vmatprep.subr.bf16.mxu0 %v6996_v4 }
 0x215   : > { %5858 = vmatpush3.bf16.msra.mxu0 %v6351_v58 }
 0x216   : > { %5911 = vmatprep.subr.bf16.mxu0 %v6996_v4 }
 0x218   : > { %5860 = vmatmul.mubr.bf16.vlgmr.msra.gmra.mxu0 %v959_v50 }
 0x219   : > { %5913 = vmatprep.mubr.msk.bf16.mxu0 %vm6997_vm0, %v6996_v4 }
 0x2b8   : > { %v1048_v60 = vpop.f32.mrf.mxu0  ;;  %v1143_v61 = vpop.f32.mrf.mxu1 }
 0x2b9   : > { %v1144_v62 = vadd.f32 %v5331_v59, %v1143_v61  ;;  %v1049_v10 = vadd.f32 %v5322_v2, %v1048_v60 }
 0x2ba   : > { %v5821_v63 = vpop.f32.mrf.mxu0  ;;  %v5841_v0 = vpop.f32.mrf.mxu1 }
 0x2bb   : > { %v7384_v1 = vpack.c.bf16 %v1144_v62, %v1144_v62  ;;  %v7394_v12 = vpack.c.bf16 %v1049_v10, %v1049_v10 }
 0x2bc   : > { %v1051_v3 = vpop.f32.mrf.mxu0  ;;  %v1146_v5 = vpop.f32.mrf.mxu1 }
 0x2bd   : > { %v1147_v6 = vadd.f32 %v5331_v59, %v1146_v5  ;;  %v1256_v7 = vsel %vm1251_vm1, %v7384_v1, 0  ;;  %v1052_v14 = vadd.f32 %v5322_v2, %v1051_v3 }
 0x2be   : > { %v5822_v8 = vpop.f32.mrf.mxu0  ;;  %v5842_v9 = vpop.f32.mrf.mxu1  ;;  %5864 = vmatpush3.bf16.xpose.msra.mxu1 %v1256_v7 }
 0x2bf   : > { %5869 = vmatprep.subr.bf16.mxu1 %v6996_v4  ;;  %v7392_v11 = vpack.c.bf16 %v1147_v6, %v1147_v6  ;;  %v7403_v15 = vpack.c.bf16 %v1052_v14, %v1052_v14 }
 0x2c1   : > { %v1302_v13 = vsel %vm1251_vm1, %v7392_v11, 0 }
 0x2c5   : > { %5866 = vmatmul.mubr.msk.bf16.vlgmr.msra.gmra.mxu1 %vm1251_vm1, %v7394_v12 }
 0x2c6   : > { %5870 = vmatpush3.bf16.xpose.msra.mxu1 %v1302_v13  ;;  %5871 = vmatprep.mubr.msk.bf16.mxu1 %vm6997_vm0, %v6996_v4 }
 0x2c7   : > { %5875 = vmatprep.subr.bf16.mxu1 %v6996_v4 }
 0x2cd   : > { %5872 = vmatmul.mubr.msk.bf16.vlgmr.msra.gmra.mxu1 %vm1251_vm1, %v7403_v15 }
 0x2ce   : > { %5877 = vmatprep.mubr.msk.bf16.mxu1 %vm6997_vm0, %v6996_v4 }
 0x2d8   : > { %v1238_v17 = vpop.f32.mrf.mxu0 }
 0x2d9   : > { %v1239_v18 = vadd.f32 %v5340_v16, %v1238_v17 }
 0x2da   : > { %v5861_v19 = vpop.f32.mrf.mxu0 }
 0x2db   : > { %v7412_v20 = vpack.c.bf16 %v1239_v18, %v1239_v18 }
 0x2dc   : > { %v1241_v21 = vpop.f32.mrf.mxu0 }
 0x2dd   : > { %v1242_v22 = vadd.f32 %v5340_v16, %v1241_v21  ;;  %v1378_v23 = vsel %vm1376_vm2, %v7412_v20, 0 }
 0x2de   : > { %v5862_v24 = vpop.f32.mrf.mxu0  ;;  %5876 = vmatpush3.bf16.msra.mxu1 %v1378_v23 }
 0x2df   : > { %5881 = vmatprep.subr.bf16.mxu1 %v6996_v4  ;;  %v7436_v58 = vpack.c.bf16 %v1242_v22, %v1242_v22 }
 0x2e1   : > { %v1424_v61 = vsel %vm1376_vm2, %v7436_v58, 0 }
 0x385   : > { %v1292_v28 = vpop.f32.mrf.mxu1 }
 0x386   : > { %v1344_v31 = vmul.f32 0.17677669, %v1292_v28 }
 0x387   : > { %v5867_v32 = vpop.f32.mrf.mxu1 }
 0x388   : > { %v1346_v33 = vadd.f32 %v1344_v31, %v7420_v30 }
 0x389   : > { %v1295_v34 = vpop.f32.mrf.mxu1 }
 0x38a   : > { %v1349_v35 = vsel %vm1348_vm4, %v1346_v33, -inf }
 0x38b   : > { %1350 = vmax.xlane.f32.xlu0 %v1349_v35  ;;  %v5868_v36 = vpop.f32.mrf.mxu1 }
 0x38d   : > { %v1338_v37 = vpop.f32.mrf.mxu1 }
 0x38e   : > { %v1345_v38 = vmul.f32 0.17677669, %v1338_v37 }
 0x38f   : > { %v5873_v39 = vpop.f32.mrf.mxu1 }
 0x390   : > { %v1347_v40 = vadd.f32 %v1345_v38, %v7420_v30 }
 0x391   : > { %v1341_v41 = vpop.f32.mrf.mxu1 }
 0x392   : > { %v1352_v42 = vsel %vm1348_vm4, %v1347_v40, -inf }
 0x393   : > { %1353 = vmax.xlane.f32.xlu1 %v1352_v42  ;;  %v5874_v43 = vpop.f32.mrf.mxu1 }
 0x414   : > { %v1351_v44 = vpop.xlane.xlu0 %1350 }
 0x415   : > { %v1355_v45 = vsub.f32 %v1346_v33, %v1351_v44 }
 0x417   : > { %v1357_v46 = vmul.f32 1.442695, %v1355_v45 }
 0x419   : > { %6556 = vpow2.f32 %v1357_v46 }
 0x41c   : > { %v1354_v47 = vpop.xlane.xlu1 %1353 }
 0x41d   : > { %v1356_v48 = vsub.f32 %v1347_v40, %v1354_v47 }
 0x41f   : > { %v1359_v49 = vmul.f32 1.442695, %v1356_v48 }
 0x421   : > { %6558 = vpow2.f32 %v1359_v49 }
 0x426   : > { %v6557_v50 = vpop.eup %6556 }
 0x427   : > { %v1361_v52 = vsel %vm1348_vm4, %v6557_v50, 0.0 }
 0x428   : > { %1362 = vadd.xlane.f32.xlu0 %v1361_v52 }
 0x42e   : > { %v6559_v53 = vpop.eup %6558 }
 0x42f   : > { %v1364_v54 = vsel %vm1348_vm4, %v6559_v53, 0.0 }
 0x430   : > { %1365 = vadd.xlane.f32.xlu1 %v1364_v54 }
 0x43e   : > { %1470 = vrot.lane.b32.xlu0 %v7384_v1, %s6999_s8 }
 0x441   : > { %1467 = vrot.lane.b32.xlu1 %v7394_v12, %s6999_s8 }
 0x445   : > { %1522 = vrot.lane.b32.xlu1 %v7392_v11, %s6999_s8 }
 0x449   : > { %1519 = vrot.lane.b32.xlu1 %v7403_v15, %s6999_s8 }
 0x4b1   : > { %v1363_v55 = vpop.xlane.xlu0 %1362 }
 0x4b2   : > { %6560 = vrcp.f32 %v1363_v55 }
 0x4b5   : > { %v1471_v0 = vpop.permute.xlu0 %1470 }
 0x4b6   : > { %v1476_v5 = vsel %vm1251_vm1, %v1471_v0, 0 }
 0x4b9   : > { %v1366_v56 = vpop.xlane.xlu1 %1365 }
 0x4ba   : > { %6562 = vrcp.f32 %v1366_v56 }
 0x4bd   : > { %v1468_v3 = vpop.permute.xlu1 %1467 }
 0x4bf   : > { %v6561_v57 = vpop.eup %6560 }
 0x4c0   : > { %v1369_v59 = vmul.f32 %v6561_v57, %v6557_v50 }
 0x4c1   : > { %v1523_v6 = vpop.permute.xlu1 %1522 }
 0x4c2   : > { %v1371_v60 = vpack.c.bf16 %v1369_v59, %v1369_v59  ;;  %v1528_v7 = vsel %vm1251_vm1, %v1523_v6, 0 }
 0x4c4   : > { %5878 = vmatmul.mubr.msk.bf16.vlgmr.msra.gmra.mxu1 %vm1348_vm4, %v1371_v60 }
 0x4c5   : > { %5882 = vmatpush3.bf16.msra.mxu1 %v1424_v61  ;;  %5883 = vmatprep.mubr.msk.bf16.mxu1 %vm6997_vm0, %v6996_v4  ;;  %v1520_v8 = vpop.permute.xlu1 %1519 }
 0x4c6   : > { %5887 = vmatprep.subr.bf16.mxu1 %v6996_v4 }
 0x4c7   : > { %v6563_v62 = vpop.eup %6562 }
 0x4c8   : > { %v1370_v63 = vmul.f32 %v6563_v62, %v6559_v53 }
 0x4ca   : > { %v1372_v2 = vpack.c.bf16 %v1370_v63, %v1370_v63 }
 0x4cc   : > { %5884 = vmatmul.mubr.msk.bf16.vlgmr.msra.gmra.mxu1 %vm1348_vm4, %v1372_v2 }
 0x4cd   : > { %5888 = vmatpush3.bf16.xpose.msra.mxu1 %v1476_v5  ;;  %5889 = vmatprep.mubr.msk.bf16.mxu1 %vm6997_vm0, %v6996_v4 }
 0x4ce   : > { %5893 = vmatprep.subr.bf16.mxu1 %v6996_v4 }
 0x4d4   : > { %5890 = vmatmul.mubr.msk.bf16.vlgmr.msra.gmra.mxu1 %vm1251_vm1, %v1468_v3 }
 0x4d5   : > { %5894 = vmatpush3.bf16.xpose.msra.mxu1 %v1528_v7  ;;  %5895 = vmatprep.mubr.msk.bf16.mxu1 %vm6997_vm0, %v6996_v4 }
 0x4d6   : > { %5899 = vmatprep.subr.bf16.mxu1 %v6996_v4 }
 0x4dc   : > { %5896 = vmatmul.mubr.msk.bf16.vlgmr.msra.gmra.mxu1 %vm1251_vm1, %v1520_v8 }
 0x4dd   : > { %5901 = vmatprep.mubr.msk.bf16.mxu1 %vm6997_vm0, %v6996_v4 }
 0x584   : > { %v7457_v9 = vpop.f32.mrf.mxu1 }
 0x586   : > { %v5879_v10 = vpop.f32.mrf.mxu1 }
 0x588   : > { %v1417_v13 = vpop.f32.mrf.mxu1 }
 0x58a   : > { %v5880_v14 = vpop.f32.mrf.mxu1 }
 0x58c   : > { %v7459_v16 = vpop.f32.mrf.mxu1 }
 0x58e   : > { %v5885_v17 = vpop.f32.mrf.mxu1 }
 0x590   : > { %v1463_v18 = vpop.f32.mrf.mxu1 }
 0x592   : > { %v5886_v19 = vpop.f32.mrf.mxu1 }
 0x594   : > { %v1512_v21 = vpop.f32.mrf.mxu1 }
 0x595   : > { %v1570_v22 = vmul.f32 0.17677669, %v1512_v21 }
 0x596   : > { %v5891_v23 = vpop.f32.mrf.mxu1 }
 0x597   : > { %v1572_v24 = vadd.f32 %v1570_v22, %v7420_v30 }
 0x598   : > { %v1515_v25 = vpop.f32.mrf.mxu1 }
 0x599   : > { %v1574_v26 = vsel %vm1348_vm4, %v1572_v24, -inf }
 0x59a   : > { %1575 = vmax.xlane.f32.xlu0 %v1574_v26  ;;  %v5892_v28 = vpop.f32.mrf.mxu1 }
 0x59c   : > { %v1564_v29 = vpop.f32.mrf.mxu1 }
 0x59d   : > { %v1571_v31 = vmul.f32 0.17677669, %v1564_v29 }
 0x59e   : > { %v5897_v32 = vpop.f32.mrf.mxu1 }
 0x59f   : > { %v1573_v33 = vadd.f32 %v1571_v31, %v7420_v30 }
 0x5a0   : > { %v1567_v34 = vpop.f32.mrf.mxu1 }
 0x5a1   : > { %v1577_v35 = vsel %vm1348_vm4, %v1573_v33, -inf }
 0x5a2   : > { %1578 = vmax.xlane.f32.xlu1 %v1577_v35  ;;  %v5898_v36 = vpop.f32.mrf.mxu1 }
 0x5b3   : > { %1648 = vrot.lane.b32.xlu1 %v7436_v58, %s6999_s8 }
 0x5b7   : > { %1698 = vrot.lane.b32.xlu1 %v7384_v1, %s7000_s23 }
 0x5bb   : > { %1748 = vrot.lane.b32.xlu1 %v7392_v11, %s7000_s23 }
 0x5bf   : > { %1746 = vrot.lane.b32.xlu1 %v7403_v15, %s7000_s23 }
 0x623   : > { %v1576_v37 = vpop.xlane.xlu0 %1575 }
 0x624   : > { %v1580_v38 = vsub.f32 %v1572_v24, %v1576_v37 }
 0x626   : > { %v1582_v39 = vmul.f32 1.442695, %v1580_v38 }
 0x628   : > { %6564 = vpow2.f32 %v1582_v39 }
 0x62b   : > { %v1579_v40 = vpop.xlane.xlu1 %1578 }
 0x62c   : > { %v1581_v41 = vsub.f32 %v1573_v33, %v1579_v40 }
 0x62e   : > { %v1584_v42 = vmul.f32 1.442695, %v1581_v41 }
 0x62f   : > { %v1649_v43 = vpop.permute.xlu1 %1648 }
 0x630   : > { %6566 = vpow2.f32 %v1584_v42  ;;  %v1654_v60 = vsel %vm1376_vm2, %v1649_v43, 0 }
 0x633   : > { %v1699_v44 = vpop.permute.xlu1 %1698 }
 0x634   : > { %v1704_v45 = vsel %vm1251_vm1, %v1699_v44, 0 }
 0x635   : > { %v6565_v46 = vpop.eup %6564  ;;  %5912 = vmatpush3.bf16.xpose.msra.mxu0 %v1704_v45 }
 0x636   : > { %v1586_v47 = vsel %vm1348_vm4, %v6565_v46, 0.0  ;;  %5923 = vmatprep.subr.bf16.mxu0 %v6996_v4 }
 0x637   : > { %1587 = vadd.xlane.f32.xlu0 %v1586_v47  ;;  %v1749_v63 = vpop.permute.xlu1 %1748 }
 0x638   : > { %v1754_v2 = vsel %vm1251_vm1, %v1749_v63, 0 }
 0x63b   : > { %v1747_v3 = vpop.permute.xlu1 %1746 }
 0x63d   : > { %v6567_v48 = vpop.eup %6566 }
 0x63e   : > { %v1589_v49 = vsel %vm1348_vm4, %v6567_v48, 0.0 }
 0x63f   : > { %1590 = vadd.xlane.f32.xlu0 %v1589_v49 }
 0x655   : > { %1599 = vrot.lane.b32.xlu0 %v7412_v20, %s6999_s8 }
 0x659   : > { %1696 = vrot.lane.b32.xlu0 %v7394_v12, %s7000_s23 }
 0x6c0   : > { %v1588_v50 = vpop.xlane.xlu0 %1587 }
 0x6c1   : > { %6568 = vrcp.f32 %v1588_v50 }
 0x6c8   : > { %v1591_v52 = vpop.xlane.xlu0 %1590 }
 0x6c9   : > { %6570 = vrcp.f32 %v1591_v52 }
 0x6cc   : > { %v1600_v53 = vpop.permute.xlu0 %1599 }
 0x6cd   : > { %v1605_v54 = vsel %vm1376_vm2, %v1600_v53, 0 }
 0x6ce   : > { %v6569_v55 = vpop.eup %6568  ;;  %5900 = vmatpush3.bf16.msra.mxu1 %v1605_v54 }
 0x6cf   : > { %5905 = vmatprep.subr.bf16.mxu1 %v6996_v4  ;;  %v1594_v56 = vmul.f32 %v6569_v55, %v6565_v46 }
 0x6d0   : > { %v1697_v57 = vpop.permute.xlu0 %1696 }
 0x6d1   : > { %5914 = vmatmul.mubr.msk.bf16.vlgmr.msra.gmra.mxu0 %vm1251_vm1, %v1697_v57  ;;  %v1596_v59 = vpack.c.bf16 %v1594_v56, %v1594_v56 }
 0x6d2   : > { %5925 = vmatprep.mubr.msk.bf16.mxu0 %vm6997_vm0, %v6996_v4 }
 0x6d3   : > { %5902 = vmatmul.mubr.msk.bf16.vlgmr.msra.gmra.mxu1 %vm1348_vm4, %v1596_v59 }
 0x6d4   : > { %5906 = vmatpush3.bf16.msra.mxu1 %v1654_v60  ;;  %5907 = vmatprep.mubr.msk.bf16.mxu1 %vm6997_vm0, %v6996_v4 }
 0x6d5   : > { %5917 = vmatprep.subr.bf16.mxu1 %v6996_v4 }
 0x6d6   : > { %v6571_v61 = vpop.eup %6570 }
 0x6d7   : > { %v1595_v62 = vmul.f32 %v6571_v61, %v6567_v48 }
 0x6d9   : > { %v1597_v0 = vpack.c.bf16 %v1595_v62, %v1595_v62 }
 0x6db   : > { %5908 = vmatmul.mubr.msk.bf16.vlgmr.msra.gmra.mxu1 %vm1348_vm4, %v1597_v0 }
 0x6dc   : > { %5918 = vmatpush3.bf16.xpose.msra.mxu1 %v1754_v2  ;;  %5919 = vmatprep.mubr.msk.bf16.mxu1 %vm6997_vm0, %v6996_v4 }
 0x6dd   : > { %5929 = vmatprep.subr.bf16.mxu1 %v6996_v4 }
 0x6e3   : > { %5920 = vmatmul.mubr.msk.bf16.vlgmr.msra.gmra.mxu1 %vm1251_vm1, %v1747_v3 }
 0x6e4   : > { %5931 = vmatprep.mubr.msk.bf16.mxu1 %vm6997_vm0, %v6996_v4 }
 0x791   : > { %v1740_v5 = vpop.f32.mrf.mxu0 }
 0x792   : > { %v1796_v6 = vmul.f32 0.17677669, %v1740_v5 }
 0x793   : > { %v7499_v7 = vpop.f32.mrf.mxu1  ;;  %v5915_v8 = vpop.f32.mrf.mxu0 }
 0x794   : > { %v1798_v10 = vadd.f32 %v1796_v6, %v7420_v30 }
 0x795   : > { %v5903_v13 = vpop.f32.mrf.mxu1  ;;  %v1743_v14 = vpop.f32.mrf.mxu0 }
 0x796   : > { %v1800_v17 = vsel %vm1348_vm4, %v1798_v10, -inf }
 0x797   : > { %v1644_v18 = vpop.f32.mrf.mxu1  ;;  %1801 = vmax.xlane.f32.xlu0 %v1800_v17  ;;  %v5916_v19 = vpop.f32.mrf.mxu0 }
 0x799   : > { %v5904_v21 = vpop.f32.mrf.mxu1 }
 0x79b   : > { %v7503_v22 = vpop.f32.mrf.mxu1 }
 0x79c   : > { %v6298_v23 = vpack.i.bf16 %v7503_v22, %v7499_v7 }
 0x79d   : > { %v5909_v24 = vpop.f32.mrf.mxu1 }
 0x79f   : > { %v1693_v25 = vpop.f32.mrf.mxu1 }
 0x7a1   : > { %v5910_v26 = vpop.f32.mrf.mxu1 }
 0x7a3   : > { %v1790_v28 = vpop.f32.mrf.mxu1 }
 0x7a4   : > { %v1797_v29 = vmul.f32 0.17677669, %v1790_v28 }
 0x7a5   : > { %v5921_v31 = vpop.f32.mrf.mxu1 }
 0x7a6   : > { %v1799_v32 = vadd.f32 %v1797_v29, %v7420_v30 }
 0x7a7   : > { %v1793_v33 = vpop.f32.mrf.mxu1 }
 0x7a8   : > { %v1803_v34 = vsel %vm1348_vm4, %v1799_v32, -inf }
 0x7a9   : > { %1804 = vmax.xlane.f32.xlu1 %v1803_v34  ;;  %v5922_v35 = vpop.f32.mrf.mxu1 }
 0x7ba   : > { %1872 = vrot.lane.b32.xlu1 %v7436_v58, %s7000_s23 }
 0x7be   : > { %1922 = vrot.lane.b32.xlu1 %v7384_v1, %s7001_s16 }
 0x7c2   : > { %1972 = vrot.lane.b32.xlu1 %v7392_v11, %s7001_s16 }
 0x7c6   : > { %1970 = vrot.lane.b32.xlu1 %v7403_v15, %s7001_s16 }
 0x820   : > { %v1802_v36 = vpop.xlane.xlu0 %1801 }
 0x821   : > { %v1806_v37 = vsub.f32 %v1798_v10, %v1802_v36 }
 0x823   : > { %v1808_v38 = vmul.f32 1.442695, %v1806_v37 }
 0x825   : > { %6572 = vpow2.f32 %v1808_v38 }
 0x832   : > { %v6573_v39 = vpop.eup %6572  ;;  %v1805_v40 = vpop.xlane.xlu1 %1804 }
 0x833   : > { %v1807_v41 = vsub.f32 %v1799_v32, %v1805_v40  ;;  %v1812_v42 = vsel %vm1348_vm4, %v6573_v39, 0.0 }
 0x834   : > { %1813 = vadd.xlane.f32.xlu0 %v1812_v42 }
 0x835   : > { %v1810_v43 = vmul.f32 1.442695, %v1807_v41 }
 0x836   : > { %v1873_v44 = vpop.permute.xlu1 %1872 }
 0x837   : > { %6574 = vpow2.f32 %v1810_v43  ;;  %v1878_v1 = vsel %vm1376_vm2, %v1873_v44, 0 }
 0x838   : > { %5930 = vmatpush3.bf16.msra.mxu1 %v1878_v1 }
 0x839   : > { %5941 = vmatprep.subr.bf16.mxu1 %v6996_v4 }
 0x83a   : > { %v1923_v52 = vpop.permute.xlu1 %1922 }
 0x83b   : > { %v1928_v54 = vsel %vm1251_vm1, %v1923_v52, 0  ;;  %v6355_v52 = vld [vmem:[#allocation14 + $0xc0] ss:$16 sps:$4 sm:$0xff]  }
 0x83e   : > { %v1973_v56 = vpop.permute.xlu1 %1972 }
 0x83f   : > { %v1978_v60 = vsel %vm1251_vm1, %v1973_v56, 0  ;;  %v6361_v56 = vld [vmem:[#allocation14 + $0x80] ss:$16 sps:$4 sm:$0xff]  }
 0x842   : > { %v1971_v61 = vpop.permute.xlu1 %1970 }
 0x844   : > { %v6575_v11 = vpop.eup %6574 }
 0x845   : > { %v1815_v15 = vsel %vm1348_vm4, %v6575_v11, 0.0 }
 0x846   : > { %1816 = vadd.xlane.f32.xlu0 %v1815_v15 }
 0x85c   : > { %1824 = vrot.lane.b32.xlu0 %v7412_v20, %s7000_s23 }
 0x860   : > { %1920 = vrot.lane.b32.xlu0 %v7394_v12, %s7001_s16 }
 0x8bd   : > { %v1814_v45 = vpop.xlane.xlu0 %1813 }
 0x8be   : > { %6576 = vrcp.f32 %v1814_v45 }
 0x8cb   : > { %v6577_v46 = vpop.eup %6576 }
 0x8cc   : > { %v1820_v48 = vmul.f32 %v6577_v46, %v6573_v39 }
 0x8ce   : > { %v1822_v53 = vpack.c.bf16 %v1820_v48, %v1820_v48  ;;  %v6352_v48 = vld [vmem:[#allocation14 + $0xe0] ss:$16 sps:$4 sm:$0xff]  }
 0x8cf   : > { %v1817_v47 = vpop.xlane.xlu0 %1816 }
 0x8d0   : > { %6578 = vrcp.f32 %v1817_v47 }
 0x8d3   : > { %v1825_v49 = vpop.permute.xlu0 %1824 }
 0x8d4   : > { %v1830_v50 = vsel %vm1376_vm2, %v1825_v49, 0 }
 0x8d5   : > { %5924 = vmatpush3.bf16.msra.mxu0 %v1830_v50  ;;  %v6357_v50 = vld [vmem:[#allocation14 + $0xc4] ss:$16 sps:$4 sm:$0xff]  }
 0x8d6   : > { %5935 = vmatprep.subr.bf16.mxu0 %v6996_v4 }
 0x8d7   : > { %v1921_v57 = vpop.permute.xlu0 %1920 }
 0x8d8   : > { %5926 = vmatmul.mubr.msk.bf16.vlgmr.msra.gmra.mxu0 %vm1348_vm4, %v1822_v53  ;;  %v7002_v53 = vmov 0  }
 0x8d9   : > { %5936 = vmatpush3.bf16.xpose.msra.mxu0 %v1928_v54  ;;  %5937 = vmatprep.mubr.msk.bf16.mxu0 %vm6997_vm0, %v6996_v4  ;;  %v6360_v54 = vld [vmem:[#allocation14 + $0xa4] ss:$16 sps:$4 sm:$0xff]  }
 0x8da   : > { %5947 = vmatprep.subr.bf16.mxu0 %v6996_v4 }
 0x8dd   : > { %v6579_v12 = vpop.eup %6578 }
 0x8de   : > { %v1821_v55 = vmul.f32 %v6579_v12, %v6575_v11  ;;  %v6358_v12 = vld [vmem:[#allocation14 + $0xa0] ss:$16 sps:$4 sm:$0xff]  }
 0x8e0   : > { %5938 = vmatmul.mubr.msk.bf16.vlgmr.msra.gmra.mxu0 %vm1251_vm1, %v1921_v57  ;;  %v1823_v59 = vpack.c.bf16 %v1821_v55, %v1821_v55  ;;  %v6363_v55 = vld [vmem:[#allocation14 + $0x84] ss:$16 sps:$4 sm:$0xff]  }
 0x8e1   : > { %5949 = vmatprep.mubr.msk.bf16.mxu0 %vm6997_vm0, %v6996_v4  ;;  %v6366_v57 = vld [vmem:[#allocation14 + $0x64] ss:$16 sps:$4 sm:$0xff]  }
 0x8e2   : > { %5932 = vmatmul.mubr.msk.bf16.vlgmr.msra.gmra.mxu1 %vm1348_vm4, %v1823_v59  ;;  %v6364_v59 = vld [vmem:[#allocation14 + $0x60] ss:$16 sps:$4 sm:$0xff]  }
 0x8e3   : > { %5942 = vmatpush3.bf16.xpose.msra.mxu1 %v1978_v60  ;;  %5943 = vmatprep.mubr.msk.bf16.mxu1 %vm6997_vm0, %v6996_v4  ;;  %v6369_v60 = vld [vmem:[#allocation14 + $0x44] ss:$16 sps:$4 sm:$0xff]  }
 0x8e4   : > { %5953 = vmatprep.subr.bf16.mxu1 %v6996_v4 }
 0x8ea   : > { %5944 = vmatmul.mubr.msk.bf16.vlgmr.msra.gmra.mxu1 %vm1251_vm1, %v1971_v61  ;;  %v6367_v61 = vld [vmem:[#allocation14 + $0x40] ss:$16 sps:$4 sm:$0xff]  }
 0x8eb   : > { %5955 = vmatprep.mubr.msk.bf16.mxu1 %vm6997_vm0, %v6996_v4 }
 0x998   : > { %v1866_v62 = vpop.f32.mrf.mxu0 }
 0x99a   : > { %v5927_v63 = vpop.f32.mrf.mxu0 }
 0x99b   : > { %v6370_v63 = vld [vmem:[#allocation14 + $0x20] ss:$16 sps:$4 sm:$0xff]  }
 0x99c   : > { %v1869_v0 = vpop.f32.mrf.mxu0 }
 0x99d   : > { %v6375_v0 = vld [vmem:[#allocation14 + $0x4] ss:$16 sps:$4 sm:$0xff]  }
 0x99e   : > { %v5928_v2 = vpop.f32.mrf.mxu0 }
 0x99f   : > { %v6373_v2 = vld [vmem:[#allocation14] ss:$16 sps:$4 sm:$0xff]  }
 0x9a0   : > { %v1964_v3 = vpop.f32.mrf.mxu0 }
 0x9a1   : > { %v2020_v5 = vmul.f32 0.17677669, %v1964_v3  ;;  %v6376_v3 = vld [vmem:[#allocation16 + $0x78] sm:$0xff]  }
 0x9a2   : > { %v1914_v6 = vpop.f32.mrf.mxu1  ;;  %v5939_v8 = vpop.f32.mrf.mxu0 }
 0x9a3   : > { %v2022_v10 = vadd.f32 %v2020_v5, %v7420_v30  ;;  %v6303_v33 = vpack.i.bf16 %v1914_v6, %v1866_v62  ;;  %v6372_v62 = vld [vmem:[#allocation14 + $0x24] ss:$16 sps:$4 sm:$0xff]   ;;  %v6377_v5 = vld [vmem:[#allocation16 + $0x38] sm:$0xff]  }
 0x9a4   : > { %v5933_v13 = vpop.f32.mrf.mxu1  ;;  %v1967_v14 = vpop.f32.mrf.mxu0  ;;  %v6378_v6 = vld [vmem:[#allocation16 + $0x70] sm:$0xff]  }
 0x9a5   : > { %v2024_v17 = vsel %vm1348_vm4, %v2022_v10, -inf  ;;  %v6379_v8 = vld [vmem:[#allocation16 + $0x30] sm:$0xff]   ;;  %v6381_v13 = vld [vmem:[#allocation16 + $0x28] sm:$0xff]   ;;  %v6382_v14 = vld [vmem:[#allocation16 + $0x60] sm:$0xff]  }
 0x9a6   : > { %v1917_v18 = vpop.f32.mrf.mxu1  ;;  %2025 = vmax.xlane.f32.xlu0 %v2024_v17  ;;  %v5940_v19 = vpop.f32.mrf.mxu0  ;;  %v6383_v17 = vld [vmem:[#allocation16 + $0x20] sm:$0xff]  }
 0x9a7   : > { %v6384_v18 = vld [vmem:[#allocation16 + $0x58] sm:$0xff]  }
 0x9a8   : > { %v5934_v21 = vpop.f32.mrf.mxu1  ;;  %v6385_v19 = vld [vmem:[#allocation16 + $0x18] sm:$0xff]  }
 0x9a9   : > { %v6386_v21 = vld [vmem:[#allocation16 + $0x50] sm:$0xff]  }
 0x9aa   : > { %v2014_v24 = vpop.f32.mrf.mxu1 }
 0x9ab   : > { %v2021_v25 = vmul.f32 0.17677669, %v2014_v24  ;;  %v6387_v24 = vld [vmem:[#allocation16 + $0x10] sm:$0xff]  }
 0x9ac   : > { %v5945_v26 = vpop.f32.mrf.mxu1 }
 0x9ad   : > { %v2023_v28 = vadd.f32 %v2021_v25, %v7420_v30  ;;  %v6388_v25 = vld [vmem:[#allocation16 + $0x48] sm:$0xff]  }
 0x9ae   : > { %v2017_v29 = vpop.f32.mrf.mxu1  ;;  %v6389_v26 = vld [vmem:[#allocation16 + $0x8] sm:$0xff]  }
 0x9af   : > { %v2027_v31 = vsel %vm1348_vm4, %v2023_v28, -inf  ;;  %v6391_v29 = vld [vmem:[#allocation16] sm:$0xff]  }
 0x9b0   : > { %2028 = vmax.xlane.f32.xlu1 %v2027_v31  ;;  %v5946_v32 = vpop.f32.mrf.mxu1  ;;  %v6392_v31 = vld [vmem:[#allocation13 + $0x38] sm:$0xff]  }
 0x9b1   : > { %v6393_v32 = vld [vmem:[#allocation13 + $0x30] sm:$0xff]  }
 0x9c1   : > { %2096 = vrot.lane.b32.xlu1 %v7436_v58, %s7001_s16 }
 0x9c5   : > { %6299 = vrot.lane.b32.xlu1 %v6298_v23, %s7001_s16  ;;  %v6354_v23 = vld [vmem:[#allocation14 + $0xe4] ss:$16 sps:$4 sm:$0xff]  }
 0x9c9   : > { %6304 = vrot.lane.b32.xlu1 %v6303_v33, %s7000_s23  ;;  %v6394_v33 = vld [vmem:[#allocation13 + $0x28] sm:$0xff]  }
 0xa2f   : > { %v2026_v34 = vpop.xlane.xlu0 %2025 }
 0xa30   : > { %v2030_v35 = vsub.f32 %v2022_v10, %v2026_v34  ;;  %v6380_v10 = vld [vmem:[#allocation16 + $0x68] sm:$0xff]   ;;  %v6395_v34 = vld [vmem:[#allocation13 + $0x20] sm:$0xff]  }
 0xa32   : > { %v2032_v36 = vmul.f32 1.442695, %v2030_v35  ;;  %v6396_v35 = vld [vmem:[#allocation13 + $0x18] sm:$0xff]  }
 0xa34   : > { %6580 = vpow2.f32 %v2032_v36  ;;  %v6397_v36 = vld [vmem:[#allocation13 + $0x10] sm:$0xff]  }
 0xa39   : > { %v2029_v37 = vpop.xlane.xlu1 %2028 }
 0xa3a   : > { %v2031_v38 = vsub.f32 %v2023_v28, %v2029_v37  ;;  %v6390_v28 = vld [vmem:[#allocation16 + $0x40] sm:$0xff]   ;;  %v6398_v37 = vld [vmem:[#allocation13 + $0x8] sm:$0xff]  }
 0xa3c   : > { %v2034_v39 = vmul.f32 1.442695, %v2031_v38 }
 0xa3d   : > { %v2097_v40 = vpop.permute.xlu1 %2096 }
 0xa3e   : > { %6582 = vpow2.f32 %v2034_v39  ;;  %v2102_v41 = vsel %vm1376_vm2, %v2097_v40, 0  ;;  %v6399_v39 = vld [vmem:[#allocation13] sm:$0xff]  }
 0xa3f   : > { %5954 = vmatpush3.bf16.msra.mxu1 %v2102_v41  ;;  %v6402_v41 = vld [vmem:[#allocation14 + $0xec] ss:$16 sps:$4 sm:$0xff]  }
 0xa40   : > { %2470 = vmatprep.subr.bf16.mxu1 %v6354_v23 }
 0xa41   : > { %v6581_v58 = vpop.eup %6580 }
 0xa42   : > { %v2036_v42 = vsel %vm1348_vm4, %v6581_v58, 0.0 }
 0xa43   : > { %2037 = vadd.xlane.f32.xlu0 %v2036_v42 }
 0xa4b   : > { %v6583_v7 = vpop.eup %6582 }
 0xa4c   : > { %v2039_v22 = vsel %vm1348_vm4, %v6583_v7, 0.0 }
 0xa4d   : > { %2040 = vadd.xlane.f32.xlu0 %v2039_v22 }
 0xa63   : > { %2048 = vrot.lane.b32.xlu0 %v7412_v20, %s7001_s16 }
 0xacc   : > { %v2038_v43 = vpop.xlane.xlu0 %2037 }
 0xacd   : > { %6584 = vrcp.f32 %v2038_v43 }
 0xad6   : > { %v2041_v44 = vpop.xlane.xlu0 %2040 }
 0xad7   : > { %6586 = vrcp.f32 %v2041_v44 }
 0xada   : > { %v6585_v1 = vpop.eup %6584  ;;  %v2049_v11 = vpop.permute.xlu0 %2048 }
 0xadb   : > { %v2054_v15 = vsel %vm1376_vm2, %v2049_v11, 0  ;;  %v2044_v45 = vmul.f32 %v6585_v1, %v6581_v58  ;;  %v2292_v1 = vsub.s32 0, %v7417_v27  ;;  %v7580_v11 = vld [vmem:[%s7973_s14] sm:$0xf] }
 0xadc   : > { %5948 = vmatpush3.bf16.msra.mxu0 %v2054_v15  ;;  %v2296_v15 = vsub.s32 1, %v7417_v27 }
 0xadd   : > { %v2046_v46 = vpack.c.bf16 %v2044_v45, %v2044_v45  ;;  %5959 = vmatprep.subr.bf16.mxu0 %v6996_v4  ;;  %v2293_v45 = vrot.slane %v7580_v11, %v2292_v1 }
 0xadf   : > { %5950 = vmatmul.mubr.msk.bf16.vlgmr.msra.gmra.mxu0 %vm1348_vm4, %v2046_v46  ;;  %v2297_v46 = vrot.slane %v7580_v11, %v2296_v15 }
 0xae0   : > { %5975 = vmatprep.mubr.msk.bf16.mxu0 %vm6997_vm0, %v6996_v4  ;;  %5960 = vmatpush3.bf16.msra.mxu0 %v6392_v31 }
 0xae1   : > { %5961 = vmatprep.subr.bf16.mxu0 %v6996_v4 }
 0xae4   : > { %v6587_v47 = vpop.eup %6586  ;;  %5962 = vmatpush3.bf16.msra.mxu0 %v6393_v32 }
 0xae5   : > { %v2045_v20 = vmul.f32 %v6587_v47, %v6583_v7  ;;  %5963 = vmatprep.subr.bf16.mxu0 %v6996_v4 }
 0xae7   : > { %v2047_v49 = vpack.c.bf16 %v2045_v20, %v2045_v20 }
 0xae8   : > { %5964 = vmatpush3.bf16.msra.mxu0 %v6394_v33 }
 0xae9   : > { %5956 = vmatmul.mubr.msk.bf16.vlgmr.msra.gmra.mxu1 %vm1348_vm4, %v2047_v49  ;;  %5965 = vmatprep.subr.bf16.mxu0 %v6996_v4 }
 0xaea   : > { %2471 = vmatpush1.bf16.msra.mxu1 %v6352_v48  ;;  %2502 = vmatprep.mubr.bf16.mxu1 %v7002_v53 }
 0xaeb   : > { %2472 = vmatprep.subr.bf16.mxu1 %v6357_v50 }
 0xaec   : > { %5966 = vmatpush3.bf16.msra.mxu0 %v6395_v34 }
 0xaed   : > { %5967 = vmatprep.subr.bf16.mxu0 %v6996_v4 }
 0xaee   : > { %2473 = vmatpush1.bf16.msra.mxu1 %v6355_v52 }
 0xaef   : > { %2474 = vmatprep.subr.bf16.mxu1 %v6360_v54 }
 0xaf0   : > { %5968 = vmatpush3.bf16.msra.mxu0 %v6396_v35 }
 0xaf1   : > { %5969 = vmatprep.subr.bf16.mxu0 %v6996_v4 }
 0xaf2   : > { %2475 = vmatpush1.bf16.msra.mxu1 %v6358_v12 }
 0xaf3   : > { %2476 = vmatprep.subr.bf16.mxu1 %v6363_v55 }
 0xaf4   : > { %5970 = vmatpush3.bf16.msra.mxu0 %v6397_v36 }
 0xaf5   : > { %5971 = vmatprep.subr.bf16.mxu0 %v6996_v4 }
 0xaf6   : > { %2477 = vmatpush1.bf16.msra.mxu1 %v6361_v56 }
 0xaf7   : > { %2478 = vmatprep.subr.bf16.mxu1 %v6366_v57 }
 0xaf8   : > { %5972 = vmatpush3.bf16.msra.mxu0 %v6398_v37 }
 0xaf9   : > { %5973 = vmatprep.subr.bf16.mxu0 %v6996_v4 }
 0xafa   : > { %2479 = vmatpush1.bf16.msra.mxu1 %v6364_v59 }
 0xafb   : > { %2480 = vmatprep.subr.bf16.mxu1 %v6369_v60 }
 0xafc   : > { %5974 = vmatpush3.bf16.msra.mxu0 %v6399_v39 }
 0xafd   : > { %2513 = vmatprep.subr.bf16.mxu0 %v6402_v41 }
 0xafe   : > { %2481 = vmatpush1.bf16.msra.mxu1 %v6367_v61 }
 0xaff   : > { %2482 = vmatprep.subr.bf16.mxu1 %v6372_v62 }
 0xb02   : > { %2483 = vmatpush1.bf16.msra.mxu1 %v6370_v63 }
 0xb03   : > { %2484 = vmatprep.subr.bf16.mxu1 %v6375_v0 }
 0xb06   : > { %2485 = vmatpush1.bf16.msra.mxu1 %v6373_v2 }
 0xb07   : > { %5647 = vmatprep.subr.bf16.mxu1 %v6376_v3 }
 0xb09   : > { %2503 = vmatmul.mubr.bf16.vlgmr.msra.gmra.mxu1 %v7368_v51 }
 0xb0a   : > { %5648 = vmatpush3.bf16.msra.mxu1 %v6377_v5 }
 0xb0b   : > { %5649 = vmatprep.subr.bf16.mxu1 %v6378_v6 }
 0xb0e   : > { %5650 = vmatpush3.bf16.msra.mxu1 %v6379_v8 }
 0xb0f   : > { %5651 = vmatprep.subr.bf16.mxu1 %v6380_v10 }
 0xb12   : > { %5652 = vmatpush3.bf16.msra.mxu1 %v6381_v13 }
 0xb13   : > { %5653 = vmatprep.subr.bf16.mxu1 %v6382_v14 }
 0xb16   : > { %5654 = vmatpush3.bf16.msra.mxu1 %v6383_v17 }
 0xb17   : > { %5655 = vmatprep.subr.bf16.mxu1 %v6384_v18 }
 0xb1a   : > { %5656 = vmatpush3.bf16.msra.mxu1 %v6385_v19 }
 0xb1b   : > { %5657 = vmatprep.subr.bf16.mxu1 %v6386_v21 }
 0xb1e   : > { %5658 = vmatpush3.bf16.msra.mxu1 %v6387_v24 }
 0xb1f   : > { %5659 = vmatprep.subr.bf16.mxu1 %v6388_v25 }
 0xb22   : > { %5660 = vmatpush3.bf16.msra.mxu1 %v6389_v26 }
 0xb23   : > { %5661 = vmatprep.subr.bf16.mxu1 %v6390_v28 }
 0xb26   : > { %5662 = vmatpush3.bf16.msra.mxu1 %v6391_v29 }
 0xb27   : > { %5979 = vmatprep.subr.bf16.mxu1 %v6996_v4 }
 0xb9f   : > { %v2090_v38 = vpop.f32.mrf.mxu0 }
 0xba1   : > { %v5951_v40 = vpop.f32.mrf.mxu0 }
 0xba3   : > { %v2093_v58 = vpop.f32.mrf.mxu0 }
 0xba5   : > { %v5952_v42 = vpop.f32.mrf.mxu0 }
 0xba6   : > { %v6300_v42 = vpop.permute.xlu1 %6299 }
 0xba9   : > { %v2138_v7 = vpop.f32.mrf.mxu1 }
 0xbaa   : > { %v6308_v22 = vpack.i.bf16 %v2138_v7, %v2090_v38  ;;  %v6305_v7 = vpop.permute.xlu1 %6304 }
 0xbab   : > { %v5957_v23 = vpop.f32.mrf.mxu1 }
 0xbac   : > { %6309 = vrot.lane.b32.xlu0 %v6308_v22, %s6999_s8  ;;  %v6302_v22 = vunpack.i.h.bf16 %v6300_v42  ;;  %v6301_v23 = vunpack.i.l.bf16 %v6300_v42 }
 0xbad   : > { %v2141_v43 = vpop.f32.mrf.mxu1 }
 0xbae   : > { %v6307_v43 = vunpack.i.h.bf16 %v6305_v7 }
 0xbaf   : > { %v5958_v44 = vpop.f32.mrf.mxu1 }
 0xbb0   : > { %v6306_v44 = vunpack.i.l.bf16 %v6305_v7 }
 0xbc9   : > { %v2504_v47 = vpop.f32.mrf.mxu1 }
 0xbca   : > { %v2505_v20 = vadd.f32 %v2504_v47, %v2293_v45  ;;  %v2168_v47 = vsel %vm1251_vm1, %v7457_v9, %v6301_v23  ;;  %v6408_v9 = vld [vmem:[#allocation14 + $0xac] ss:$16 sps:$4 sm:$0xff]  }
 0xbcb   : > { %v2506_v48 = vpop.f32.mrf.mxu1 }
 0xbcc   : > { %v2556_v49 = vmul.f32 %v2505_v20, %v2505_v20  ;;  %v2507_v50 = vadd.f32 %v2506_v48, %v2297_v46 }
 0xbcd   : > { %v2508_v52 = vpop.f32.mrf.mxu1 }
 0xbce   : > { %v2564_v54 = vmul.f32 %v2556_v49, %v2505_v20  ;;  %v2557_v12 = vmul.f32 %v2507_v50, %v2507_v50  ;;  %v2509_v55 = vadd.f32 %v2508_v52, %v2293_v45 }
 0xbcf   : > { %v2510_v56 = vpop.f32.mrf.mxu1 }
 0xbd0   : > { %v2572_v57 = vmul.f32 0.044715, %v2564_v54  ;;  %v2565_v59 = vmul.f32 %v2557_v12, %v2507_v50  ;;  %v2560_v60 = vmul.f32 %v2509_v55, %v2509_v55  ;;  %v2511_v61 = vadd.f32 %v2510_v56, %v2297_v46  ;;  %v6400_v12 = vld [vmem:[#allocation14 + $0xe8] ss:$16 sps:$4 sm:$0xff]   ;;  %v6405_v56 = vld [vmem:[#allocation14 + $0xcc] ss:$16 sps:$4 sm:$0xff]  }
 0xbd1   : > { %v2169_v46 = vsel %vm1251_vm1, %v7459_v16, %v6302_v22  ;;  %v6406_v16 = vld [vmem:[#allocation14 + $0xa8] ss:$16 sps:$4 sm:$0xff]  }
 0xbd2   : > { %v2580_v62 = vadd.f32 %v2572_v57, %v2505_v20  ;;  %v2573_v63 = vmul.f32 0.044715, %v2565_v59  ;;  %v2568_v0 = vmul.f32 %v2560_v60, %v2509_v55  ;;  %v2561_v2 = vmul.f32 %v2511_v61, %v2511_v61  ;;  %v6403_v57 = vld [vmem:[#allocation14 + $0xc8] ss:$16 sps:$4 sm:$0xff]   ;;  %v6411_v59 = vld [vmem:[#allocation14 + $0x8c] ss:$16 sps:$4 sm:$0xff]  }
 0xbd3   : > { %v2172_v49 = vsel %vm2170_vm5, %v2169_v46, %v6307_v43  ;;  %v6409_v60 = vld [vmem:[#allocation14 + $0x88] ss:$16 sps:$4 sm:$0xff]  }
 0xbd4   : > { %v2588_v3 = vmul.f32 0.7978846, %v2580_v62  ;;  %v2581_v5 = vadd.f32 %v2573_v63, %v2507_v50  ;;  %v2576_v6 = vmul.f32 0.044715, %v2568_v0  ;;  %v2569_v8 = vmul.f32 %v2561_v2, %v2511_v61  ;;  %v6412_v62 = vld [vmem:[#allocation14 + $0x68] ss:$16 sps:$4 sm:$0xff]  }
 0xbd5   : > { %v6417_v63 = vld [vmem:[#allocation14 + $0x4c] ss:$16 sps:$4 sm:$0xff]   ;;  %v6415_v0 = vld [vmem:[#allocation14 + $0x48] ss:$16 sps:$4 sm:$0xff]  }
 0xbd6   : > { %v2589_v10 = vmul.f32 0.7978846, %v2581_v5  ;;  %v2584_v13 = vadd.f32 %v2576_v6, %v2509_v55  ;;  %v2577_v14 = vmul.f32 0.044715, %v2569_v8  ;;  %6588 = vtanh.f32 %v2588_v3  ;;  %v6420_v2 = vld [vmem:[#allocation14 + $0x2c] ss:$16 sps:$4 sm:$0xff]  }
 0xbd7   : > { %v6418_v3 = vld [vmem:[#allocation14 + $0x28] ss:$16 sps:$4 sm:$0xff]   ;;  %v6423_v5 = vld [vmem:[#allocation14 + $0xc] ss:$16 sps:$4 sm:$0xff]  }
 0xbd8   : > { %6590 = vtanh.f32 %v2589_v10  ;;  %v2592_v17 = vmul.f32 0.7978846, %v2584_v13  ;;  %v2585_v18 = vadd.f32 %v2577_v14, %v2511_v61  ;;  %v6421_v6 = vld [vmem:[#allocation14 + $0x8] ss:$16 sps:$4 sm:$0xff]   ;;  %v6426_v13 = vld [vmem:[#allocation16 + $0xf0] sm:$0xff]  }
 0xbd9   : > { %v6424_v8 = vld [vmem:[#allocation16 + $0xf8] sm:$0xff]   ;;  %v6427_v14 = vld [vmem:[#allocation16 + $0xb0] sm:$0xff]  }
 0xbda   : > { %6592 = vtanh.f32 %v2592_v17  ;;  %v2593_v19 = vmul.f32 0.7978846, %v2585_v18  ;;  %v6425_v10 = vld [vmem:[#allocation16 + $0xb8] sm:$0xff]   ;;  %v6428_v17 = vld [vmem:[#allocation16 + $0xe8] sm:$0xff]  }
 0xbdb   : > { %v6429_v18 = vld [vmem:[#allocation16 + $0xa8] sm:$0xff]  }
 0xbdc   : > { %6594 = vtanh.f32 %v2593_v19  ;;  %v6430_v19 = vld [vmem:[#allocation16 + $0xe0] sm:$0xff]  }
 0xbe3   : > { %v6589_v21 = vpop.eup %6588 }
 0xbe4   : > { %v2604_v28 = vadd.f32 1.0, %v6589_v21  ;;  %v6431_v21 = vld [vmem:[#allocation16 + $0xa0] sm:$0xff]  }
 0xbe5   : > { %v6591_v24 = vpop.eup %6590 }
 0xbe6   : > { %v2605_v25 = vadd.f32 1.0, %v6591_v24  ;;  %v2612_v35 = vmul.f32 0.5, %v2604_v28  ;;  %v6432_v24 = vld [vmem:[#allocation16 + $0xd8] sm:$0xff]   ;;  %v6436_v28 = vld [vmem:[#allocation16 + $0xc8] sm:$0xff]  }
 0xbe7   : > { %v6593_v26 = vpop.eup %6592 }
 0xbe8   : > { %v2608_v29 = vadd.f32 1.0, %v6593_v26  ;;  %v2613_v34 = vmul.f32 0.5, %v2605_v25  ;;  %v2620_v40 = vmul.f32 %v2612_v35, %v2505_v20  ;;  %v6433_v25 = vld [vmem:[#allocation16 + $0x98] sm:$0xff]   ;;  %v6435_v26 = vld [vmem:[#allocation16 + $0x90] sm:$0xff]  }
 0xbe9   : > { %v6595_v31 = vpop.eup %6594 }
 0xbea   : > { %v2616_v32 = vmul.f32 0.5, %v2608_v29  ;;  %v2609_v33 = vadd.f32 1.0, %v6595_v31  ;;  %v2621_v38 = vmul.f32 %v2613_v34, %v2507_v50  ;;  %v2171_v50 = vsel %vm2170_vm5, %v2168_v47, %v6306_v44  ;;  %v6437_v29 = vld [vmem:[#allocation16 + $0x88] sm:$0xff]   ;;  %v6438_v31 = vld [vmem:[#allocation16 + $0xc0] sm:$0xff]  }
 0xbec   : > { %v2617_v36 = vmul.f32 0.5, %v2609_v33  ;;  %v2624_v37 = vmul.f32 %v2616_v32, %v2509_v55  ;;  %v6439_v32 = vld [vmem:[#allocation16 + $0x80] sm:$0xff]  }
 0xbee   : > { %v2625_v39 = vmul.f32 %v2617_v36, %v2511_v61  ;;  %v2628_v58 = vpack.c.bf16 %v2624_v37, %v2620_v40  ;;  %v6414_v61 = vld [vmem:[#allocation14 + $0x6c] ss:$16 sps:$4 sm:$0xff]   ;;  %v2300_v37 = vsub.s32 2, %v7417_v27 }
 0xbf0   : > { %v2629_v41 = vpack.c.bf16 %v2625_v39, %v2621_v38  ;;  %v2304_v38 = vsub.s32 3, %v7417_v27  ;;  %v2301_v39 = vrot.slane %v7580_v11, %v2300_v37 }
 0xbf2   : > { %2862 = vmatprep.mubr.bf16.mxu1 %v2629_v41  ;;  %v2305_v40 = vrot.slane %v7580_v11, %v2304_v38 }
 0xbf3   : > { %2863 = vmatmul.mubr.bf16.vlgmr.msra.gmra.mxu1 %v2628_v58 }
 0xbf4   : > { %5995 = vmatprep.mubr.msk.bf16.mxu1 %vm6997_vm0, %v6996_v4 }
 0xc1e   : > { %v6310_v45 = vpop.permute.xlu0 %6309 }
 0xc1f   : > { %v6312_v20 = vunpack.i.h.bf16 %v6310_v45  ;;  %v6311_v48 = vunpack.i.l.bf16 %v6310_v45 }
 0xc21   : > { %v2175_v52 = vsel %vm2173_vm6, %v2172_v49, %v6312_v20  ;;  %v2174_v54 = vsel %vm2173_vm6, %v2171_v50, %v6311_v48 }
 0xc22   : > { %v2176_v55 = vpack.c.bf16 %v2175_v52, %v2174_v54 }
 0xc24   : > { %5976 = vmatmul.mubr.bf16.vlgmr.msra.gmra.mxu0 %v2176_v55 }
 0xc25   : > { %2514 = vmatpush1.bf16.msra.mxu0 %v6400_v12  ;;  %2545 = vmatprep.mubr.bf16.mxu0 %v7002_v53 }
 0xc26   : > { %2515 = vmatprep.subr.bf16.mxu0 %v6405_v56 }
 0xc29   : > { %2516 = vmatpush1.bf16.msra.mxu0 %v6403_v57 }
 0xc2a   : > { %2517 = vmatprep.subr.bf16.mxu0 %v6408_v9 }
 0xc2d   : > { %2518 = vmatpush1.bf16.msra.mxu0 %v6406_v16 }
 0xc2e   : > { %2519 = vmatprep.subr.bf16.mxu0 %v6411_v59 }
 0xc31   : > { %2520 = vmatpush1.bf16.msra.mxu0 %v6409_v60 }
 0xc32   : > { %2521 = vmatprep.subr.bf16.mxu0 %v6414_v61 }
 0xc35   : > { %2522 = vmatpush1.bf16.msra.mxu0 %v6412_v62 }
 0xc36   : > { %2523 = vmatprep.subr.bf16.mxu0 %v6417_v63 }
 0xc39   : > { %2524 = vmatpush1.bf16.msra.mxu0 %v6415_v0 }
 0xc3a   : > { %2525 = vmatprep.subr.bf16.mxu0 %v6420_v2 }
 0xc3d   : > { %2526 = vmatpush1.bf16.msra.mxu0 %v6418_v3 }
 0xc3e   : > { %2527 = vmatprep.subr.bf16.mxu0 %v6423_v5 }
 0xc41   : > { %2528 = vmatpush1.bf16.msra.mxu0 %v6421_v6 }
 0xc42   : > { %5669 = vmatprep.subr.bf16.mxu0 %v6424_v8 }
 0xc44   : > { %2546 = vmatmul.mubr.bf16.vlgmr.msra.gmra.mxu0 %v7368_v51  ;;  %v6434_v51 = vld [vmem:[#allocation16 + $0xd0] sm:$0xff]  }
 0xc45   : > { %5670 = vmatpush3.bf16.msra.mxu0 %v6425_v10 }
 0xc46   : > { %5671 = vmatprep.subr.bf16.mxu0 %v6426_v13 }
 0xc49   : > { %5672 = vmatpush3.bf16.msra.mxu0 %v6427_v14 }
 0xc4a   : > { %5673 = vmatprep.subr.bf16.mxu0 %v6428_v17 }
 0xc4d   : > { %5674 = vmatpush3.bf16.msra.mxu0 %v6429_v18 }
 0xc4e   : > { %5675 = vmatprep.subr.bf16.mxu0 %v6430_v19 }
 0xc51   : > { %5676 = vmatpush3.bf16.msra.mxu0 %v6431_v21 }
 0xc52   : > { %5677 = vmatprep.subr.bf16.mxu0 %v6432_v24 }
 0xc55   : > { %5678 = vmatpush3.bf16.msra.mxu0 %v6433_v25 }
 0xc56   : > { %5679 = vmatprep.subr.bf16.mxu0 %v6434_v51 }
 0xc59   : > { %5680 = vmatpush3.bf16.msra.mxu0 %v6435_v26 }
 0xc5a   : > { %5681 = vmatprep.subr.bf16.mxu0 %v6436_v28 }
 0xc5d   : > { %5682 = vmatpush3.bf16.msra.mxu0 %v6437_v29 }
 0xc5e   : > { %5683 = vmatprep.subr.bf16.mxu0 %v6438_v31 }
 0xc61   : > { %5684 = vmatpush3.bf16.msra.mxu0 %v6439_v32  ;;  %v5365_v32 = vld [vmem:[%s7971_s12] ss:$0 sm:$0xff] }
 0xc62   : > { %5999 = vmatprep.subr.bf16.mxu0 %v6996_v4 }
 0xcb3   : > { %v5663_v28 = vpop.f32.mrf.mxu1 }
 0xcb5   : > { %v5664_v29 = vpop.f32.mrf.mxu1 }
 0xcb7   : > { %v5666_v31 = vpop.f32.mrf.mxu1 }
 0xce4   : > { %v7602_v33 = vpop.f32.mrf.mxu0 }
 0xce6   : > { %v5977_v34 = vpop.f32.mrf.mxu0 }
 0xce7   : > { %v5665_v34 = vadd.f32 %v5664_v29, %v5663_v28 }
 0xce8   : > { %v7604_v35 = vpop.f32.mrf.mxu0 }
 0xcea   : > { %v5978_v36 = vpop.f32.mrf.mxu0 }
 0xceb   : > { %v5408_v36 = vld [vmem:[%s8037_s22] ss:$0 sm:$0xff] }
 0xd04   : > { %v2547_v41 = vpop.f32.mrf.mxu0 }
 0xd05   : > { %v2548_v58 = vadd.f32 %v2547_v41, %v2301_v39  ;;  %v2266_v41 = vadd.f32 %v5365_v32, %v7602_v33 }
 0xd06   : > { %v2549_v42 = vpop.f32.mrf.mxu0 }
 0xd07   : > { %v2558_v7 = vmul.f32 %v2548_v58, %v2548_v58  ;;  %v2550_v22 = vadd.f32 %v2549_v42, %v2305_v40  ;;  %v2865_v42 = vadd.f32 %v5665_v34, %v5408_v36 }
 0xd08   : > { %v2551_v23 = vpop.f32.mrf.mxu0 }
 0xd09   : > { %v2566_v43 = vmul.f32 %v2558_v7, %v2548_v58  ;;  %v2559_v44 = vmul.f32 %v2550_v22, %v2550_v22  ;;  %v2552_v45 = vadd.f32 %v2551_v23, %v2301_v39  ;;  %v5667_v39 = vpop.f32.mrf.mxu1 }
 0xd0a   : > { %v2553_v46 = vpop.f32.mrf.mxu0  ;;  %v5668_v7 = vadd.f32 %v5667_v39, %v5666_v31  ;;  %v5449_v31 = vld [vmem:[#allocation5 + $0x1] ss:$0 sm:$0xff] }
 0xd0b   : > { %v2574_v47 = vmul.f32 0.044715, %v2566_v43  ;;  %v2567_v20 = vmul.f32 %v2559_v44, %v2550_v22  ;;  %v2562_v48 = vmul.f32 %v2552_v45, %v2552_v45  ;;  %v2554_v49 = vadd.f32 %v2553_v46, %v2305_v40  ;;  %v6660_v43 = vld [vmem:[%s7313_s25] sm:$0xff] }
 0xd0c   : > { %v2912_v44 = vadd.f32 %v6660_v43, %v2266_v41  ;;  %v5450_v41 = vld [vmem:[%s8036_s24 + $0x1] ss:$0 sm:$0xff] }
 0xd0d   : > { %v2582_v50 = vadd.f32 %v2574_v47, %v2548_v58  ;;  %v2575_v52 = vmul.f32 0.044715, %v2567_v20  ;;  %v2570_v54 = vmul.f32 %v2562_v48, %v2552_v45  ;;  %v2563_v12 = vmul.f32 %v2554_v49, %v2554_v49 }
 0xd0e   : > { %v2868_v20 = vadd.f32 %v5668_v7, %v5408_v36 }
 0xd0f   : > { %v2590_v55 = vmul.f32 0.7978846, %v2582_v50  ;;  %v2583_v11 = vadd.f32 %v2575_v52, %v2550_v22  ;;  %v2578_v56 = vmul.f32 0.044715, %v2570_v54  ;;  %v2571_v57 = vmul.f32 %v2563_v12, %v2554_v49  ;;  %v6661_v50 = vld [vmem:[%s7313_s25 + $0x8] sm:$0xff]  ;;  %s8040_s25 = sld [smem:[#allocation37_spill]] }
 0xd10   : > { %v6440_v12 = vld [vmem:[#allocation7 + $0x78] sm:$0xff]  }
 0xd11   : > { %v2591_v9 = vmul.f32 0.7978846, %v2583_v11  ;;  %v2586_v16 = vadd.f32 %v2578_v56, %v2552_v45  ;;  %v2579_v59 = vmul.f32 0.044715, %v2571_v57  ;;  %6596 = vtanh.f32 %v2590_v55  ;;  %v6441_v55 = vld [vmem:[#allocation8 + $0x78] sm:$0xff]   ;;  %5980 = vmatpush3.bf16.msra.mxu1 %v6440_v12  ;;  %v6462_v12 = vld [vmem:[#allocation11 + $0x48] sm:$0xff]  }
 0xd12   : > { %5981 = vmatprep.subr.bf16.mxu1 %v6996_v4 }
 0xd13   : > { %6598 = vtanh.f32 %v2591_v9  ;;  %v2594_v60 = vmul.f32 0.7978846, %v2586_v16  ;;  %v2587_v61 = vadd.f32 %v2579_v59, %v2554_v49 }
 0xd15   : > { %6600 = vtanh.f32 %v2594_v60  ;;  %v2595_v62 = vmul.f32 0.7978846, %v2587_v61  ;;  %v6442_v61 = vld [vmem:[#allocation7 + $0x70] sm:$0xff]  }
 0xd16   : > { %5982 = vmatpush3.bf16.msra.mxu1 %v6442_v61 }
 0xd17   : > { %6602 = vtanh.f32 %v2595_v62  ;;  %v6443_v62 = vld [vmem:[#allocation8 + $0x70] sm:$0xff]   ;;  %5983 = vmatprep.subr.bf16.mxu1 %v6996_v4 }
 0xd1e   : > { %v6597_v63 = vpop.eup %6596 }
 0xd1f   : > { %v2606_v5 = vadd.f32 1.0, %v6597_v63  ;;  %v6444_v63 = vld [vmem:[#allocation7 + $0x68] sm:$0xff]  }
 0xd20   : > { %v6599_v0 = vpop.eup %6598  ;;  %5984 = vmatpush3.bf16.msra.mxu1 %v6444_v63 }
 0xd21   : > { %v2607_v2 = vadd.f32 1.0, %v6599_v0  ;;  %v2614_v17 = vmul.f32 0.5, %v2606_v5  ;;  %v6445_v0 = vld [vmem:[#allocation8 + $0x68] sm:$0xff]   ;;  %5985 = vmatprep.subr.bf16.mxu1 %v6996_v4  ;;  %v6448_v5 = vld [vmem:[#allocation7 + $0x58] sm:$0xff]  }
 0xd22   : > { %v6601_v3 = vpop.eup %6600 }
 0xd23   : > { %v2610_v6 = vadd.f32 1.0, %v6601_v3  ;;  %v2615_v14 = vmul.f32 0.5, %v2607_v2  ;;  %v2622_v25 = vmul.f32 %v2614_v17, %v2548_v58  ;;  %v6446_v2 = vld [vmem:[#allocation7 + $0x60] sm:$0xff]  }
 0xd24   : > { %v6603_v8 = vpop.eup %6602  ;;  %v6447_v3 = vld [vmem:[#allocation8 + $0x60] sm:$0xff]   ;;  %5986 = vmatpush3.bf16.msra.mxu1 %v6446_v2 }
 0xd25   : > { %v2618_v10 = vmul.f32 0.5, %v2610_v6  ;;  %v2611_v13 = vadd.f32 1.0, %v6603_v8  ;;  %v2623_v21 = vmul.f32 %v2615_v14, %v2550_v22  ;;  %5987 = vmatprep.subr.bf16.mxu1 %v6996_v4  ;;  %v6449_v6 = vld [vmem:[#allocation8 + $0x58] sm:$0xff]   ;;  %v6450_v8 = vld [vmem:[#allocation7 + $0x50] sm:$0xff]   ;;  %v6453_v14 = vld [vmem:[#allocation8 + $0x48] sm:$0xff]  }
 0xd26   : > { %v6454_v17 = vld [vmem:[#allocation7 + $0x40] sm:$0xff]  }
 0xd27   : > { %v2619_v18 = vmul.f32 0.5, %v2611_v13  ;;  %v2626_v19 = vmul.f32 %v2618_v10, %v2552_v45  ;;  %v2269_v45 = vadd.f32 %v5365_v32, %v7604_v35  ;;  %v6451_v10 = vld [vmem:[#allocation8 + $0x50] sm:$0xff]   ;;  %v6452_v13 = vld [vmem:[#allocation7 + $0x48] sm:$0xff]   ;;  %v5503_v32 = vld [vmem:[%s8035_s18 + $0x1] ss:$0 sm:$0xff] }
 0xd28   : > { %5988 = vmatpush3.bf16.msra.mxu1 %v6448_v5 }
 0xd29   : > { %v2627_v24 = vmul.f32 %v2619_v18, %v2554_v49  ;;  %v2630_v26 = vpack.c.bf16 %v2626_v19, %v2622_v25  ;;  %v2913_v52 = vadd.f32 %v6661_v50, %v2269_v45  ;;  %5989 = vmatprep.subr.bf16.mxu1 %v6996_v4  ;;  %v6455_v18 = vld [vmem:[#allocation8 + $0x40] sm:$0xff]  }
 0xd2a   : > { %v6456_v45 = vld [vmem:[#allocation11 + $0x78] sm:$0xff]   ;;  %v6459_v50 = vld [vmem:[#allocation11 + $0x60] sm:$0xff]  }
 0xd2b   : > { %v2631_v51 = vpack.c.bf16 %v2627_v24, %v2623_v21 }
 0xd2c   : > { %5990 = vmatpush3.bf16.msra.mxu1 %v6450_v8 }
 0xd2d   : > { %2903 = vmatprep.mubr.bf16.mxu0 %v2631_v51  ;;  %5991 = vmatprep.subr.bf16.mxu1 %v6996_v4 }
 0xd2e   : > { %2904 = vmatmul.mubr.bf16.vlgmr.msra.gmra.mxu0 %v2630_v26 }
 0xd2f   : > { %6015 = vmatprep.mubr.msk.bf16.mxu0 %vm6997_vm0, %v6996_v4  ;;  %6000 = vmatpush3.bf16.msra.mxu0 %v6441_v55  ;;  %v6463_v55 = vld [vmem:[#allocation11 + $0x40] sm:$0xff]  }
 0xd30   : > { %6001 = vmatprep.subr.bf16.mxu0 %v6996_v4  ;;  %5992 = vmatpush3.bf16.msra.mxu1 %v6452_v13 }
 0xd31   : > { %5993 = vmatprep.subr.bf16.mxu1 %v6996_v4 }
 0xd33   : > { %6002 = vmatpush3.bf16.msra.mxu0 %v6443_v62 }
 0xd34   : > { %6003 = vmatprep.subr.bf16.mxu0 %v6996_v4  ;;  %5994 = vmatpush3.bf16.msra.mxu1 %v6454_v17  ;;  %v5469_v17 = vld [vmem:[%s7969_s10 + $0x1] ss:$0 sm:$0xff] }
 0xd35   : > { %6019 = vmatprep.subr.bf16.mxu1 %v6996_v4 }
 0xd37   : > { %6004 = vmatpush3.bf16.msra.mxu0 %v6445_v0 }
 0xd38   : > { %6005 = vmatprep.subr.bf16.mxu0 %v6996_v4 }
 0xd3b   : > { %6006 = vmatpush3.bf16.msra.mxu0 %v6447_v3 }
 0xd3c   : > { %6007 = vmatprep.subr.bf16.mxu0 %v6996_v4 }
 0xd3f   : > { %6008 = vmatpush3.bf16.msra.mxu0 %v6449_v6 }
 0xd40   : > { %6009 = vmatprep.subr.bf16.mxu0 %v6996_v4 }
 0xd43   : > { %6010 = vmatpush3.bf16.msra.mxu0 %v6451_v10 }
 0xd44   : > { %6011 = vmatprep.subr.bf16.mxu0 %v6996_v4 }
 0xd47   : > { %6012 = vmatpush3.bf16.msra.mxu0 %v6453_v14 }
 0xd48   : > { %6013 = vmatprep.subr.bf16.mxu0 %v6996_v4 }
 0xd4b   : > { %6014 = vmatpush3.bf16.msra.mxu0 %v6455_v18 }
 0xd4c   : > { %6039 = vmatprep.subr.bf16.mxu0 %v6996_v4 }
 0xdee   : > { %v5685_v40 = vpop.f32.mrf.mxu0 }
 0xdf0   : > { %v5686_v58 = vpop.f32.mrf.mxu0 }
 0xdf1   : > { %v5687_v22 = vadd.f32 %v5686_v58, %v5685_v40  ;;  %v5504_v58 = vld [vmem:[%s7963_s4 + $0x1] ss:$0 sm:$0xff] }
 0xdf2   : > { %v5688_v23 = vpop.f32.mrf.mxu0 }
 0xdf3   : > { %v2906_v46 = vadd.f32 %v5687_v22, %v2865_v42 }
 0xdf4   : > { %v5689_v47 = vpop.f32.mrf.mxu0 }
 0xdf5   : > { %v5690_v48 = vadd.f32 %v5689_v47, %v5688_v23  ;;  %v7625_v49 = vadd.f32 %v2912_v44, %v2906_v46 }
 0xdf7   : > { %v2909_v54 = vadd.f32 %v5690_v48, %v2868_v20  ;;  %3102 = vadd.xlane.f32.xlu1 %v7625_v49  ;;  %v6457_v20 = vld [vmem:[#allocation11 + $0x70] sm:$0xff]   ;;  %v6458_v48 = vld [vmem:[#allocation11 + $0x68] sm:$0xff]  }
 0xdf9   : > { %v7629_v33 = vadd.f32 %v2913_v52, %v2909_v54  ;;  %v6460_v52 = vld [vmem:[#allocation11 + $0x58] sm:$0xff]   ;;  %v6461_v54 = vld [vmem:[#allocation11 + $0x50] sm:$0xff]  }
 0xdfb   : > { %3104 = vadd.xlane.f32.xlu0 %v7629_v33 }
 0xe80   : > { %v3103_v35 = vpop.xlane.xlu1 %3102 }
 0xe81   : > { %v3106_v11 = vmul.f32 0.0078125, %v3103_v35  ;;  %v5460_v35 = vld [vmem:[#allocation10 + $0x1] ss:$0 sm:$0xff] }
 0xe83   : > { %v3108_v56 = vsub.f32 %v7625_v49, %v3106_v11 }
 0xe84   : > { %v3105_v57 = vpop.xlane.xlu0 %3104 }
 0xe85   : > { %v3107_v9 = vmul.f32 0.0078125, %v3105_v57  ;;  %v3110_v16 = vmul.f32 %v3108_v56, %v3108_v56 }
 0xe87   : > { %v3109_v59 = vsub.f32 %v7629_v33, %v3107_v9  ;;  %3112 = vadd.xlane.f32.xlu0 %v3110_v16 }
 0xe89   : > { %v3111_v60 = vmul.f32 %v3109_v59, %v3109_v59 }
 0xe8b   : > { %3114 = vadd.xlane.f32.xlu0 %v3111_v60  ;;  %v5451_v60 = vld [vmem:[%s7965_s6 + $0x1] ss:$0 sm:$0xff] }
 0xf10   : > { %v3113_v19 = vpop.xlane.xlu0 %3112 }
 0xf11   : > { %v3116_v21 = vmul.f32 0.0078125, %v3113_v19 }
 0xf13   : > { %v3118_v24 = vadd.f32 1e-05, %v3116_v21 }
 0xf14   : > { %v3115_v25 = vpop.xlane.xlu0 %3114 }
 0xf15   : > { %6604 = vrsqrt.f32 %v3118_v24  ;;  %v3117_v51 = vmul.f32 0.0078125, %v3115_v25 }
 0xf17   : > { %v3119_v26 = vadd.f32 1e-05, %v3117_v51 }
 0xf19   : > { %6606 = vrsqrt.f32 %v3119_v26 }
 0xf22   : > { %v6605_v28 = vpop.eup %6604 }
 0xf23   : > { %v3122_v29 = vmul.f32 %v6605_v28, %v3108_v56 }
 0xf25   : > { %v3130_v39 = vmul.f32 %v5449_v31, %v3122_v29  ;;  %v4454_v40 = vmul.f32 %v5503_v32, %v3122_v29 }
 0xf26   : > { %v6607_v34 = vpop.eup %6606 }
 0xf27   : > { %v3123_v36 = vmul.f32 %v6607_v34, %v3109_v59  ;;  %v3138_v22 = vadd.f32 %v5450_v41, %v3130_v39  ;;  %v4462_v43 = vadd.f32 %v5504_v58, %v4454_v40 }
 0xf29   : > { %v3131_v42 = vmul.f32 %v5449_v31, %v3123_v36  ;;  %v4455_v7 = vmul.f32 %v5503_v32, %v3123_v36 }
 0xf2b   : > { %v3139_v23 = vadd.f32 %v5450_v41, %v3131_v42  ;;  %v4463_v44 = vadd.f32 %v5504_v58, %v4455_v7 }
 0xf2d   : > { %v3140_v46 = vpack.c.bf16 %v3139_v23, %v3138_v22  ;;  %v7659_v47 = vpack.c.bf16 %v4463_v44, %v4462_v43 }
 0xf2f   : > { %5996 = vmatmul.mubr.bf16.vlgmr.msra.gmra.mxu1 %v3140_v46  ;;  %6016 = vmatmul.mubr.bf16.vlgmr.msra.gmra.mxu0 %v3140_v46 }
 0xf30   : > { %6020 = vmatpush3.bf16.msra.mxu1 %v6456_v45  ;;  %6035 = vmatprep.mubr.msk.bf16.mxu1 %vm6997_vm0, %v6996_v4 }
 0xf31   : > { %6021 = vmatprep.subr.bf16.mxu1 %v6996_v4  ;;  %6041 = vmatprep.mubr.msk.bf16.mxu0 %vm6997_vm0, %v6996_v4 }
 0xf34   : > { %6022 = vmatpush3.bf16.msra.mxu1 %v6457_v20 }
 0xf35   : > { %6023 = vmatprep.subr.bf16.mxu1 %v6996_v4 }
 0xf38   : > { %6024 = vmatpush3.bf16.msra.mxu1 %v6458_v48 }
 0xf39   : > { %6025 = vmatprep.subr.bf16.mxu1 %v6996_v4 }
 0xf3c   : > { %6026 = vmatpush3.bf16.msra.mxu1 %v6459_v50 }
 0xf3d   : > { %6027 = vmatprep.subr.bf16.mxu1 %v6996_v4 }
 0xf40   : > { %6028 = vmatpush3.bf16.msra.mxu1 %v6460_v52 }
 0xf41   : > { %6029 = vmatprep.subr.bf16.mxu1 %v6996_v4 }
 0xf44   : > { %6030 = vmatpush3.bf16.msra.mxu1 %v6461_v54 }
 0xf45   : > { %6031 = vmatprep.subr.bf16.mxu1 %v6996_v4 }
 0xf48   : > { %6032 = vmatpush3.bf16.msra.mxu1 %v6462_v12 }
 0xf49   : > { %6033 = vmatprep.subr.bf16.mxu1 %v6996_v4 }
 0xf4c   : > { %6034 = vmatpush3.bf16.msra.mxu1 %v6463_v55 }
 0xf4d   : > { %6045 = vmatprep.subr.bf16.mxu1 %v6996_v4 }
 0xf4f   : > { %6036 = vmatmul.mubr.bf16.vlgmr.msra.gmra.mxu1 %v3140_v46 }
 0xf50   : > { %6047 = vmatprep.mubr.msk.bf16.mxu1 %vm6997_vm0, %v6996_v4 }
 0xfef   : > { %v3229_v11 = vpop.f32.mrf.mxu1  ;;  %v3324_v56 = vpop.f32.mrf.mxu0 }
 0xff0   : > { %v3325_v57 = vadd.f32 %v5460_v35, %v3324_v56  ;;  %v3230_v5 = vadd.f32 %v5451_v60, %v3229_v11 }
 0xff1   : > { %v5997_v9 = vpop.f32.mrf.mxu1  ;;  %v6017_v16 = vpop.f32.mrf.mxu0 }
 0xff2   : > { %v7675_v59 = vpack.c.bf16 %v3325_v57, %v3325_v57  ;;  %v7687_v10 = vpack.c.bf16 %v3230_v5, %v3230_v5 }
 0xff3   : > { %v3232_v61 = vpop.f32.mrf.mxu1  ;;  %v3327_v62 = vpop.f32.mrf.mxu0 }
 0xff4   : > { %v3328_v63 = vadd.f32 %v5460_v35, %v3327_v62  ;;  %v3436_v0 = vsel %vm1251_vm1, %v7675_v59, 0  ;;  %v3233_v13 = vadd.f32 %v5451_v60, %v3232_v61 }
 0xff5   : > { %v5998_v2 = vpop.f32.mrf.mxu1  ;;  %v6018_v3 = vpop.f32.mrf.mxu0  ;;  %6040 = vmatpush3.bf16.xpose.msra.mxu0 %v3436_v0 }
 0xff6   : > { %v7682_v6 = vpack.c.bf16 %v3328_v63, %v3328_v63  ;;  %6051 = vmatprep.subr.bf16.mxu0 %v6996_v4  ;;  %v7694_v14 = vpack.c.bf16 %v3233_v13, %v3233_v13 }
 0xff8   : > { %v3482_v8 = vsel %vm1251_vm1, %v7682_v6, 0 }
 0xff9   : > { %6046 = vmatpush3.bf16.xpose.msra.mxu1 %v3482_v8 }
 0xffa   : > { %6057 = vmatprep.subr.bf16.mxu1 %v6996_v4 }
 0xffc   : > { %6042 = vmatmul.mubr.msk.bf16.vlgmr.msra.gmra.mxu0 %vm1251_vm1, %v7687_v10 }
 0xffd   : > { %6053 = vmatprep.mubr.msk.bf16.mxu0 %vm6997_vm0, %v6996_v4 }
0x1000   : > { %6048 = vmatmul.mubr.msk.bf16.vlgmr.msra.gmra.mxu1 %vm1251_vm1, %v7694_v14 }
0x1001   : > { %6059 = vmatprep.mubr.msk.bf16.mxu1 %vm6997_vm0, %v6996_v4 }
0x100f   : > { %v3419_v18 = vpop.f32.mrf.mxu1 }
0x1010   : > { %v3420_v19 = vadd.f32 %v5469_v17, %v3419_v18 }
0x1011   : > { %v6037_v21 = vpop.f32.mrf.mxu1 }
0x1012   : > { %v7703_v24 = vpack.c.bf16 %v3420_v19, %v3420_v19 }
0x1013   : > { %v3422_v25 = vpop.f32.mrf.mxu1 }
0x1014   : > { %v3423_v51 = vadd.f32 %v5469_v17, %v3422_v25  ;;  %v3556_v26 = vsel %vm1376_vm2, %v7703_v24, 0 }
0x1015   : > { %v6038_v28 = vpop.f32.mrf.mxu1  ;;  %6052 = vmatpush3.bf16.msra.mxu0 %v3556_v26 }
0x1016   : > { %v7707_v29 = vpack.c.bf16 %v3423_v51, %v3423_v51  ;;  %6063 = vmatprep.subr.bf16.mxu0 %v6996_v4 }
0x1018   : > { %v3602_v31 = vsel %vm1376_vm2, %v7707_v29, 0 }
0x1019   : > { %6058 = vmatpush3.bf16.msra.mxu1 %v3602_v31 }
0x101a   : > { %6069 = vmatprep.subr.bf16.mxu1 %v6996_v4 }
0x10bc   : > { %v3472_v32 = vpop.f32.mrf.mxu0 }
0x10bd   : > { %v3524_v34 = vmul.f32 0.17677669, %v3472_v32 }
0x10be   : > { %v6043_v36 = vpop.f32.mrf.mxu0 }
0x10bf   : > { %v3526_v39 = vadd.f32 %v3524_v34, %v7420_v30 }
0x10c0   : > { %v3475_v40 = vpop.f32.mrf.mxu0  ;;  %v3518_v41 = vpop.f32.mrf.mxu1 }
0x10c1   : > { %v3525_v58 = vmul.f32 0.17677669, %v3518_v41  ;;  %v3528_v42 = vsel %vm1348_vm4, %v3526_v39, -inf }
0x10c2   : > { %3529 = vmax.xlane.f32.xlu1 %v3528_v42  ;;  %v6044_v7 = vpop.f32.mrf.mxu0  ;;  %v6049_v22 = vpop.f32.mrf.mxu1 }
0x10c3   : > { %v3527_v23 = vadd.f32 %v3525_v58, %v7420_v30 }
0x10c4   : > { %v3521_v43 = vpop.f32.mrf.mxu1 }
0x10c5   : > { %v3531_v44 = vsel %vm1348_vm4, %v3527_v23, -inf }
0x10c6   : > { %3532 = vmax.xlane.f32.xlu0 %v3531_v44  ;;  %v6050_v45 = vpop.f32.mrf.mxu1 }
0x10d3   : > { %3648 = vrot.lane.b32.xlu1 %v7675_v59, %s6999_s8 }
0x114b   : > { %v3530_v46 = vpop.xlane.xlu1 %3529 }
0x114c   : > { %v3534_v20 = vsub.f32 %v3526_v39, %v3530_v46 }
0x114e   : > { %v3536_v48 = vmul.f32 1.442695, %v3534_v20 }
0x114f   : > { %v3533_v50 = vpop.xlane.xlu0 %3532  ;;  %v3649_v56 = vpop.permute.xlu1 %3648 }
0x1150   : > { %6608 = vpow2.f32 %v3536_v48  ;;  %v3535_v52 = vsub.f32 %v3527_v23, %v3533_v50  ;;  %v3654_v63 = vsel %vm1251_vm1, %v3649_v56, 0 }
0x1152   : > { %v3538_v54 = vmul.f32 1.442695, %v3535_v52 }
0x1154   : > { %6610 = vpow2.f32 %v3538_v54 }
0x115d   : > { %v6609_v12 = vpop.eup %6608 }
0x115e   : > { %v3540_v55 = vsel %vm1348_vm4, %v6609_v12, 0.0 }
0x115f   : > { %3541 = vadd.xlane.f32.xlu1 %v3540_v55 }
0x1161   : > { %v6611_v35 = vpop.eup %6610 }
0x1162   : > { %v3543_v11 = vsel %vm1348_vm4, %v6611_v35, 0.0 }
0x1163   : > { %3544 = vadd.xlane.f32.xlu0 %v3543_v11 }
0x1170   : > { %3645 = vrot.lane.b32.xlu1 %v7687_v10, %s6999_s8 }
0x1174   : > { %3697 = vrot.lane.b32.xlu1 %v7694_v14, %s6999_s8 }
0x1179   : > { %3700 = vrot.lane.b32.xlu0 %v7682_v6, %s6999_s8 }
0x11e8   : > { %v3542_v57 = vpop.xlane.xlu1 %3541 }
0x11e9   : > { %6612 = vrcp.f32 %v3542_v57 }
0x11ec   : > { %v3545_v9 = vpop.xlane.xlu0 %3544  ;;  %v3646_v8 = vpop.permute.xlu1 %3645 }
0x11ed   : > { %6614 = vrcp.f32 %v3545_v9 }
0x11f0   : > { %v3701_v2 = vpop.permute.xlu0 %3700  ;;  %v3698_v13 = vpop.permute.xlu1 %3697 }
0x11f1   : > { %v3706_v5 = vsel %vm1251_vm1, %v3701_v2, 0 }
0x11f6   : > { %v6613_v16 = vpop.eup %6612 }
0x11f7   : > { %v3548_v60 = vmul.f32 %v6613_v16, %v6609_v12 }
0x11f9   : > { %v3550_v61 = vpack.c.bf16 %v3548_v60, %v3548_v60 }
0x11fa   : > { %v6615_v62 = vpop.eup %6614 }
0x11fb   : > { %6054 = vmatmul.mubr.msk.bf16.vlgmr.msra.gmra.mxu0 %vm1348_vm4, %v3550_v61  ;;  %v3549_v0 = vmul.f32 %v6615_v62, %v6611_v35 }
0x11fc   : > { %6064 = vmatpush3.bf16.xpose.msra.mxu0 %v3654_v63  ;;  %6065 = vmatprep.mubr.msk.bf16.mxu0 %vm6997_vm0, %v6996_v4 }
0x11fd   : > { %v3551_v3 = vpack.c.bf16 %v3549_v0, %v3549_v0  ;;  %6075 = vmatprep.subr.bf16.mxu0 %v6996_v4 }
0x11ff   : > { %6060 = vmatmul.mubr.msk.bf16.vlgmr.msra.gmra.mxu1 %vm1348_vm4, %v3551_v3 }
0x1200   : > { %6070 = vmatpush3.bf16.xpose.msra.mxu1 %v3706_v5  ;;  %6071 = vmatprep.mubr.msk.bf16.mxu1 %vm6997_vm0, %v6996_v4 }
0x1201   : > { %6081 = vmatprep.subr.bf16.mxu1 %v6996_v4 }
0x1203   : > { %6066 = vmatmul.mubr.msk.bf16.vlgmr.msra.gmra.mxu0 %vm1251_vm1, %v3646_v8 }
0x1204   : > { %6077 = vmatprep.mubr.msk.bf16.mxu0 %vm6997_vm0, %v6996_v4 }
0x1207   : > { %6072 = vmatmul.mubr.msk.bf16.vlgmr.msra.gmra.mxu1 %vm1251_vm1, %v3698_v13 }
0x1208   : > { %6083 = vmatprep.mubr.msk.bf16.mxu1 %vm6997_vm0, %v6996_v4 }
0x12bb   : > { %v7743_v17 = vpop.f32.mrf.mxu0 }
0x12bd   : > { %v6055_v18 = vpop.f32.mrf.mxu0 }
0x12bf   : > { %v3595_v19 = vpop.f32.mrf.mxu0  ;;  %v7745_v21 = vpop.f32.mrf.mxu1 }
0x12c1   : > { %v6056_v25 = vpop.f32.mrf.mxu0  ;;  %v6061_v51 = vpop.f32.mrf.mxu1 }
0x12c3   : > { %v3641_v26 = vpop.f32.mrf.mxu1  ;;  %v3690_v28 = vpop.f32.mrf.mxu0 }
0x12c4   : > { %v3748_v31 = vmul.f32 0.17677669, %v3690_v28 }
0x12c5   : > { %v6062_v32 = vpop.f32.mrf.mxu1  ;;  %v6067_v34 = vpop.f32.mrf.mxu0 }
0x12c6   : > { %v3750_v36 = vadd.f32 %v3748_v31, %v7420_v30 }
0x12c7   : > { %v3693_v39 = vpop.f32.mrf.mxu0  ;;  %v3742_v40 = vpop.f32.mrf.mxu1 }
0x12c8   : > { %v3749_v41 = vmul.f32 0.17677669, %v3742_v40  ;;  %v3752_v58 = vsel %vm1348_vm4, %v3750_v36, -inf }
0x12c9   : > { %3753 = vmax.xlane.f32.xlu1 %v3752_v58  ;;  %v6068_v42 = vpop.f32.mrf.mxu0  ;;  %v6073_v7 = vpop.f32.mrf.mxu1 }
0x12ca   : > { %v3751_v22 = vadd.f32 %v3749_v41, %v7420_v30 }
0x12cb   : > { %v3745_v23 = vpop.f32.mrf.mxu1 }
0x12cc   : > { %v3755_v43 = vsel %vm1348_vm4, %v3751_v22, -inf }
0x12cd   : > { %3756 = vmax.xlane.f32.xlu0 %v3755_v43  ;;  %v6074_v44 = vpop.f32.mrf.mxu1 }
0x12da   : > { %3777 = vrot.lane.b32.xlu1 %v7703_v24, %s6999_s8 }
0x12de   : > { %3876 = vrot.lane.b32.xlu1 %v7675_v59, %s7000_s23 }
0x12e2   : > { %3926 = vrot.lane.b32.xlu1 %v7682_v6, %s7000_s23 }
0x12e6   : > { %3874 = vrot.lane.b32.xlu1 %v7687_v10, %s7000_s23 }
0x1352   : > { %v3754_v45 = vpop.xlane.xlu1 %3753 }
0x1353   : > { %v3758_v46 = vsub.f32 %v3750_v36, %v3754_v45 }
0x1355   : > { %v3760_v20 = vmul.f32 1.442695, %v3758_v46 }
0x1356   : > { %v3778_v48 = vpop.permute.xlu1 %3777  ;;  %v3757_v50 = vpop.xlane.xlu0 %3756 }
0x1357   : > { %6616 = vpow2.f32 %v3760_v20  ;;  %v3783_v52 = vsel %vm1376_vm2, %v3778_v48, 0  ;;  %v3759_v54 = vsub.f32 %v3751_v22, %v3757_v50 }
0x1358   : > { %6076 = vmatpush3.bf16.msra.mxu0 %v3783_v52 }
0x1359   : > { %v3762_v12 = vmul.f32 1.442695, %v3759_v54  ;;  %6087 = vmatprep.subr.bf16.mxu0 %v6996_v4 }
0x135a   : > { %v3877_v62 = vpop.permute.xlu1 %3876 }
0x135b   : > { %6618 = vpow2.f32 %v3762_v12  ;;  %v3882_v3 = vsel %vm1251_vm1, %v3877_v62, 0 }
0x135e   : > { %v3927_v8 = vpop.permute.xlu1 %3926 }
0x135f   : > { %v3932_v18 = vsel %vm1251_vm1, %v3927_v8, 0 }
0x1362   : > { %v3875_v19 = vpop.permute.xlu1 %3874 }
0x1364   : > { %v6617_v55 = vpop.eup %6616 }
0x1365   : > { %v3764_v35 = vsel %vm1348_vm4, %v6617_v55, 0.0 }
0x1366   : > { %3765 = vadd.xlane.f32.xlu0 %v3764_v35 }
0x1368   : > { %v6619_v11 = vpop.eup %6618 }
0x1369   : > { %v3767_v56 = vsel %vm1348_vm4, %v6619_v11, 0.0 }
0x136a   : > { %3768 = vadd.xlane.f32.xlu0 %v3767_v56 }
0x1380   : > { %3826 = vrot.lane.b32.xlu0 %v7707_v29, %s6999_s8 }
0x1384   : > { %3924 = vrot.lane.b32.xlu0 %v7694_v14, %s7000_s23 }
0x13ef   : > { %v3766_v57 = vpop.xlane.xlu0 %3765 }
0x13f0   : > { %6620 = vrcp.f32 %v3766_v57 }
0x13f3   : > { %v3769_v9 = vpop.xlane.xlu0 %3768 }
0x13f4   : > { %6622 = vrcp.f32 %v3769_v9 }
0x13f7   : > { %v3827_v16 = vpop.permute.xlu0 %3826 }
0x13f8   : > { %v3832_v60 = vsel %vm1376_vm2, %v3827_v16, 0 }
0x13f9   : > { %6082 = vmatpush3.bf16.msra.mxu1 %v3832_v60 }
0x13fa   : > { %6093 = vmatprep.subr.bf16.mxu1 %v6996_v4 }
0x13fb   : > { %v3925_v25 = vpop.permute.xlu0 %3924 }
0x13fd   : > { %v6621_v61 = vpop.eup %6620 }
0x13fe   : > { %v3772_v63 = vmul.f32 %v6621_v61, %v6617_v55 }
0x1400   : > { %v3774_v0 = vpack.c.bf16 %v3772_v63, %v3772_v63 }
0x1401   : > { %v6623_v2 = vpop.eup %6622 }
0x1402   : > { %6078 = vmatmul.mubr.msk.bf16.vlgmr.msra.gmra.mxu0 %vm1348_vm4, %v3774_v0  ;;  %v3773_v5 = vmul.f32 %v6623_v2, %v6619_v11 }
0x1403   : > { %6088 = vmatpush3.bf16.xpose.msra.mxu0 %v3882_v3  ;;  %6089 = vmatprep.mubr.msk.bf16.mxu0 %vm6997_vm0, %v6996_v4 }
0x1404   : > { %v3775_v13 = vpack.c.bf16 %v3773_v5, %v3773_v5  ;;  %6099 = vmatprep.subr.bf16.mxu0 %v6996_v4 }
0x1406   : > { %6084 = vmatmul.mubr.msk.bf16.vlgmr.msra.gmra.mxu1 %vm1348_vm4, %v3775_v13 }
0x1407   : > { %6094 = vmatpush3.bf16.xpose.msra.mxu1 %v3932_v18  ;;  %6095 = vmatprep.mubr.msk.bf16.mxu1 %vm6997_vm0, %v6996_v4 }
0x1408   : > { %6105 = vmatprep.subr.bf16.mxu1 %v6996_v4 }
0x140a   : > { %6090 = vmatmul.mubr.msk.bf16.vlgmr.msra.gmra.mxu0 %vm1251_vm1, %v3875_v19 }
0x140b   : > { %6101 = vmatprep.mubr.msk.bf16.mxu0 %vm6997_vm0, %v6996_v4 }
0x140e   : > { %6096 = vmatmul.mubr.msk.bf16.vlgmr.msra.gmra.mxu1 %vm1251_vm1, %v3925_v25 }
0x140f   : > { %6107 = vmatprep.mubr.msk.bf16.mxu1 %vm6997_vm0, %v6996_v4 }
0x14c2   : > { %v7785_v51 = vpop.f32.mrf.mxu0 }
0x14c4   : > { %v6079_v26 = vpop.f32.mrf.mxu0 }
0x14c6   : > { %v3822_v28 = vpop.f32.mrf.mxu0  ;;  %v7787_v31 = vpop.f32.mrf.mxu1 }
0x14c7   : > { %v6313_v32 = vpack.i.bf16 %v7787_v31, %v7785_v51 }
0x14c8   : > { %v6080_v34 = vpop.f32.mrf.mxu0  ;;  %v6085_v36 = vpop.f32.mrf.mxu1 }
0x14ca   : > { %v3871_v39 = vpop.f32.mrf.mxu1  ;;  %v3918_v40 = vpop.f32.mrf.mxu0 }
0x14cb   : > { %v3974_v41 = vmul.f32 0.17677669, %v3918_v40 }
0x14cc   : > { %v6086_v58 = vpop.f32.mrf.mxu1  ;;  %v6091_v42 = vpop.f32.mrf.mxu0 }
0x14cd   : > { %v3976_v7 = vadd.f32 %v3974_v41, %v7420_v30 }
0x14ce   : > { %v3921_v22 = vpop.f32.mrf.mxu0  ;;  %v3968_v23 = vpop.f32.mrf.mxu1 }
0x14cf   : > { %v3975_v43 = vmul.f32 0.17677669, %v3968_v23  ;;  %v3978_v44 = vsel %vm1348_vm4, %v3976_v7, -inf }
0x14d0   : > { %3979 = vmax.xlane.f32.xlu1 %v3978_v44  ;;  %v6092_v45 = vpop.f32.mrf.mxu0  ;;  %v6097_v46 = vpop.f32.mrf.mxu1 }
0x14d1   : > { %v3977_v20 = vadd.f32 %v3975_v43, %v7420_v30 }
0x14d2   : > { %v3971_v48 = vpop.f32.mrf.mxu1 }
0x14d3   : > { %v3981_v50 = vsel %vm1348_vm4, %v3977_v20, -inf }
0x14d4   : > { %3982 = vmax.xlane.f32.xlu0 %v3981_v50  ;;  %v6098_v52 = vpop.f32.mrf.mxu1 }
0x14e1   : > { %4002 = vrot.lane.b32.xlu1 %v7703_v24, %s7000_s23 }
0x14e5   : > { %4100 = vrot.lane.b32.xlu1 %v7675_v59, %s7001_s16 }
0x14e9   : > { %4150 = vrot.lane.b32.xlu1 %v7682_v6, %s7001_s16 }
0x14ed   : > { %4098 = vrot.lane.b32.xlu1 %v7687_v10, %s7001_s16 }
0x1559   : > { %v3980_v54 = vpop.xlane.xlu1 %3979 }
0x155a   : > { %v3984_v12 = vsub.f32 %v3976_v7, %v3980_v54 }
0x155c   : > { %v3986_v55 = vmul.f32 1.442695, %v3984_v12 }
0x155d   : > { %v4003_v35 = vpop.permute.xlu1 %4002  ;;  %v3983_v11 = vpop.xlane.xlu0 %3982 }
0x155e   : > { %6624 = vpow2.f32 %v3986_v55  ;;  %v4008_v56 = vsel %vm1376_vm2, %v4003_v35, 0  ;;  %v3985_v57 = vsub.f32 %v3977_v20, %v3983_v11 }
0x155f   : > { %6100 = vmatpush3.bf16.msra.mxu0 %v4008_v56 }
0x1560   : > { %v3988_v9 = vmul.f32 1.442695, %v3985_v57  ;;  %6111 = vmatprep.subr.bf16.mxu0 %v6996_v4 }
0x1561   : > { %v4101_v2 = vpop.permute.xlu1 %4100 }
0x1562   : > { %6626 = vpow2.f32 %v3988_v9  ;;  %v4106_v13 = vsel %vm1251_vm1, %v4101_v2, 0 }
0x1565   : > { %v4151_v18 = vpop.permute.xlu1 %4150 }
0x1566   : > { %v4156_v25 = vsel %vm1251_vm1, %v4151_v18, 0  ;;  %v6469_v18 = vld [vmem:[#allocation14 + $0x1c4] ss:$16 sps:$4 sm:$0xff]  }
0x1569   : > { %v4099_v26 = vpop.permute.xlu1 %4098 }
0x156b   : > { %v6625_v59 = vpop.eup %6624 }
0x156c   : > { %v3990_v6 = vsel %vm1348_vm4, %v6625_v59, 0.0 }
0x156d   : > { %3991 = vadd.xlane.f32.xlu0 %v3990_v6 }
0x156f   : > { %v6627_v16 = vpop.eup %6626 }
0x1570   : > { %v3993_v10 = vsel %vm1348_vm4, %v6627_v16, 0.0 }
0x1571   : > { %3994 = vadd.xlane.f32.xlu0 %v3993_v10 }
0x1587   : > { %4050 = vrot.lane.b32.xlu0 %v7707_v29, %s7000_s23 }
0x158b   : > { %4148 = vrot.lane.b32.xlu0 %v7694_v14, %s7001_s16 }
0x15f6   : > { %v3992_v60 = vpop.xlane.xlu0 %3991 }
0x15f7   : > { %6628 = vrcp.f32 %v3992_v60 }
0x15fa   : > { %v3995_v61 = vpop.xlane.xlu0 %3994 }
0x15fb   : > { %6630 = vrcp.f32 %v3995_v61 }
0x15fe   : > { %v4051_v62 = vpop.permute.xlu0 %4050 }
0x15ff   : > { %v4056_v63 = vsel %vm1376_vm2, %v4051_v62, 0  ;;  %v6466_v62 = vld [vmem:[#allocation14 + $0x1e4] ss:$16 sps:$4 sm:$0xff]  }
0x1600   : > { %6106 = vmatpush3.bf16.msra.mxu1 %v4056_v63 }
0x1601   : > { %6117 = vmatprep.subr.bf16.mxu1 %v6996_v4 }
0x1602   : > { %v4149_v28 = vpop.permute.xlu0 %4148 }
0x1604   : > { %v6629_v0 = vpop.eup %6628 }
0x1605   : > { %v3998_v3 = vmul.f32 %v6629_v0, %v6625_v59 }
0x1607   : > { %v4000_v5 = vpack.c.bf16 %v3998_v3, %v3998_v3 }
0x1608   : > { %v6631_v8 = vpop.eup %6630 }
0x1609   : > { %6102 = vmatmul.mubr.msk.bf16.vlgmr.msra.gmra.mxu0 %vm1348_vm4, %v4000_v5  ;;  %v3999_v14 = vmul.f32 %v6631_v8, %v6627_v16 }
0x160a   : > { %6112 = vmatpush3.bf16.xpose.msra.mxu0 %v4106_v13  ;;  %6113 = vmatprep.mubr.msk.bf16.mxu0 %vm6997_vm0, %v6996_v4 }
0x160b   : > { %v4001_v19 = vpack.c.bf16 %v3999_v14, %v3999_v14  ;;  %6123 = vmatprep.subr.bf16.mxu0 %v6996_v4  ;;  %v6464_v14 = vld [vmem:[#allocation14 + $0x1e0] ss:$16 sps:$4 sm:$0xff]  }
0x160d   : > { %6108 = vmatmul.mubr.msk.bf16.vlgmr.msra.gmra.mxu1 %vm1348_vm4, %v4001_v19  ;;  %v6467_v19 = vld [vmem:[#allocation14 + $0x1c0] ss:$16 sps:$4 sm:$0xff]  }
0x160e   : > { %6118 = vmatpush3.bf16.xpose.msra.mxu1 %v4156_v25  ;;  %6119 = vmatprep.mubr.msk.bf16.mxu1 %vm6997_vm0, %v6996_v4  ;;  %v6472_v25 = vld [vmem:[#allocation14 + $0x1a4] ss:$16 sps:$4 sm:$0xff]  }
0x160f   : > { %6129 = vmatprep.subr.bf16.mxu1 %v6996_v4 }
0x1611   : > { %6114 = vmatmul.mubr.msk.bf16.vlgmr.msra.gmra.mxu0 %vm1251_vm1, %v4099_v26  ;;  %v6470_v26 = vld [vmem:[#allocation14 + $0x1a0] ss:$16 sps:$4 sm:$0xff]  }
0x1612   : > { %6125 = vmatprep.mubr.msk.bf16.mxu0 %vm6997_vm0, %v6996_v4 }
0x1615   : > { %6120 = vmatmul.mubr.msk.bf16.vlgmr.msra.gmra.mxu1 %vm1251_vm1, %v4149_v28  ;;  %v6475_v28 = vld [vmem:[#allocation14 + $0x184] ss:$16 sps:$4 sm:$0xff]  }
0x1616   : > { %6131 = vmatprep.mubr.msk.bf16.mxu1 %vm6997_vm0, %v6996_v4 }
0x16c9   : > { %v4044_v34 = vpop.f32.mrf.mxu0 }
0x16cb   : > { %v6103_v36 = vpop.f32.mrf.mxu0 }
0x16cc   : > { %v6478_v36 = vld [vmem:[#allocation14 + $0x164] ss:$16 sps:$4 sm:$0xff]  }
0x16cd   : > { %v4047_v39 = vpop.f32.mrf.mxu0  ;;  %v4092_v40 = vpop.f32.mrf.mxu1 }
0x16ce   : > { %v6318_v11 = vpack.i.bf16 %v4092_v40, %v4044_v34  ;;  %v6473_v34 = vld [vmem:[#allocation14 + $0x180] ss:$16 sps:$4 sm:$0xff]   ;;  %v6481_v40 = vld [vmem:[#allocation14 + $0x144] ss:$16 sps:$4 sm:$0xff]  }
0x16cf   : > { %v6104_v41 = vpop.f32.mrf.mxu0  ;;  %v6109_v58 = vpop.f32.mrf.mxu1  ;;  %v6476_v39 = vld [vmem:[#allocation14 + $0x160] ss:$16 sps:$4 sm:$0xff]  }
0x16d0   : > { %v6479_v41 = vld [vmem:[#allocation14 + $0x140] ss:$16 sps:$4 sm:$0xff]   ;;  %v6484_v58 = vld [vmem:[#allocation14 + $0x124] ss:$16 sps:$4 sm:$0xff]  }
0x16d1   : > { %v4095_v42 = vpop.f32.mrf.mxu1  ;;  %v4142_v7 = vpop.f32.mrf.mxu0 }
0x16d2   : > { %v4198_v22 = vmul.f32 0.17677669, %v4142_v7  ;;  %v6482_v42 = vld [vmem:[#allocation14 + $0x120] ss:$16 sps:$4 sm:$0xff]   ;;  %v6487_v7 = vld [vmem:[#allocation14 + $0x104] ss:$16 sps:$4 sm:$0xff]  }
0x16d3   : > { %v6110_v23 = vpop.f32.mrf.mxu1  ;;  %v6115_v43 = vpop.f32.mrf.mxu0 }
0x16d4   : > { %v4200_v44 = vadd.f32 %v4198_v22, %v7420_v30  ;;  %v6485_v22 = vld [vmem:[#allocation14 + $0x100] ss:$16 sps:$4 sm:$0xff]   ;;  %v6488_v23 = vld [vmem:[#allocation16 + $0x178] sm:$0xff]  }
0x16d5   : > { %v4145_v45 = vpop.f32.mrf.mxu0  ;;  %v4192_v46 = vpop.f32.mrf.mxu1  ;;  %v6489_v43 = vld [vmem:[#allocation16 + $0x138] sm:$0xff]  }
0x16d6   : > { %v4199_v20 = vmul.f32 0.17677669, %v4192_v46  ;;  %v4202_v48 = vsel %vm1348_vm4, %v4200_v44, -inf  ;;  %v6491_v45 = vld [vmem:[#allocation16 + $0x130] sm:$0xff]   ;;  %v6492_v46 = vld [vmem:[#allocation16 + $0x168] sm:$0xff]  }
0x16d7   : > { %4203 = vmax.xlane.f32.xlu1 %v4202_v48  ;;  %v6116_v50 = vpop.f32.mrf.mxu0  ;;  %v6121_v52 = vpop.f32.mrf.mxu1  ;;  %v6494_v48 = vld [vmem:[#allocation16 + $0x160] sm:$0xff]  }
0x16d8   : > { %v4201_v54 = vadd.f32 %v4199_v20, %v7420_v30  ;;  %v6493_v20 = vld [vmem:[#allocation16 + $0x128] sm:$0xff]   ;;  %v6495_v50 = vld [vmem:[#allocation16 + $0x120] sm:$0xff]   ;;  %v6496_v52 = vld [vmem:[#allocation16 + $0x158] sm:$0xff]  }
0x16d9   : > { %v4195_v12 = vpop.f32.mrf.mxu1 }
0x16da   : > { %v4205_v55 = vsel %vm1348_vm4, %v4201_v54, -inf  ;;  %v6498_v12 = vld [vmem:[#allocation16 + $0x150] sm:$0xff]  }
0x16db   : > { %4206 = vmax.xlane.f32.xlu0 %v4205_v55  ;;  %v6122_v35 = vpop.f32.mrf.mxu1  ;;  %v6499_v55 = vld [vmem:[#allocation16 + $0x110] sm:$0xff]  }
0x16dc   : > { %v6500_v35 = vld [vmem:[#allocation16 + $0x148] sm:$0xff]  }
0x16e8   : > { %4226 = vrot.lane.b32.xlu1 %v7703_v24, %s7001_s16 }
0x16ec   : > { %6314 = vrot.lane.b32.xlu1 %v6313_v32, %s7001_s16 }
0x16f0   : > { %6319 = vrot.lane.b32.xlu1 %v6318_v11, %s7000_s23  ;;  %v6501_v11 = vld [vmem:[#allocation16 + $0x108] sm:$0xff]   ;;  %s6898_s23 = scalar_lea.vmem %s7916_s1, 256 }
0x16f1   : > { %p6899_p8 = scmp.ne.s32.totalorder %s7916_s1, %s6898_s23 }
0x16f3   : > { %p6900_p10 = pnand %p6899_p8, %p8041_p5 }
0x16f5   : > { %p6901_p11 = pneg %p6900_p10 }
0x1760   : > { %v4204_v56 = vpop.xlane.xlu1 %4203 }
0x1761   : > { %v4208_v57 = vsub.f32 %v4200_v44, %v4204_v56  ;;  %v6490_v44 = vld [vmem:[#allocation16 + $0x170] sm:$0xff]   ;;  %v6502_v56 = vld [vmem:[#allocation16 + $0x140] sm:$0xff]  }
0x1763   : > { %v4210_v9 = vmul.f32 1.442695, %v4208_v57  ;;  %v6503_v57 = vld [vmem:[#allocation16 + $0x100] sm:$0xff]  }
0x1764   : > { %v4227_v30 = vpop.permute.xlu1 %4226  ;;  %v4207_v59 = vpop.xlane.xlu0 %4206 }
0x1765   : > { %6632 = vpow2.f32 %v4210_v9  ;;  %v4232_v6 = vsel %vm1376_vm2, %v4227_v30, 0  ;;  %v4209_v16 = vsub.f32 %v4201_v54, %v4207_v59  ;;  %v6497_v54 = vld [vmem:[#allocation16 + $0x118] sm:$0xff]   ;;  %v6505_v30 = vld [vmem:[#allocation13 + $0x70] sm:$0xff]   ;;  %v6506_v59 = vld [vmem:[#allocation13 + $0x68] sm:$0xff]  }
0x1766   : > { %6124 = vmatpush3.bf16.msra.mxu0 %v4232_v6  ;;  %v6504_v9 = vld [vmem:[#allocation13 + $0x78] sm:$0xff]   ;;  %v6507_v6 = vld [vmem:[#allocation13 + $0x60] sm:$0xff]  }
0x1767   : > { %v4212_v10 = vmul.f32 1.442695, %v4209_v16  ;;  %6135 = vmatprep.subr.bf16.mxu0 %v6996_v4  ;;  %v6508_v16 = vld [vmem:[#allocation13 + $0x58] sm:$0xff]  }
0x1769   : > { %6634 = vpow2.f32 %v4212_v10  ;;  %v6509_v10 = vld [vmem:[#allocation13 + $0x50] sm:$0xff]  }
0x1772   : > { %v6633_v24 = vpop.eup %6632 }
0x1773   : > { %v4214_v51 = vsel %vm1348_vm4, %v6633_v24, 0.0 }
0x1774   : > { %4215 = vadd.xlane.f32.xlu0 %v4214_v51  ;;  %v6511_v51 = vld [vmem:[#allocation13 + $0x40] sm:$0xff]  }
0x1776   : > { %v6635_v31 = vpop.eup %6634 }
0x1777   : > { %v4217_v32 = vsel %vm1348_vm4, %v6635_v31, 0.0 }
0x1778   : > { %4218 = vadd.xlane.f32.xlu0 %v4217_v32 }
0x178e   : > { %4274 = vrot.lane.b32.xlu0 %v7707_v29, %s7001_s16  ;;  %s8039_s16 = sld [smem:[#allocation36_spill]] }
0x17fd   : > { %v4216_v60 = vpop.xlane.xlu0 %4215 }
0x17fe   : > { %6636 = vrcp.f32 %v4216_v60 }
0x1801   : > { %v4219_v61 = vpop.xlane.xlu0 %4218 }
0x1802   : > { %6638 = vrcp.f32 %v4219_v61 }
0x1805   : > { %v4275_v63 = vpop.permute.xlu0 %4274 }
0x1806   : > { %v4280_v0 = vsel %vm1376_vm2, %v4275_v63, 0 }
0x1807   : > { %6130 = vmatpush3.bf16.msra.mxu1 %v4280_v0 }
0x1808   : > { %4646 = vmatprep.subr.bf16.mxu1 %v6466_v62 }
0x180b   : > { %v6637_v2 = vpop.eup %6636 }
0x180c   : > { %v4222_v3 = vmul.f32 %v6637_v2, %v6633_v24  ;;  %v6510_v24 = vld [vmem:[#allocation13 + $0x48] sm:$0xff]  }
0x180e   : > { %v4224_v5 = vpack.c.bf16 %v4222_v3, %v4222_v3 }
0x180f   : > { %v6639_v8 = vpop.eup %6638 }
0x1810   : > { %6126 = vmatmul.mubr.msk.bf16.vlgmr.msra.gmra.mxu0 %vm1348_vm4, %v4224_v5  ;;  %v4223_v13 = vmul.f32 %v6639_v8, %v6635_v31  ;;  %v6514_v31 = vld [vmem:[#allocation14 + $0x1ec] ss:$16 sps:$4 sm:$0xff]   ;;  %v7864_v8 = vld [vmem:[%s7973_s14 + $0x4] sm:$0xf] }
0x1811   : > { %6151 = vmatprep.mubr.msk.bf16.mxu0 %vm6997_vm0, %v6996_v4  ;;  %6136 = vmatpush3.bf16.msra.mxu0 %v6504_v9 }
0x1812   : > { %v4225_v29 = vpack.c.bf16 %v4223_v13, %v4223_v13  ;;  %6137 = vmatprep.subr.bf16.mxu0 %v6996_v4  ;;  %v4473_v13 = vrot.slane %v7864_v8, %v2296_v15 }
0x1814   : > { %6132 = vmatmul.mubr.msk.bf16.vlgmr.msra.gmra.mxu1 %vm1348_vm4, %v4225_v29 }
0x1815   : > { %4647 = vmatpush1.bf16.msra.mxu1 %v6464_v14  ;;  %4678 = vmatprep.mubr.bf16.mxu1 %v7002_v53 }
0x1816   : > { %4648 = vmatprep.subr.bf16.mxu1 %v6469_v18  ;;  %6138 = vmatpush3.bf16.msra.mxu0 %v6505_v30 }
0x1817   : > { %6139 = vmatprep.subr.bf16.mxu0 %v6996_v4 }
0x1819   : > { %4649 = vmatpush1.bf16.msra.mxu1 %v6467_v19 }
0x181a   : > { %4650 = vmatprep.subr.bf16.mxu1 %v6472_v25  ;;  %6140 = vmatpush3.bf16.msra.mxu0 %v6506_v59 }
0x181b   : > { %6141 = vmatprep.subr.bf16.mxu0 %v6996_v4 }
0x181d   : > { %4651 = vmatpush1.bf16.msra.mxu1 %v6470_v26 }
0x181e   : > { %4652 = vmatprep.subr.bf16.mxu1 %v6475_v28  ;;  %6142 = vmatpush3.bf16.msra.mxu0 %v6507_v6 }
0x181f   : > { %6143 = vmatprep.subr.bf16.mxu0 %v6996_v4 }
0x1821   : > { %4653 = vmatpush1.bf16.msra.mxu1 %v6473_v34 }
0x1822   : > { %4654 = vmatprep.subr.bf16.mxu1 %v6478_v36  ;;  %6144 = vmatpush3.bf16.msra.mxu0 %v6508_v16 }
0x1823   : > { %6145 = vmatprep.subr.bf16.mxu0 %v6996_v4 }
0x1825   : > { %4655 = vmatpush1.bf16.msra.mxu1 %v6476_v39 }
0x1826   : > { %4656 = vmatprep.subr.bf16.mxu1 %v6481_v40  ;;  %6146 = vmatpush3.bf16.msra.mxu0 %v6509_v10 }
0x1827   : > { %6147 = vmatprep.subr.bf16.mxu0 %v6996_v4 }
0x1829   : > { %4657 = vmatpush1.bf16.msra.mxu1 %v6479_v41 }
0x182a   : > { %4658 = vmatprep.subr.bf16.mxu1 %v6484_v58  ;;  %6148 = vmatpush3.bf16.msra.mxu0 %v6510_v24 }
0x182b   : > { %6149 = vmatprep.subr.bf16.mxu0 %v6996_v4  ;;  %v4469_v4 = vrot.slane %v7864_v8, %v2292_v1 }
0x182d   : > { %4659 = vmatpush1.bf16.msra.mxu1 %v6482_v42 }
0x182e   : > { %4660 = vmatprep.subr.bf16.mxu1 %v6487_v7  ;;  %6150 = vmatpush3.bf16.msra.mxu0 %v6511_v51 }
0x182f   : > { %4689 = vmatprep.subr.bf16.mxu0 %v6514_v31 }
0x1831   : > { %4661 = vmatpush1.bf16.msra.mxu1 %v6485_v22 }
0x1832   : > { %5759 = vmatprep.subr.bf16.mxu1 %v6488_v23 }
0x1834   : > { %4679 = vmatmul.mubr.bf16.vlgmr.msra.gmra.mxu1 %v7659_v47 }
0x1835   : > { %5760 = vmatpush3.bf16.msra.mxu1 %v6489_v43 }
0x1836   : > { %5761 = vmatprep.subr.bf16.mxu1 %v6490_v44 }
0x1839   : > { %5762 = vmatpush3.bf16.msra.mxu1 %v6491_v45 }
0x183a   : > { %5763 = vmatprep.subr.bf16.mxu1 %v6492_v46 }
0x183d   : > { %5764 = vmatpush3.bf16.msra.mxu1 %v6493_v20 }
0x183e   : > { %5765 = vmatprep.subr.bf16.mxu1 %v6494_v48 }
0x1841   : > { %5766 = vmatpush3.bf16.msra.mxu1 %v6495_v50 }
0x1842   : > { %5767 = vmatprep.subr.bf16.mxu1 %v6496_v52 }
0x1845   : > { %5768 = vmatpush3.bf16.msra.mxu1 %v6497_v54 }
0x1846   : > { %5769 = vmatprep.subr.bf16.mxu1 %v6498_v12 }
0x1849   : > { %5770 = vmatpush3.bf16.msra.mxu1 %v6499_v55 }
0x184a   : > { %5771 = vmatprep.subr.bf16.mxu1 %v6500_v35 }
0x184d   : > { %5772 = vmatpush3.bf16.msra.mxu1 %v6501_v11 }
0x184e   : > { %5773 = vmatprep.subr.bf16.mxu1 %v6502_v56 }
0x1851   : > { %5774 = vmatpush3.bf16.msra.mxu1 %v6503_v57 }
0x18d0   : > { %v4268_v32 = vpop.f32.mrf.mxu0 }
0x18d2   : > { %v6127_v60 = vpop.f32.mrf.mxu0 }
0x18d4   : > { %v4271_v61 = vpop.f32.mrf.mxu0  ;;  %v4316_v62 = vpop.f32.mrf.mxu1 }
0x18d5   : > { %v6323_v63 = vpack.i.bf16 %v4316_v62, %v4268_v32  ;;  %v6315_v62 = vpop.permute.xlu1 %6314 }
0x18d6   : > { %v6128_v0 = vpop.f32.mrf.mxu0  ;;  %v6133_v2 = vpop.f32.mrf.mxu1 }
0x18d7   : > { %6324 = vrot.lane.b32.xlu1 %v6323_v63, %s6999_s8  ;;  %v6317_v0 = vunpack.i.h.bf16 %v6315_v62  ;;  %v6316_v2 = vunpack.i.l.bf16 %v6315_v62  ;;  %s5578_s8 = sshll.u32 %s7127_s2, 8  ;;  %s7003_s2 = smov [#allocation17]  }
0x18d8   : > { %v4319_v3 = vpop.f32.mrf.mxu1  ;;  %s6902_s13 = sshll.u32 %s7003_s2, 4  ;;  %s6903_s13 = int_to_ptr.vmem [resolvable:$false] %s6902_s13 }
0x18d9   : > { %v6320_v63 = vpop.permute.xlu1 %6319  ;;  %p6905_p1 = scmp.lt.s32.totalorder %s7916_s1, %s6903_s13 }
0x18da   : > { %v6134_v5 = vpop.f32.mrf.mxu1  ;;  %v6322_v3 = vunpack.i.h.bf16 %v6320_v63 }
0x18db   : > { %v6321_v5 = vunpack.i.l.bf16 %v6320_v63 }
0x18f4   : > { %v4680_v14 = vpop.f32.mrf.mxu1 }
0x18f5   : > { %v4681_v29 = vadd.f32 %v4680_v14, %v4469_v4  ;;  %v4346_v14 = vsel %vm1251_vm1, %v7743_v17, %v6316_v2  ;;  %v6520_v17 = vld [vmem:[#allocation14 + $0x1ac] ss:$16 sps:$4 sm:$0xff]  }
0x18f6   : > { %v4682_v18 = vpop.f32.mrf.mxu1 }
0x18f7   : > { %v4732_v19 = vmul.f32 %v4681_v29, %v4681_v29  ;;  %v4683_v25 = vadd.f32 %v4682_v18, %v4473_v13 }
0x18f8   : > { %v4684_v26 = vpop.f32.mrf.mxu1 }
0x18f9   : > { %v4740_v28 = vmul.f32 %v4732_v19, %v4681_v29  ;;  %v4733_v34 = vmul.f32 %v4683_v25, %v4683_v25  ;;  %v4685_v36 = vadd.f32 %v4684_v26, %v4469_v4 }
0x18fa   : > { %v4686_v39 = vpop.f32.mrf.mxu1 }
0x18fb   : > { %v4748_v40 = vmul.f32 0.044715, %v4740_v28  ;;  %v4741_v41 = vmul.f32 %v4733_v34, %v4683_v25  ;;  %v4736_v58 = vmul.f32 %v4685_v36, %v4685_v36  ;;  %v4687_v42 = vadd.f32 %v4686_v39, %v4473_v13  ;;  %v6512_v34 = vld [vmem:[#allocation14 + $0x1e8] ss:$16 sps:$4 sm:$0xff]   ;;  %v6517_v39 = vld [vmem:[#allocation14 + $0x1cc] ss:$16 sps:$4 sm:$0xff]  }
0x18fc   : > { %v4347_v13 = vsel %vm1251_vm1, %v7745_v21, %v6317_v0  ;;  %v6518_v21 = vld [vmem:[#allocation14 + $0x1a8] ss:$16 sps:$4 sm:$0xff]  }
0x18fd   : > { %v4756_v7 = vadd.f32 %v4748_v40, %v4681_v29  ;;  %v4749_v1 = vmul.f32 0.044715, %v4741_v41  ;;  %v4744_v22 = vmul.f32 %v4736_v58, %v4685_v36  ;;  %v4737_v23 = vmul.f32 %v4687_v42, %v4687_v42  ;;  %v6515_v40 = vld [vmem:[#allocation14 + $0x1c8] ss:$16 sps:$4 sm:$0xff]   ;;  %v6523_v41 = vld [vmem:[#allocation14 + $0x18c] ss:$16 sps:$4 sm:$0xff]  }
0x18fe   : > { %v6521_v58 = vld [vmem:[#allocation14 + $0x188] ss:$16 sps:$4 sm:$0xff]  }
0x18ff   : > { %v4764_v43 = vmul.f32 0.7978846, %v4756_v7  ;;  %v4757_v15 = vadd.f32 %v4749_v1, %v4683_v25  ;;  %v4752_v44 = vmul.f32 0.044715, %v4744_v22  ;;  %v4745_v45 = vmul.f32 %v4737_v23, %v4687_v42  ;;  %v6524_v7 = vld [vmem:[#allocation14 + $0x168] ss:$16 sps:$4 sm:$0xff]  }
0x1900   : > { %v6529_v1 = vld [vmem:[#allocation14 + $0x14c] ss:$16 sps:$4 sm:$0xff]   ;;  %v6527_v22 = vld [vmem:[#allocation14 + $0x148] ss:$16 sps:$4 sm:$0xff]  }
0x1901   : > { %v4765_v46 = vmul.f32 0.7978846, %v4757_v15  ;;  %v4760_v20 = vadd.f32 %v4752_v44, %v4685_v36  ;;  %v4753_v48 = vmul.f32 0.044715, %v4745_v45  ;;  %6640 = vtanh.f32 %v4764_v43  ;;  %v6532_v23 = vld [vmem:[#allocation14 + $0x12c] ss:$16 sps:$4 sm:$0xff]  }
0x1902   : > { %v6535_v43 = vld [vmem:[#allocation14 + $0x10c] ss:$16 sps:$4 sm:$0xff]   ;;  %v6533_v15 = vld [vmem:[#allocation14 + $0x108] ss:$16 sps:$4 sm:$0xff]  }
0x1903   : > { %6642 = vtanh.f32 %v4765_v46  ;;  %v4768_v50 = vmul.f32 0.7978846, %v4760_v20  ;;  %v4761_v52 = vadd.f32 %v4753_v48, %v4687_v42  ;;  %v6536_v44 = vld [vmem:[#allocation16 + $0x1f8] sm:$0xff]   ;;  %v6538_v46 = vld [vmem:[#allocation16 + $0x1f0] sm:$0xff]   ;;  %v6540_v48 = vld [vmem:[#allocation16 + $0x1e8] sm:$0xff]  }
0x1904   : > { %v6537_v45 = vld [vmem:[#allocation16 + $0x1b8] sm:$0xff]   ;;  %v6539_v20 = vld [vmem:[#allocation16 + $0x1b0] sm:$0xff]  }
0x1905   : > { %6644 = vtanh.f32 %v4768_v50  ;;  %v4769_v54 = vmul.f32 0.7978846, %v4761_v52  ;;  %v6541_v50 = vld [vmem:[#allocation16 + $0x1a8] sm:$0xff]   ;;  %v6542_v52 = vld [vmem:[#allocation16 + $0x1e0] sm:$0xff]  }
0x1907   : > { %6646 = vtanh.f32 %v4769_v54  ;;  %v6543_v54 = vld [vmem:[#allocation16 + $0x1a0] sm:$0xff]  }
0x190e   : > { %v6641_v12 = vpop.eup %6640 }
0x190f   : > { %v4780_v56 = vadd.f32 1.0, %v6641_v12  ;;  %v6544_v12 = vld [vmem:[#allocation16 + $0x1d8] sm:$0xff]  }
0x1910   : > { %v6643_v55 = vpop.eup %6642 }
0x1911   : > { %v4781_v35 = vadd.f32 1.0, %v6643_v55  ;;  %v4788_v16 = vmul.f32 0.5, %v4780_v56  ;;  %v6545_v55 = vld [vmem:[#allocation16 + $0x198] sm:$0xff]   ;;  %v6549_v56 = vld [vmem:[#allocation16 + $0x188] sm:$0xff]  }
0x1912   : > { %v6645_v11 = vpop.eup %6644 }
0x1913   : > { %v4784_v57 = vadd.f32 1.0, %v6645_v11  ;;  %v4789_v6 = vmul.f32 0.5, %v4781_v35  ;;  %v4796_v32 = vmul.f32 %v4788_v16, %v4681_v29  ;;  %v4349_v29 = vsel %vm2170_vm5, %v4347_v13, %v6322_v3  ;;  %v6547_v35 = vld [vmem:[#allocation16 + $0x190] sm:$0xff]   ;;  %v6548_v11 = vld [vmem:[#allocation16 + $0x1c8] sm:$0xff]  }
0x1914   : > { %v6647_v9 = vpop.eup %6646 }
0x1915   : > { %v4792_v30 = vmul.f32 0.5, %v4784_v57  ;;  %v4785_v59 = vadd.f32 1.0, %v6647_v9  ;;  %v4797_v51 = vmul.f32 %v4789_v6, %v4683_v25  ;;  %v4348_v25 = vsel %vm2170_vm5, %v4346_v14, %v6321_v5  ;;  %v6550_v57 = vld [vmem:[#allocation16 + $0x1c0] sm:$0xff]  }
0x1916   : > { %v6551_v9 = vld [vmem:[#allocation16 + $0x180] sm:$0xff]  }
0x1917   : > { %v4793_v10 = vmul.f32 0.5, %v4785_v59  ;;  %v4800_v24 = vmul.f32 %v4792_v30, %v4685_v36 }
0x1919   : > { %v4801_v31 = vmul.f32 %v4793_v10, %v4687_v42  ;;  %v4804_v61 = vpack.c.bf16 %v4800_v24, %v4796_v32  ;;  %v6526_v42 = vld [vmem:[#allocation14 + $0x16c] ss:$16 sps:$4 sm:$0xff]   ;;  %v4477_v10 = vrot.slane %v7864_v8, %v2300_v37  ;;  %v4481_v24 = vrot.slane %v7864_v8, %v2304_v38 }
0x191b   : > { %v4805_v60 = vpack.c.bf16 %v4801_v31, %v4797_v51 }
0x191d   : > { %5038 = vmatprep.mubr.bf16.mxu1 %v4805_v60 }
0x191e   : > { %5039 = vmatmul.mubr.bf16.vlgmr.msra.gmra.mxu1 %v4804_v61 }
0x1949   : > { %v6325_v4 = vpop.permute.xlu1 %6324 }
0x194a   : > { %v6327_v18 = vunpack.i.h.bf16 %v6325_v4  ;;  %v6326_v19 = vunpack.i.l.bf16 %v6325_v4 }
0x194c   : > { %v4351_v26 = vsel %vm2173_vm6, %v4349_v29, %v6327_v18  ;;  %v4350_v28 = vsel %vm2173_vm6, %v4348_v25, %v6326_v19 }
0x194d   : > { %v4352_v36 = vpack.c.bf16 %v4351_v26, %v4350_v28 }
0x194f   : > { %6152 = vmatmul.mubr.bf16.vlgmr.msra.gmra.mxu0 %v4352_v36 }
0x1950   : > { %4690 = vmatpush1.bf16.msra.mxu0 %v6512_v34  ;;  %4721 = vmatprep.mubr.bf16.mxu0 %v7002_v53  ;;  %v6530_v53 = vld [vmem:[#allocation14 + $0x128] ss:$16 sps:$4 sm:$0xff]  }
0x1951   : > { %4691 = vmatprep.subr.bf16.mxu0 %v6517_v39 }
0x1954   : > { %4692 = vmatpush1.bf16.msra.mxu0 %v6515_v40 }
0x1955   : > { %4693 = vmatprep.subr.bf16.mxu0 %v6520_v17 }
0x1958   : > { %4694 = vmatpush1.bf16.msra.mxu0 %v6518_v21 }
0x1959   : > { %4695 = vmatprep.subr.bf16.mxu0 %v6523_v41 }
0x195c   : > { %4696 = vmatpush1.bf16.msra.mxu0 %v6521_v58 }
0x195d   : > { %4697 = vmatprep.subr.bf16.mxu0 %v6526_v42 }
0x1960   : > { %4698 = vmatpush1.bf16.msra.mxu0 %v6524_v7 }
0x1961   : > { %4699 = vmatprep.subr.bf16.mxu0 %v6529_v1 }
0x1964   : > { %4700 = vmatpush1.bf16.msra.mxu0 %v6527_v22 }
0x1965   : > { %4701 = vmatprep.subr.bf16.mxu0 %v6532_v23 }
0x1968   : > { %4702 = vmatpush1.bf16.msra.mxu0 %v6530_v53 }
0x1969   : > { %4703 = vmatprep.subr.bf16.mxu0 %v6535_v43 }
0x196c   : > { %4704 = vmatpush1.bf16.msra.mxu0 %v6533_v15 }
0x196d   : > { %5781 = vmatprep.subr.bf16.mxu0 %v6536_v44 }
0x196f   : > { %4722 = vmatmul.mubr.bf16.vlgmr.msra.gmra.mxu0 %v7659_v47  ;;  %v6546_v47 = vld [vmem:[#allocation16 + $0x1d0] sm:$0xff]  }
0x1970   : > { %5782 = vmatpush3.bf16.msra.mxu0 %v6537_v45 }
0x1971   : > { %5783 = vmatprep.subr.bf16.mxu0 %v6538_v46 }
0x1974   : > { %5784 = vmatpush3.bf16.msra.mxu0 %v6539_v20 }
0x1975   : > { %5785 = vmatprep.subr.bf16.mxu0 %v6540_v48 }
0x1978   : > { %5786 = vmatpush3.bf16.msra.mxu0 %v6541_v50 }
0x1979   : > { %5787 = vmatprep.subr.bf16.mxu0 %v6542_v52 }
0x197c   : > { %5788 = vmatpush3.bf16.msra.mxu0 %v6543_v54 }
0x197d   : > { %5789 = vmatprep.subr.bf16.mxu0 %v6544_v12 }
0x1980   : > { %5790 = vmatpush3.bf16.msra.mxu0 %v6545_v55  ;;  %v5494_v55 = vld [vmem:[%s7971_s12 + $0x1] ss:$0 sm:$0xff] }
0x1981   : > { %5791 = vmatprep.subr.bf16.mxu0 %v6546_v47 }
0x1984   : > { %5792 = vmatpush3.bf16.msra.mxu0 %v6547_v35  ;;  %v5537_v35 = vld [vmem:[%s8037_s22 + $0x1] ss:$0 sm:$0xff] }
0x1985   : > { %5793 = vmatprep.subr.bf16.mxu0 %v6548_v11 }
0x1988   : > { %5794 = vmatpush3.bf16.msra.mxu0 %v6549_v56 }
0x1989   : > { %5795 = vmatprep.subr.bf16.mxu0 %v6550_v57 }
0x198c   : > { %5796 = vmatpush3.bf16.msra.mxu0 %v6551_v9 }
0x19de   : > { %v5775_v52 = vpop.f32.mrf.mxu1 }
0x19e0   : > { %v5776_v54 = vpop.f32.mrf.mxu1 }
0x19e1   : > { %v5777_v47 = vadd.f32 %v5776_v54, %v5775_v52 }
0x19e2   : > { %v5778_v12 = vpop.f32.mrf.mxu1 }
0x19e4   : > { %v5779_v11 = vpop.f32.mrf.mxu1 }
0x1a0f   : > { %v7882_v30 = vpop.f32.mrf.mxu0 }
0x1a10   : > { %v4442_v57 = vadd.f32 %v5494_v55, %v7882_v30 }
0x1a11   : > { %v6153_v59 = vpop.f32.mrf.mxu0 }
0x1a12   : > { %v5041_v59 = vadd.f32 %v5777_v47, %v5537_v35 }
0x1a13   : > { %v7884_v6 = vpop.f32.mrf.mxu0 }
0x1a15   : > { %v6154_v16 = vpop.f32.mrf.mxu0 }
0x1a16   : > { %v5780_v16 = vadd.f32 %v5779_v11, %v5778_v12 }
0x1a2f   : > { %v4723_v51 = vpop.f32.mrf.mxu0 }
0x1a30   : > { %v4724_v31 = vadd.f32 %v4723_v51, %v4477_v10  ;;  %v5088_v51 = vadd.f32 %v4442_v57, %v7625_v49 }
0x1a31   : > { %v4725_v32 = vpop.f32.mrf.mxu0 }
0x1a32   : > { %v4734_v60 = vmul.f32 %v4724_v31, %v4724_v31  ;;  %v4726_v61 = vadd.f32 %v4725_v32, %v4481_v24 }
0x1a33   : > { %v4727_v62 = vpop.f32.mrf.mxu0 }
0x1a34   : > { %v4742_v63 = vmul.f32 %v4734_v60, %v4724_v31  ;;  %v4735_v0 = vmul.f32 %v4726_v61, %v4726_v61  ;;  %v4728_v2 = vadd.f32 %v4727_v62, %v4477_v10 }
0x1a35   : > { %v4729_v3 = vpop.f32.mrf.mxu0 }
0x1a36   : > { %v4750_v5 = vmul.f32 0.044715, %v4742_v63  ;;  %v4743_v4 = vmul.f32 %v4735_v0, %v4726_v61  ;;  %v4738_v13 = vmul.f32 %v4728_v2, %v4728_v2  ;;  %v4730_v14 = vadd.f32 %v4729_v3, %v4481_v24 }
0x1a38   : > { %v4758_v18 = vadd.f32 %v4750_v5, %v4724_v31  ;;  %v4751_v37 = vmul.f32 0.044715, %v4743_v4  ;;  %v4746_v19 = vmul.f32 %v4738_v13, %v4728_v2  ;;  %v4739_v27 = vmul.f32 %v4730_v14, %v4730_v14 }
0x1a3a   : > { %v4766_v29 = vmul.f32 0.7978846, %v4758_v18  ;;  %v4759_v38 = vadd.f32 %v4751_v37, %v4726_v61  ;;  %v4754_v8 = vmul.f32 0.044715, %v4746_v19  ;;  %v4747_v25 = vmul.f32 %v4739_v27, %v4730_v14 }
0x1a3c   : > { %v4767_v26 = vmul.f32 0.7978846, %v4759_v38  ;;  %v4762_v28 = vadd.f32 %v4754_v8, %v4728_v2  ;;  %v4755_v34 = vmul.f32 0.044715, %v4747_v25  ;;  %6648 = vtanh.f32 %v4766_v29  ;;  %v5570_v25 = vld [vmem:[%s8038_s27] ss:$0 sm:$0xff]  ;;  %s7914_s27 = scalar_lea.hbm %s8040_s25, %s5578_s8 }
0x1a3e   : > { %6650 = vtanh.f32 %v4767_v26  ;;  %v4770_v36 = vmul.f32 0.7978846, %v4762_v28  ;;  %v4763_v39 = vadd.f32 %v4755_v34, %v4730_v14  ;;  %v5571_v28 = vld [vmem:[%s8039_s16] ss:$0 sm:$0xff]  ;;  %s6904_s16 = scalar_lea.vmem %s6903_s13, 512 }
0x1a3f   : > { %p6906_p3 = scmp.lt.s32.totalorder %s6904_s16, %s6898_s23 }
0x1a40   : > { %6652 = vtanh.f32 %v4770_v36  ;;  %v4771_v40 = vmul.f32 0.7978846, %v4763_v39 }
0x1a41   : > { %p6907_p4 = por %p6906_p3, %p6905_p1 }
0x1a42   : > { %6654 = vtanh.f32 %v4771_v40 }
0x1a43   : > { %p6908_p2 = pnand %p6907_p4, %p6901_p11 }
0x1a49   : > { %v6649_v17 = vpop.eup %6648 }
0x1a4a   : > { %v4782_v42 = vadd.f32 1.0, %v6649_v17 }
0x1a4b   : > { %v6651_v21 = vpop.eup %6650 }
0x1a4c   : > { %v4783_v41 = vadd.f32 1.0, %v6651_v21  ;;  %v4790_v43 = vmul.f32 0.5, %v4782_v42 }
0x1a4d   : > { %v6653_v58 = vpop.eup %6652 }
0x1a4e   : > { %v4786_v7 = vadd.f32 1.0, %v6653_v58  ;;  %v4791_v53 = vmul.f32 0.5, %v4783_v41  ;;  %v4798_v20 = vmul.f32 %v4790_v43, %v4724_v31  ;;  %v4445_v31 = vadd.f32 %v5494_v55, %v7884_v6 }
0x1a4f   : > { %v6655_v1 = vpop.eup %6654 }
0x1a50   : > { %v4794_v22 = vmul.f32 0.5, %v4786_v7  ;;  %v4787_v23 = vadd.f32 1.0, %v6655_v1  ;;  %v4799_v45 = vmul.f32 %v4791_v53, %v4726_v61  ;;  %v5044_v61 = vadd.f32 %v5780_v16, %v5537_v35 }
0x1a51   : > { %v5089_v0 = vadd.f32 %v4445_v31, %v7629_v33 }
0x1a52   : > { %v4795_v15 = vmul.f32 0.5, %v4787_v23  ;;  %v4802_v44 = vmul.f32 %v4794_v22, %v4728_v2 }
0x1a54   : > { %v4803_v46 = vmul.f32 %v4795_v15, %v4730_v14  ;;  %v4806_v50 = vpack.c.bf16 %v4802_v44, %v4798_v20 }
0x1a56   : > { %v4807_v48 = vpack.c.bf16 %v4803_v46, %v4799_v45 }
0x1a58   : > { %5079 = vmatprep.mubr.bf16.mxu0 %v4807_v48 }
0x1a59   : > { %5080 = vmatmul.mubr.bf16.vlgmr.msra.gmra.mxu0 %v4806_v50 }
0x1b19   : > { %v5797_v56 = vpop.f32.mrf.mxu0 }
0x1b1b   : > { %v5798_v9 = vpop.f32.mrf.mxu0 }
0x1b1c   : > { %v5799_v10 = vadd.f32 %v5798_v9, %v5797_v56 }
0x1b1d   : > { %v5800_v24 = vpop.f32.mrf.mxu0 }
0x1b1e   : > { %v5082_v32 = vadd.f32 %v5799_v10, %v5041_v59 }
0x1b1f   : > { %v5801_v60 = vpop.f32.mrf.mxu0 }
0x1b20   : > { %v5802_v62 = vadd.f32 %v5801_v60, %v5800_v24  ;;  %v5090_v63 = vadd.f32 %v5088_v51, %v5082_v32 }
0x1b22   : > { %v5085_v2 = vadd.f32 %v5802_v62, %v5044_v61  ;;  %5092 = vadd.xlane.f32.xlu0 %v5090_v63 }
0x1b24   : > { %v5091_v3 = vadd.f32 %v5089_v0, %v5085_v2 }
0x1b26   : > { %5094 = vadd.xlane.f32.xlu1 %v5091_v3 }
0x1bab   : > { %v5093_v30 = vpop.xlane.xlu0 %5092 }
0x1bac   : > { %v5096_v5 = vmul.f32 0.0078125, %v5093_v30 }
0x1bae   : > { %v5098_v4 = vsub.f32 %v5090_v63, %v5096_v5 }
0x1baf   : > { %v5095_v13 = vpop.xlane.xlu1 %5094 }
0x1bb0   : > { %v5097_v14 = vmul.f32 0.0078125, %v5095_v13  ;;  %v5100_v18 = vmul.f32 %v5098_v4, %v5098_v4 }
0x1bb2   : > { %v5099_v49 = vsub.f32 %v5091_v3, %v5097_v14  ;;  %5102 = vadd.xlane.f32.xlu0 %v5100_v18 }
0x1bb4   : > { %v5101_v6 = vmul.f32 %v5099_v49, %v5099_v49 }
0x1bb6   : > { %5104 = vadd.xlane.f32.xlu0 %v5101_v6 }
0x1c3b   : > { %v5103_v37 = vpop.xlane.xlu0 %5102 }
0x1c3c   : > { %v5106_v19 = vmul.f32 0.0078125, %v5103_v37 }
0x1c3e   : > { %v5108_v27 = vadd.f32 1e-05, %v5106_v19 }
0x1c3f   : > { %v5105_v33 = vpop.xlane.xlu0 %5104 }
0x1c40   : > { %6656 = vrsqrt.f32 %v5108_v27  ;;  %v5107_v29 = vmul.f32 0.0078125, %v5105_v33 }
0x1c42   : > { %v5109_v38 = vadd.f32 1e-05, %v5107_v29 }
0x1c44   : > { %6658 = vrsqrt.f32 %v5109_v38 }
0x1c4d   : > { %v6657_v8 = vpop.eup %6656 }
0x1c4e   : > { %v5112_v26 = vmul.f32 %v6657_v8, %v5098_v4 }
0x1c50   : > { %v5120_v34 = vmul.f32 %v5570_v25, %v5112_v26 }
0x1c51   : > { %v6659_v36 = vpop.eup %6658 }
0x1c52   : > { %v5128_v39 = vadd.f32 %v5571_v28, %v5120_v34  ;;  %v5113_v40 = vmul.f32 %v6659_v36, %v5099_v49 }
0x1c54   : > { %v5121_v17 = vmul.f32 %v5570_v25, %v5113_v40  ;;  %5130 = vst [vmem:[%s736_s19] sm:$0xff] %v5128_v39 }
0x1c56   : > { %v5129_v21 = vadd.f32 %v5571_v28, %v5121_v17 }
0x1c58   : > { %5131 = vst [vmem:[%s736_s19 + $0x8] sm:$0xff] %v5129_v21 }
0x1c59   : > { %6911 = shalt.err (!%p6908_p2)
}
0x1c5a   : > { %s6912_s8 = scalar_lea.hbm %s7914_s27, 256  ;;  %s6916_s29 = scalar_lea.hbm %s8040_s25, 512 }
0x1c5b   : > { %p6913_p6 = scmp.ne.s32.totalorder %s7914_s27, %s6912_s8  ;;  %p6917_p12 = scmp.lt.s32.totalorder %s7914_s27, %s8040_s25 }
0x1c5c   : > { %p6918_p13 = scmp.lt.s32.totalorder %s6916_s29, %s6912_s8 }
0x1c5d   : > { %p6914_p9 = pnand %p6913_p6, %p8041_p5 }
0x1c5e   : > { %p6919_p0 = por %p6918_p13, %p6917_p12 }
0x1c5f   : > { %p6915_p7 = pneg %p6914_p9 }
0x1c61   : > { %p6920_p8 = pnand %p6919_p0, %p6915_p7 }
0x1c63   : > { %6923 = shalt.err (!%p6920_p8)
}
0x1c64   : > { %s7004_s23 = smov 128   ;;  %s7005_s13 = smov 8  }
0x1c65   : > { %s8042_s16 = scalar_lea.sflag [#allocation4], %s7307_s11 }
0x1c66   : > { %6189 = dma.vmem_to_hbm [thread:$0]  (%p8041_p5), %s7916_s1, 256, %s7914_s27, %s8042_s16, %s7004_s23, %s7004_s23, %s7005_s13  }
0x1c67 PF: > { %s5161_s19 = sand.u32 1, %s6966_s0   ;;  %p8043_p10 = scmp.ne.s32.totalorder %s8022_s17, 0 }
0x1c68   : > { %p8044_p11 = scmp.ge.s32.totalorder %s6978_s21, 2  ;;  %s5162_s26 = scalar_lea.sflag [#allocation4], %s5161_s19 }
0x1c6a   : > { %p6221_p1 = pnand %p8044_p11, %p8043_p10 }
0x1c6c   : > { %p6222_p3 = pneg %p6221_p1 }
0x1c6e   : > { %6961 = dma.done.wait (%p6222_p3), %s5162_s26, 256  }
0x1c6f   : > { %6963 = vsyncadd (%p6222_p3), %s5162_s26, 4294967040  ;;  %p36_p4 = scmp.ge.s32.totalorder %s7241_s28, 4   ;;  %s8045_s0 = smov %s6970_s30 }
0x1c70   : > { %s8046_s30 = smov %s6974_s20  ;;  %s8047_s20 = smov %s7253_s3 }
0x1c71   : > { %s8048_s21 = smov %s7241_s28  ;;  %38 = sbr.rel (!%p36_p4) target bundleno = 24 (0x18), region = 189 }
0x1c76   :  { %5167 = vsyncpa [#allocation3], 1 }
0x1c77   :  { %5169 = vsyncpa [#allocation3 + $0x1], 1 }
0x1c78   :  { %5170 = vsyncpa [#allocation6], 1 }
0x1c79   :  { %5171 = vsyncpa [#allocation9], 1 }
0x1c7a   :  { %5172 = vsyncpa [#allocation12], 1 }
0x1c7b   :  { %5173 = vsyncpa [#allocation15], 1 }
0x1c7c   :  { %5174 = vsyncpa [#allocation4], 1 }
0x1c7d   :  { %5176 = vsyncpa [#allocation4 + $0x1], 1 }

</bundles_post_ra>
